<compile_context>
chip_gen: v5e
topology: v5e:2x2
jax: 0.10.0
libtpu: 0.0.40
codegen_flags: <defaults>
</compile_context>

<pallas_src>
import functools

import jax
import jax.numpy as jnp
from jax.experimental import pallas as pl
from jax.experimental.pallas import tpu as pltpu

NEG_SLOPE = 0.01          # PyTorch F.leaky_relu default
NEG_INF = -1e30           # Python float (never captured as a jnp constant)
H1 = 256
H2_REAL, H2_PAD = 84, 128


def _leaky_relu(x):
    return jnp.where(x > 0, x, NEG_SLOPE * x)


def policy_kernel(a_real,
                  x_ref, w1_ref, b1_ref, w2_ref, b2_ref, w3_ref, b3_ref,
                  u_ref, tri_ref,
                  scalars_ref, probs_ref):
    # --- MLP trunk: bf16 operands on the MXU, f32 accumulate, f32 VPU math ---
    x = x_ref[...].astype(jnp.bfloat16)
    h1 = _leaky_relu(
        jnp.dot(x, w1_ref[...], preferred_element_type=jnp.float32) + b1_ref[...])
    h2 = _leaky_relu(
        jnp.dot(h1.astype(jnp.bfloat16), w2_ref[...],
                preferred_element_type=jnp.float32) + b2_ref[...])
    # Padded action columns of w3 are zero and b3 is -1e30 there, so the mask
    # is already baked into the logits.
    logits = (jnp.dot(h2.astype(jnp.bfloat16), w3_ref[...],
                      preferred_element_type=jnp.float32) + b3_ref[...])

    tb, a_pad = logits.shape
    lane = jax.lax.broadcasted_iota(jnp.int32, (tb, a_pad), 1)
    valid = lane < a_real

    # --- softmax (dim=1), numerically stabilized, f32 ---
    m = jnp.max(logits, axis=-1, keepdims=True)
    z = logits - m
    e = jnp.exp(z)                                   # padded lanes -> exp(-1e30)=0
    denom = jnp.sum(e, axis=-1, keepdims=True)
    inv = pl.reciprocal(denom, approx=False)         # EUP, replaces full-width divide
    probs = e * inv
    probs_ref[...] = probs

    # --- categorical sample via inverse CDF (uniforms supplied externally).
    # tri[k, j] = 1 if k <= j  ->  cdf = probs @ tri (cumulative sum over actions)
    cdf = jnp.dot(probs.astype(jnp.bfloat16), tri_ref[...],
                  preferred_element_type=jnp.float32)
    u = u_ref[...]                                                  # (TB, 1)
    count = jnp.sum(jnp.where((cdf <= u) & valid, 1.0, 0.0),
                    axis=-1, keepdims=True)
    idx_f = jnp.minimum(count, float(a_real - 1))                   # (TB, 1)
    idx_i = idx_f.astype(jnp.int32)

    # --- gathered log-prob without materializing log_probs:
    # log_softmax[idx] = z[idx] - log(denom)   (sum(onehot) == 1)
    onehot = (lane == idx_i).astype(jnp.float32)
    z_idx = jnp.sum(z * onehot, axis=-1, keepdims=True)             # (TB, 1)
    gathered = z_idx - jnp.log(denom)

    # --- lane-dense scalar outputs: pack idx / logp into lanes 0,1 of a tiny
    # (TB, 8) slab, transpose once, store both as one full-width (2, TB) block.
    lane8 = jax.lax.broadcasted_iota(jnp.int32, (tb, 8), 1)
    packed = jnp.where(lane8 == 0, idx_f, jnp.where(lane8 == 1, gathered, 0.0))
    packed_t = jnp.transpose(packed)                                # (8, TB)
    scalars_ref[...] = packed_t[0:2, :]


def _pick_tb(b):
    """Rows per grid step: large (<=512) to amortize per-step overhead, but keep
    >= 2 grid steps when possible so v7x's two TensorCores both get work."""
    bp = pl.cdiv(b, 128) * 128
    tb = min(512, bp)
    if bp // tb < 2 and bp >= 256:
        tb = max(128, ((bp // 2) // 128) * 128)
    return tb


def policy_forward(obs, params, u, tri):
    """Returns (int_act, probs, gathered_log_prob) — the PyTorch
    forward(obs, return_all_probs=True) output ordering."""
    B, D = obs.shape
    a_real = params["n_actions"]
    a_pad = params["w3"].shape[1]

    tb = _pick_tb(B)
    Bp = pl.cdiv(B, tb) * tb
    if Bp != B:
        obs = jnp.pad(obs, ((0, Bp - B), (0, 0)))
        u = jnp.pad(u, ((0, Bp - B), (0, 0)), constant_values=0.5)

    resident = lambda i: (0, 0)
    kernel = functools.partial(policy_kernel, a_real)

    scalars, probs_pad = pl.pallas_call(
        kernel,
        out_shape=(
            jax.ShapeDtypeStruct((2, Bp), jnp.float32),      # row0: ids, row1: logp
            jax.ShapeDtypeStruct((Bp, a_pad), jnp.float32),  # probs (padded cols)
        ),
        grid_spec=pltpu.PrefetchScalarGridSpec(
            num_scalar_prefetch=0,
            grid=(Bp // tb,),
            in_specs=[
                pl.BlockSpec((tb, D), lambda i: (i, 0)),      # obs tile
                pl.BlockSpec((D, H1), resident),              # w1 (bf16)
                pl.BlockSpec((1, H1), resident),              # b1
                pl.BlockSpec((H1, H2_PAD), resident),         # w2 (bf16)
                pl.BlockSpec((1, H2_PAD), resident),          # b2
                pl.BlockSpec((H2_PAD, a_pad), resident),      # w3 (bf16)
                pl.BlockSpec((1, a_pad), resident),           # b3 (mask baked in)
                pl.BlockSpec((tb, 1), lambda i: (i, 0)),      # uniforms tile
                pl.BlockSpec((a_pad, a_pad), resident),       # tri (bf16 CDF matrix)
            ],
            out_specs=(
                pl.BlockSpec((2, tb), lambda i: (0, i)),      # ids+logp (lane-dense)
                pl.BlockSpec((tb, a_pad), lambda i: (i, 0)),  # probs
            ),
        ),
        compiler_params=pltpu.CompilerParams(
            dimension_semantics=("parallel",),
            vmem_limit_bytes=32 * 1024 * 1024),
    )(obs, params["w1"], params["b1"], params["w2"], params["b2"],
      params["w3"], params["b3"], u, tri)

    int_act = scalars[0, :B].astype(jnp.int32).reshape(B, 1)
    logp = scalars[1, :B].reshape(B, 1)
    probs = probs_pad[:B, :a_real]
    return int_act, probs, logp


def init_params(key, obs_dim, n_actions):
    """PyTorch nn.Linear-style init U(-1/sqrt(fan_in), 1/sqrt(fan_in)).
    Weights stored transposed (in, out), zero-padded to lane-aligned widths
    (hidden 84 -> 128, actions -> multiple of 128) and cast to bfloat16.
    b3 padding columns are set to -1e30 so the padded logits are pre-masked."""
    a_pad = pl.cdiv(n_actions, 128) * 128

    def linear(k, in_pad, out_pad, in_real, out_real, mask_pad_bias=False):
        kw, kb = jax.random.split(k)
        bound = 1.0 / jnp.sqrt(float(in_real))
        w = jnp.zeros((in_pad, out_pad), jnp.float32)
        b = jnp.zeros((1, out_pad), jnp.float32)
        w = w.at[:in_real, :out_real].set(
            jax.random.uniform(kw, (in_real, out_real), jnp.float32, -bound, bound))
        b = b.at[:, :out_real].set(
            jax.random.uniform(kb, (1, out_real), jnp.float32, -bound, bound))
        if mask_pad_bias and out_real < out_pad:
            b = b.at[:, out_real:].set(NEG_INF)
        return w.astype(jnp.bfloat16), b

    k1, k2, k3 = jax.random.split(key, 3)
    w1, b1 = linear(k1, obs_dim, H1, obs_dim, H1)
    w2, b2 = linear(k2, H1, H2_PAD, H1, H2_REAL)
    w3, b3 = linear(k3, H2_PAD, a_pad, H2_REAL, n_actions, mask_pad_bias=True)
    return {"w1": w1, "b1": b1, "w2": w2, "b2": b2, "w3": w3, "b3": b3,
            "n_actions": n_actions}


def make_tri(a_pad):
    # tri[k, j] = 1 if k <= j (exactly representable in bf16; precomputed on host)
    k = jnp.arange(a_pad)[:, None]
    j = jnp.arange(a_pad)[None, :]
    return (k <= j).astype(jnp.bfloat16)


if __name__ == "__main__":
    # Modest batch: TB auto-selects 256 so the grid has 2 steps (megacore-friendly).
    B, OBS_DIM, N_ACTIONS = 512, 64, 18

    key = jax.random.PRNGKey(0)
    k_obs, k_params, k_u = jax.random.split(key, 3)

    obs = jax.random.normal(k_obs, (B, OBS_DIM), jnp.float32)
    params = init_params(k_params, OBS_DIM, N_ACTIONS)
    # TODO(synk): torch.multinomial's RNG stream has no Pallas equivalent; we
    # sample via inverse-CDF driven by these externally supplied uniforms.
    u = jax.random.uniform(k_u, (B, 1), jnp.float32)
    tri = make_tri(params["w3"].shape[1])

    int_act, probs, logp = policy_forward(obs, params, u, tri)
    jax.block_until_ready((int_act, probs, logp))

    # Sanity checks: valid action ids, normalized probs, gathered log-prob matches.
    assert int_act.shape == (B, 1) and int_act.dtype == jnp.int32
    assert probs.shape == (B, N_ACTIONS)
    assert logp.shape == (B, 1)
    assert bool(jnp.all((int_act >= 0) & (int_act < N_ACTIONS)))
    assert bool(jnp.allclose(jnp.sum(probs, axis=-1), 1.0, atol=1e-4))
    ref_logp = jnp.take_along_axis(jnp.log(probs), int_act, axis=1)
    assert bool(jnp.allclose(logp, ref_logp, atol=1e-4))

    print("KERNEL_OK")
</pallas_src>

<mosaic_0001>
module attributes {stable_mosaic.version = 11 : i64} {
  func.func @policy_kernel(%arg0: i32, %arg1: memref<256x64xf32, #tpu.memory_space<vmem>>, %arg2: memref<64x256xbf16, #tpu.memory_space<vmem>>, %arg3: memref<1x256xf32, #tpu.memory_space<vmem>>, %arg4: memref<256x128xbf16, #tpu.memory_space<vmem>>, %arg5: memref<1x128xf32, #tpu.memory_space<vmem>>, %arg6: memref<128x128xbf16, #tpu.memory_space<vmem>>, %arg7: memref<1x128xf32, #tpu.memory_space<vmem>>, %arg8: memref<256x1xf32, #tpu.memory_space<vmem>>, %arg9: memref<128x128xbf16, #tpu.memory_space<vmem>>, %arg10: memref<2x256xf32, #tpu.memory_space<vmem>>, %arg11: memref<256x128xf32, #tpu.memory_space<vmem>>) attributes {dimension_semantics = [#tpu.dimension_semantics<parallel>], iteration_bounds = array<i64: 2>, scalar_prefetch = 0 : i64, scratch_operands = 0 : i64, tpu.core_type = #tpu.core_type<tc>, window_params = [{transform_indices = @transform_0, window_bounds = array<i64: 256, 64>}, {pipeline_mode = #tpu.pipeline_mode<synchronous>, transform_indices = @transform_1, window_bounds = array<i64: 64, 256>}, {pipeline_mode = #tpu.pipeline_mode<synchronous>, transform_indices = @transform_2, window_bounds = array<i64: 1, 256>}, {pipeline_mode = #tpu.pipeline_mode<synchronous>, transform_indices = @transform_3, window_bounds = array<i64: 256, 128>}, {pipeline_mode = #tpu.pipeline_mode<synchronous>, transform_indices = @transform_4, window_bounds = array<i64: 1, 128>}, {pipeline_mode = #tpu.pipeline_mode<synchronous>, transform_indices = @transform_5, window_bounds = array<i64: 128, 128>}, {pipeline_mode = #tpu.pipeline_mode<synchronous>, transform_indices = @transform_6, window_bounds = array<i64: 1, 128>}, {transform_indices = @transform_7, window_bounds = array<i64: 256, 1>}, {pipeline_mode = #tpu.pipeline_mode<synchronous>, transform_indices = @transform_8, window_bounds = array<i64: 128, 128>}, {transform_indices = @transform_9, window_bounds = array<i64: 2, 256>}, {transform_indices = @transform_10, window_bounds = array<i64: 256, 128>}]} {
    %c0 = arith.constant 0 : index
    %c0_0 = arith.constant 0 : index
    %0 = vector.load %arg1[%c0, %c0_0] : memref<256x64xf32, #tpu.memory_space<vmem>>, vector<256x64xf32>
    %1 = arith.truncf %0 : vector<256x64xf32> to vector<256x64xbf16>
    %c0_1 = arith.constant 0 : index
    %c0_2 = arith.constant 0 : index
    %2 = vector.load %arg2[%c0_1, %c0_2] : memref<64x256xbf16, #tpu.memory_space<vmem>>, vector<64x256xbf16>
    %cst = arith.constant dense<0.000000e+00> : vector<256x256xf32>
    %3 = tpu.matmul %1, %2, %cst {dimension_numbers = #tpu.dot_dimension_numbers<[1], [0], [0], [1], [0, 0, 1, 1], [], []>} : vector<256x64xbf16>, vector<64x256xbf16>, vector<256x256xf32> -> vector<256x256xf32>
    %c0_3 = arith.constant 0 : index
    %c0_4 = arith.constant 0 : index
    %4 = vector.load %arg3[%c0_3, %c0_4] : memref<1x256xf32, #tpu.memory_space<vmem>>, vector<1x256xf32>
    %5 = vector.broadcast %4 : vector<1x256xf32> to vector<256x256xf32>
    %6 = arith.addf %3, %5 : vector<256x256xf32>
    %cst_5 = arith.constant 0.000000e+00 : f32
    %7 = vector.broadcast %cst_5 : f32 to vector<256x256xf32>
    %8 = arith.cmpf ogt, %6, %7 : vector<256x256xf32>
    %cst_6 = arith.constant 0.00999999977 : f32
    %9 = vector.broadcast %cst_6 : f32 to vector<256x256xf32>
    %10 = arith.mulf %9, %6 : vector<256x256xf32>
    %11 = arith.select %8, %6, %10 : vector<256x256xi1>, vector<256x256xf32>
    %12 = arith.truncf %11 : vector<256x256xf32> to vector<256x256xbf16>
    %c0_7 = arith.constant 0 : index
    %c0_8 = arith.constant 0 : index
    %13 = vector.load %arg4[%c0_7, %c0_8] : memref<256x128xbf16, #tpu.memory_space<vmem>>, vector<256x128xbf16>
    %cst_9 = arith.constant dense<0.000000e+00> : vector<256x128xf32>
    %14 = tpu.matmul %12, %13, %cst_9 {dimension_numbers = #tpu.dot_dimension_numbers<[1], [0], [0], [1], [0, 0, 1, 1], [], []>} : vector<256x256xbf16>, vector<256x128xbf16>, vector<256x128xf32> -> vector<256x128xf32>
    %c0_10 = arith.constant 0 : index
    %c0_11 = arith.constant 0 : index
    %15 = vector.load %arg5[%c0_10, %c0_11] : memref<1x128xf32, #tpu.memory_space<vmem>>, vector<1x128xf32>
    %16 = vector.broadcast %15 : vector<1x128xf32> to vector<256x128xf32>
    %17 = arith.addf %14, %16 : vector<256x128xf32>
    %cst_12 = arith.constant 0.000000e+00 : f32
    %18 = vector.broadcast %cst_12 : f32 to vector<256x128xf32>
    %19 = arith.cmpf ogt, %17, %18 : vector<256x128xf32>
    %cst_13 = arith.constant 0.00999999977 : f32
    %20 = vector.broadcast %cst_13 : f32 to vector<256x128xf32>
    %21 = arith.mulf %20, %17 : vector<256x128xf32>
    %22 = arith.select %19, %17, %21 : vector<256x128xi1>, vector<256x128xf32>
    %23 = arith.truncf %22 : vector<256x128xf32> to vector<256x128xbf16>
    %c0_14 = arith.constant 0 : index
    %c0_15 = arith.constant 0 : index
    %24 = vector.load %arg6[%c0_14, %c0_15] : memref<128x128xbf16, #tpu.memory_space<vmem>>, vector<128x128xbf16>
    %cst_16 = arith.constant dense<0.000000e+00> : vector<256x128xf32>
    %25 = tpu.matmul %23, %24, %cst_16 {dimension_numbers = #tpu.dot_dimension_numbers<[1], [0], [0], [1], [0, 0, 1, 1], [], []>} : vector<256x128xbf16>, vector<128x128xbf16>, vector<256x128xf32> -> vector<256x128xf32>
    %c0_17 = arith.constant 0 : index
    %c0_18 = arith.constant 0 : index
    %26 = vector.load %arg7[%c0_17, %c0_18] : memref<1x128xf32, #tpu.memory_space<vmem>>, vector<1x128xf32>
    %27 = vector.broadcast %26 : vector<1x128xf32> to vector<256x128xf32>
    %28 = arith.addf %25, %27 : vector<256x128xf32>
    %29 = tpu.iota {dimensions = array<i32: 1>} : vector<256x128xi32>
    %c18_i32 = arith.constant 18 : i32
    %30 = vector.broadcast %c18_i32 : i32 to vector<256x128xi32>
    %31 = arith.cmpi slt, %29, %30 : vector<256x128xi32>
    %cst_19 = arith.constant dense<0xFF800000> : vector<256xf32>
    %32 = vector.multi_reduction <maximumf>, %28, %cst_19 [1] : vector<256x128xf32> to vector<256xf32>
    %33 = vector.shape_cast %32 : vector<256xf32> to vector<256x1xf32>
    %34 = vector.broadcast %33 : vector<256x1xf32> to vector<256x128xf32>
    %35 = arith.subf %28, %34 : vector<256x128xf32>
    %36 = math.exp %35 : vector<256x128xf32>
    %cst_20 = arith.constant dense<0.000000e+00> : vector<256xf32>
    %37 = vector.multi_reduction <add>, %36, %cst_20 [1] : vector<256x128xf32> to vector<256xf32>
    %38 = vector.shape_cast %37 : vector<256xf32> to vector<256x1xf32>
    %39 = tpu.reciprocal %38 : vector<256x1xf32> -> vector<256x1xf32>
    %40 = vector.broadcast %39 : vector<256x1xf32> to vector<256x128xf32>
    %41 = arith.mulf %36, %40 : vector<256x128xf32>
    %c0_21 = arith.constant 0 : index
    %c0_22 = arith.constant 0 : index
    %42 = vector.load %arg11[%c0_21, %c0_22] : memref<256x128xf32, #tpu.memory_space<vmem>>, vector<256x128xf32>
    tpu.vector_store %arg11[%c0_21, %c0_22], %41 {strides = array<i32>} : memref<256x128xf32, #tpu.memory_space<vmem>>, vector<256x128xf32>,
    %43 = arith.truncf %41 : vector<256x128xf32> to vector<256x128xbf16>
    %c0_23 = arith.constant 0 : index
    %c0_24 = arith.constant 0 : index
    %44 = vector.load %arg9[%c0_23, %c0_24] : memref<128x128xbf16, #tpu.memory_space<vmem>>, vector<128x128xbf16>
    %cst_25 = arith.constant dense<0.000000e+00> : vector<256x128xf32>
    %45 = tpu.matmul %43, %44, %cst_25 {dimension_numbers = #tpu.dot_dimension_numbers<[1], [0], [0], [1], [0, 0, 1, 1], [], []>} : vector<256x128xbf16>, vector<128x128xbf16>, vector<256x128xf32> -> vector<256x128xf32>
    %c0_26 = arith.constant 0 : index
    %c0_27 = arith.constant 0 : index
    %46 = vector.load %arg8[%c0_26, %c0_27] : memref<256x1xf32, #tpu.memory_space<vmem>>, vector<256x1xf32>
    %47 = vector.broadcast %46 : vector<256x1xf32> to vector<256x128xf32>
    %48 = arith.cmpf ole, %45, %47 : vector<256x128xf32>
    %49 = arith.andi %48, %31 : vector<256x128xi1>
    %cst_28 = arith.constant 1.000000e+00 : f32
    %cst_29 = arith.constant 0.000000e+00 : f32
    %50 = vector.broadcast %cst_28 : f32 to vector<256x128xf32>
    %51 = vector.broadcast %cst_29 : f32 to vector<256x128xf32>
    %52 = arith.select %49, %50, %51 : vector<256x128xi1>, vector<256x128xf32>
    %cst_30 = arith.constant dense<0.000000e+00> : vector<256xf32>
    %53 = vector.multi_reduction <add>, %52, %cst_30 [1] : vector<256x128xf32> to vector<256xf32>
    %54 = vector.shape_cast %53 : vector<256xf32> to vector<256x1xf32>
    %cst_31 = arith.constant 1.700000e+01 : f32
    %55 = vector.broadcast %cst_31 : f32 to vector<256x1xf32>
    %56 = arith.minimumf %54, %55 : vector<256x1xf32>
    %57 = arith.fptosi %56 : vector<256x1xf32> to vector<256x1xi32>
    %58 = vector.broadcast %57 : vector<256x1xi32> to vector<256x128xi32>
    %59 = arith.cmpi eq, %29, %58 : vector<256x128xi32>
    %60 = arith.extui %59 : vector<256x128xi1> to vector<256x128xi32>
    %61 = arith.sitofp %60 : vector<256x128xi32> to vector<256x128xf32>
    %62 = arith.mulf %35, %61 : vector<256x128xf32>
    %cst_32 = arith.constant dense<0.000000e+00> : vector<256xf32>
    %63 = vector.multi_reduction <add>, %62, %cst_32 [1] : vector<256x128xf32> to vector<256xf32>
    %64 = vector.shape_cast %63 : vector<256xf32> to vector<256x1xf32>
    %65 = math.log %38 : vector<256x1xf32>
    %66 = arith.subf %64, %65 : vector<256x1xf32>
    %67 = tpu.iota {dimensions = array<i32: 1>} : vector<256x8xi32>
    %c0_i32 = arith.constant 0 : i32
    %68 = vector.broadcast %c0_i32 : i32 to vector<256x8xi32>
    %69 = arith.cmpi eq, %67, %68 : vector<256x8xi32>
    %c1_i32 = arith.constant 1 : i32
    %70 = vector.broadcast %c1_i32 : i32 to vector<256x8xi32>
    %71 = arith.cmpi eq, %67, %70 : vector<256x8xi32>
    %cst_33 = arith.constant 0.000000e+00 : f32
    %72 = vector.shape_cast %66 : vector<256x1xf32> to vector<256x1xf32>
    %73 = vector.broadcast %72 : vector<256x1xf32> to vector<256x8xf32>
    %74 = vector.broadcast %cst_33 : f32 to vector<256x8xf32>
    %75 = arith.select %71, %73, %74 : vector<256x8xi1>, vector<256x8xf32>
    %76 = vector.shape_cast %56 : vector<256x1xf32> to vector<256x1xf32>
    %77 = vector.broadcast %76 : vector<256x1xf32> to vector<256x8xf32>
    %78 = arith.select %69, %77, %75 : vector<256x8xi1>, vector<256x8xf32>
    %79 = tpu.transpose %78, [1, 0] : vector<256x8xf32> -> vector<8x256xf32>
    %80 = vector.extract_strided_slice %79 {offsets = [0, 0], sizes = [2, 256], strides = [1, 1]} : vector<8x256xf32> to vector<2x256xf32>
    %c0_34 = arith.constant 0 : index
    %c0_35 = arith.constant 0 : index
    %81 = vector.load %arg10[%c0_34, %c0_35] : memref<2x256xf32, #tpu.memory_space<vmem>>, vector<2x256xf32>
    tpu.vector_store %arg10[%c0_34, %c0_35], %80 {strides = array<i32>} : memref<2x256xf32, #tpu.memory_space<vmem>>, vector<2x256xf32>,
    return
  }
  func.func @transform_0(%arg0: i32) -> (i32, i32) {
    %c0_i32 = arith.constant 0 : i32
    %c0_i32_0 = arith.constant 0 : i32
    return %arg0, %c0_i32 : i32, i32
  }
  func.func @transform_1(%arg0: i32) -> (i32, i32) {
    %c0_i32 = arith.constant 0 : i32
    %c0_i32_0 = arith.constant 0 : i32
    %c0_i32_1 = arith.constant 0 : i32
    return %c0_i32, %c0_i32_0 : i32, i32
  }
  func.func @transform_2(%arg0: i32) -> (i32, i32) {
    %c0_i32 = arith.constant 0 : i32
    %c0_i32_0 = arith.constant 0 : i32
    %c0_i32_1 = arith.constant 0 : i32
    return %c0_i32, %c0_i32_0 : i32, i32
  }
  func.func @transform_3(%arg0: i32) -> (i32, i32) {
    %c0_i32 = arith.constant 0 : i32
    %c0_i32_0 = arith.constant 0 : i32
    %c0_i32_1 = arith.constant 0 : i32
    return %c0_i32, %c0_i32_0 : i32, i32
  }
  func.func @transform_4(%arg0: i32) -> (i32, i32) {
    %c0_i32 = arith.constant 0 : i32
    %c0_i32_0 = arith.constant 0 : i32
    %c0_i32_1 = arith.constant 0 : i32
    return %c0_i32, %c0_i32_0 : i32, i32
  }
  func.func @transform_5(%arg0: i32) -> (i32, i32) {
    %c0_i32 = arith.constant 0 : i32
    %c0_i32_0 = arith.constant 0 : i32
    %c0_i32_1 = arith.constant 0 : i32
    return %c0_i32, %c0_i32_0 : i32, i32
  }
  func.func @transform_6(%arg0: i32) -> (i32, i32) {
    %c0_i32 = arith.constant 0 : i32
    %c0_i32_0 = arith.constant 0 : i32
    %c0_i32_1 = arith.constant 0 : i32
    return %c0_i32, %c0_i32_0 : i32, i32
  }
  func.func @transform_7(%arg0: i32) -> (i32, i32) {
    %c0_i32 = arith.constant 0 : i32
    %c0_i32_0 = arith.constant 0 : i32
    return %arg0, %c0_i32 : i32, i32
  }
  func.func @transform_8(%arg0: i32) -> (i32, i32) {
    %c0_i32 = arith.constant 0 : i32
    %c0_i32_0 = arith.constant 0 : i32
    %c0_i32_1 = arith.constant 0 : i32
    return %c0_i32, %c0_i32_0 : i32, i32
  }
  func.func @transform_9(%arg0: i32) -> (i32, i32) {
    %c0_i32 = arith.constant 0 : i32
    %c0_i32_0 = arith.constant 0 : i32
    return %c0_i32, %arg0 : i32, i32
  }
  func.func @transform_10(%arg0: i32) -> (i32, i32) {
    %c0_i32 = arith.constant 0 : i32
    %c0_i32_0 = arith.constant 0 : i32
    return %arg0, %c0_i32 : i32, i32
  }
}

</mosaic_0001>

<bundles_post_ra>
// kernel: tpu_custom_call.1
= control target key start
LH: loop header
LB: loop body
LE: loop exit
PB: predicated region body
PF: predicated region fallthrough
CT: control target
= control target key end

     0   :  { %s6511_s0 = inlined_call_operand.vmem [shape: f32[512,64], index: 0, kind: input, shape index: {}]   ;;  %s6512_s1 = inlined_call_operand.vmem [shape: bf16[64,256], index: 1, kind: input, shape index: {}]   ;;  %s6513_s2 = inlined_call_operand.vmem [shape: f32[1,256], index: 2, kind: input, shape index: {}]   ;;  %s6514_s3 = inlined_call_operand.vmem [shape: bf16[256,128], index: 3, kind: input, shape index: {}]   ;;  %s6515_s4 = inlined_call_operand.vmem [shape: f32[1,128], index: 4, kind: input, shape index: {}]   ;;  %s6516_s5 = inlined_call_operand.vmem [shape: bf16[128,128], index: 5, kind: input, shape index: {}]   ;;  %s6517_s6 = inlined_call_operand.vmem [shape: f32[1,128], index: 6, kind: input, shape index: {}]   ;;  %s6518_s7 = inlined_call_operand.vmem [shape: f32[512,1], index: 7, kind: input, shape index: {}]   ;;  %s6519_s8 = inlined_call_operand.vmem [shape: bf16[128,128], index: 8, kind: input, shape index: {}]   ;;  %s6520_s9 = inlined_call_operand.hbm [shape: f32[2,512], index: 9, kind: output, shape index: {0}]   ;;  %s6521_s10 = inlined_call_operand.hbm [shape: f32[512,128], index: 10, kind: output, shape index: {1}]  }
   0x1   :  { %6597 = sst [smem:[#allocation67_spill]] %s6511_s0 }
   0x2   :  { %6598 = sst [smem:[#allocation68_spill]] %s6512_s1 }
   0x3   :  { %16 = vsyncpa [#allocation3], 0 }
   0x4   :  { %18 = vsyncpa [#allocation3 + $0x1], 0 }
   0x5   :  { %19 = vsyncpa [#allocation5], 0 }
   0x6   :  { %21 = vsyncpa [#allocation5 + $0x1], 0  ;;  %s4280_s13 = smov 0   ;;  %s4282_s14 = smov 0  }
   0x7   :  { %s4284_s15 = smov 0   ;;  %s4286_s16 = smov 0  }
   0x8 LB: > { %s4301_s17 = sadd.s32 4294967295, %s4219_s16   ;;  %s3420_s18 = sadd.s32 4294967294, %s4219_s16   ;;  %s4219_s16 = sphi %s4286_s16, %s6785_s16   ;;  %s4215_s15 = sphi %s4284_s15, %s6784_s15   ;;  %s4211_s14 = sphi %s4282_s14, %s6783_s14   ;;  %s4207_s13 = sphi %s4280_s13, %s6782_s13  }
   0x9   : > { %s4305_s19 = sadd.s32 1, %s4219_s16   ;;  %s233_s20 = sadd.s32 1, %s4215_s15 }
   0xa   : > { %s230_s21 = ssub.s32 %s4219_s16, %s4305_s19  ;;  %p243_p0 = scmp.ne.s32.totalorder %s4215_s15, %s4211_s14 }
   0xb   : > { %p231_p1 = scmp.eq.s32.totalorder %s230_s21, 0  ;;  %p244_p2 = scmp.eq.s32.totalorder %s4301_s17, 1 }
   0xc   : > { %p249_p3 = scmp.ne.s32.totalorder %s4211_s14, %s4207_s13  ;;  %p250_p4 = scmp.eq.s32.totalorder %s3420_s18, 1 }
   0xd   : > { %s4316_s22 = scalar_select %p231_p1, %s4215_s15, %s233_s20  }
   0xe   : > { %p4318_p5 = por %p244_p2, %p243_p0  ;;  %p4322_p6 = por %p250_p4, %p249_p3 }
   0xf   : > { %p3423_p7 = scmp.ge.s32.totalorder %s4219_s16, 1  ;;  %p333_p8 = scmp.lt.s32.totalorder %s4219_s16, 3 }
  0x11   : > { %p334_p9 = pnand %p3423_p7, %p333_p8 }
  0x13   : > { %337 = sbr.rel (%p334_p9) target bundleno = 1574 (0x626), region = 56 }
  0x18   : > { %s6601_s1 = sld [smem:[#allocation68_spill]]  ;;  %s3426_s27 = sshll.u32 %s4301_s17, 5  ;;  %v3685_v28 = vld [vmem:[%s6514_s3 + $0x78] sm:$0xff]  ;;  %vm498_vm0 = vcmask 523264   ;;  %v3684_v35 = vld [vmem:[%s6514_s3 + $0x70] sm:$0xff]  ;;  %v3683_v37 = vld [vmem:[%s6514_s3 + $0x68] sm:$0xff] }
  0x19   : > { %p382_p10 = scmp.lt.s32.totalorder %s3426_s27, 63  ;;  %s6602_s0 = sld [smem:[#allocation67_spill]]  ;;  %v3677_v29 = vld [vmem:[%s6514_s3 + $0x38] sm:$0xff]  ;;  %v3676_v36 = vld [vmem:[%s6514_s3 + $0x30] sm:$0xff]  ;;  %v3675_v44 = vld [vmem:[%s6514_s3 + $0x28] sm:$0xff] }
  0x1a   : > { %v3682_v45 = vld [vmem:[%s6514_s3 + $0x60] sm:$0xff]  ;;  %v3681_v53 = vld [vmem:[%s6514_s3 + $0x58] sm:$0xff]  ;;  %v3680_v61 = vld [vmem:[%s6514_s3 + $0x50] sm:$0xff]  ;;  %s5004_s12 = sand.u32 1, %s4211_s14  }
  0x1b   : > { %s6787_s27 = smov (!%p382_p10, %s3426_s27), 63  ;;  %v3674_v52 = vld [vmem:[%s6514_s3 + $0x20] sm:$0xff]  ;;  %v3673_v60 = vld [vmem:[%s6514_s3 + $0x18] sm:$0xff]  ;;  %s3425_s18 = sshll.u32 %s5004_s12, 8 }
  0x1c   : > { %s3427_s25 = sshll.u32 %s6787_s27, 3  ;;  %s5025_s27 = scalar_lea.vmem [#allocation4], %s3425_s18 }
  0x1d   : > { %s3310_s26 = sshll.u32 %s5025_s27, 4  ;;  %s3283_s30 = scalar_lea.sflag [#allocation5], %s5004_s12  ;;  %s3311_s26 = int_to_ptr.vmem [resolvable:$true] %s3310_s26 }
  0x1e   : > { %v3456_v0 = vld [vmem:[%s6601_s1 + $0x30] sm:$0xf]  ;;  %v3669_v1 = vld [vmem:[%s6601_s1 + $0x34] sm:$0xf0]  ;;  %v3668_v2 = vld [vmem:[%s6601_s1 + $0x34] sm:$0xf] }
  0x1f   : > { %v3457_v3 = vor.u32 %v3669_v1, %v3456_v0  ;;  %v3458_v4 = vld [vmem:[%s6601_s1 + $0x38] sm:$0xf0]  ;;  %v3448_v5 = vld [vmem:[%s6601_s1 + $0x20] sm:$0xf]  ;;  %v3667_v6 = vld [vmem:[%s6601_s1 + $0x24] sm:$0xf0]  ;;  %s4385_s29 = scalar_lea.vmem %s6602_s0, %s3427_s25 }
  0x20   : > { %v3461_v7 = vor.u32 %v3668_v2, %v3458_v4  ;;  %v3666_v8 = vld [vmem:[%s6601_s1 + $0x24] sm:$0xf]  ;;  %v3450_v9 = vld [vmem:[%s6601_s1 + $0x28] sm:$0xf0]  ;;  %v3449_v10 = vor.u32 %v3667_v6, %v3448_v5  ;;  %v3440_v12 = vld [vmem:[%s6601_s1 + $0x10] sm:$0xf] }
  0x21   : > { %551 = vmatpush.bf16.msra.mxu0 %v3457_v3  ;;  %3704 = vmatpush.bf16.msra.mxu2 %v3457_v3  ;;  %v3453_v11 = vor.u32 %v3666_v8, %v3450_v9  ;;  %v3665_v13 = vld [vmem:[%s6601_s1 + $0x14] sm:$0xf0]  ;;  %v3664_v14 = vld [vmem:[%s6601_s1 + $0x14] sm:$0xf]  ;;  %v3442_v15 = vld [vmem:[%s6601_s1 + $0x18] sm:$0xf0] }
  0x22   : > { %640 = vmatpush.bf16.msra.mxu1 %v3461_v7  ;;  %3708 = vmatpush.bf16.msra.mxu3 %v3461_v7  ;;  %v3441_v16 = vor.u32 %v3665_v13, %v3440_v12  ;;  %v3445_v17 = vor.u32 %v3664_v14, %v3442_v15  ;;  %v3432_v18 = vld [vmem:[%s6601_s1] sm:$0xf]  ;;  %v3663_v19 = vld [vmem:[%s6601_s1 + $0x4] sm:$0xf0]  ;;  %v3662_v20 = vld [vmem:[%s6601_s1 + $0x4] sm:$0xf] }
  0x23   : > { %v3434_v21 = vld [vmem:[%s6601_s1 + $0x8] sm:$0xf0]  ;;  %v3433_v22 = vor.u32 %v3663_v19, %v3432_v18  ;;  %v396_v24 = vld [vmem:[%s4385_s29] sm:$0xff]  ;;  %v414_v31 = vld [vmem:[%s4385_s29 + $0x90] sm:$0xff] }
  0x24   : > { %v3437_v23 = vor.u32 %v3662_v20, %v3434_v21  ;;  %v397_v25 = vld [vmem:[%s4385_s29 + $0x8] sm:$0xff]  ;;  %v412_v26 = vld [vmem:[%s4385_s29 + $0x80] sm:$0xff]  ;;  %v415_v32 = vld [vmem:[%s4385_s29 + $0x98] sm:$0xff] }
  0x25   : > { %552 = vmatpush.bf16.msra.mxu0 %v3449_v10  ;;  %3705 = vmatpush.bf16.msra.mxu2 %v3449_v10  ;;  %v413_v27 = vld [vmem:[%s4385_s29 + $0x88] sm:$0xff]  ;;  %v428_v30 = vpack.c.bf16 %v397_v25, %v396_v24  ;;  %v437_v34 = vpack.c.bf16 %v415_v32, %v414_v31  ;;  %v398_v38 = vld [vmem:[%s4385_s29 + $0x10] sm:$0xff]  ;;  %v399_v39 = vld [vmem:[%s4385_s29 + $0x18] sm:$0xff] }
  0x26   : > { %641 = vmatpush.bf16.msra.mxu1 %v3453_v11  ;;  %3709 = vmatpush.bf16.msra.mxu3 %v3453_v11  ;;  %v4399_v33 = vpack.c.bf16 %v413_v27, %v412_v26  ;;  %v416_v40 = vld [vmem:[%s4385_s29 + $0xa0] sm:$0xff]  ;;  %v417_v41 = vld [vmem:[%s4385_s29 + $0xa8] sm:$0xff]  ;;  %v429_v42 = vpack.c.bf16 %v399_v39, %v398_v38  ;;  %v418_v48 = vld [vmem:[%s4385_s29 + $0xb0] sm:$0xff] }
  0x27   : > { %v438_v43 = vpack.c.bf16 %v417_v41, %v416_v40  ;;  %v400_v46 = vld [vmem:[%s4385_s29 + $0x20] sm:$0xff]  ;;  %v401_v47 = vld [vmem:[%s4385_s29 + $0x28] sm:$0xff]  ;;  %v419_v49 = vld [vmem:[%s4385_s29 + $0xb8] sm:$0xff] }
  0x28   : > { %v430_v50 = vpack.c.bf16 %v401_v47, %v400_v46  ;;  %v439_v51 = vpack.c.bf16 %v419_v49, %v418_v48  ;;  %v402_v54 = vld [vmem:[%s4385_s29 + $0x30] sm:$0xff]  ;;  %v403_v55 = vld [vmem:[%s4385_s29 + $0x38] sm:$0xff]  ;;  %v420_v56 = vld [vmem:[%s4385_s29 + $0xc0] sm:$0xff] }
  0x29   : > { %553 = vmatpush.bf16.msra.mxu0 %v3441_v16  ;;  %3706 = vmatpush.bf16.msra.mxu2 %v3441_v16  ;;  %v421_v57 = vld [vmem:[%s4385_s29 + $0xc8] sm:$0xff]  ;;  %v431_v58 = vpack.c.bf16 %v403_v55, %v402_v54  ;;  %v404_v62 = vld [vmem:[%s4385_s29 + $0x40] sm:$0xff]  ;;  %v422_v0 = vld [vmem:[%s4385_s29 + $0xd0] sm:$0xff] }
  0x2a   : > { %642 = vmatpush.bf16.msra.mxu1 %v3445_v17  ;;  %3710 = vmatpush.bf16.msra.mxu3 %v3445_v17  ;;  %v440_v59 = vpack.c.bf16 %v421_v57, %v420_v56  ;;  %v405_v63 = vld [vmem:[%s4385_s29 + $0x48] sm:$0xff]  ;;  %v423_v1 = vld [vmem:[%s4385_s29 + $0xd8] sm:$0xff]  ;;  %v3672_v4 = vld [vmem:[%s6514_s3 + $0x10] sm:$0xff] }
  0x2b   : > { %v432_v2 = vpack.c.bf16 %v405_v63, %v404_v62  ;;  %v441_v3 = vpack.c.bf16 %v423_v1, %v422_v0  ;;  %v3679_v5 = vld [vmem:[%s6514_s3 + $0x48] sm:$0xff]  ;;  %v406_v6 = vld [vmem:[%s4385_s29 + $0x50] sm:$0xff]  ;;  %v407_v7 = vld [vmem:[%s4385_s29 + $0x58] sm:$0xff] }
  0x2c   : > { %v424_v8 = vld [vmem:[%s4385_s29 + $0xe0] sm:$0xff]  ;;  %v425_v9 = vld [vmem:[%s4385_s29 + $0xe8] sm:$0xff]  ;;  %v433_v10 = vpack.c.bf16 %v407_v7, %v406_v6  ;;  %v426_v15 = vld [vmem:[%s4385_s29 + $0xf0] sm:$0xff] }
  0x2d   : > { %554 = vmatpush.bf16.msra.mxu0 %v3433_v22  ;;  %3707 = vmatpush.bf16.msra.mxu2 %v3433_v22  ;;  %v442_v11 = vpack.c.bf16 %v425_v9, %v424_v8  ;;  %v3671_v12 = vld [vmem:[%s6514_s3 + $0x8] sm:$0xff]  ;;  %v408_v13 = vld [vmem:[%s4385_s29 + $0x60] sm:$0xff]  ;;  %v427_v16 = vld [vmem:[%s4385_s29 + $0xf8] sm:$0xff] }
  0x2e   : > { %643 = vmatpush.bf16.msra.mxu1 %v3437_v23  ;;  %3711 = vmatpush.bf16.msra.mxu3 %v3437_v23  ;;  %v409_v14 = vld [vmem:[%s4385_s29 + $0x68] sm:$0xff]  ;;  %v443_v18 = vpack.c.bf16 %v427_v16, %v426_v15  ;;  %v3670_v19 = vld [vmem:[%s6514_s3] sm:$0xff]  ;;  %v410_v21 = vld [vmem:[%s4385_s29 + $0x70] sm:$0xff] }
  0x2f   : > { %v434_v17 = vpack.c.bf16 %v409_v14, %v408_v13  ;;  %v3678_v20 = vld [vmem:[%s6514_s3 + $0x40] sm:$0xff]  ;;  %v411_v22 = vld [vmem:[%s4385_s29 + $0x78] sm:$0xff]  ;;  %v3691_v0 = vld [vmem:[%s6516_s5 + $0x28] sm:$0xff]  ;;  %s4681_s29 = scalar_lea.vmem %s6518_s7, %s3427_s25  ;;  %s4145_s25 = scalar_lea.hbm %s6521_s10, 512 }
  0x30   : > { %3462 = vmatmul.msk.bf16.vlgmr.msra.gmra.mxu0 %vm498_vm0, %v428_v30  ;;  %3471 = vmatmul.msk.bf16.vlgmr.msra.gmra.mxu2 %vm498_vm0, %v437_v34  ;;  %v435_v23 = vpack.c.bf16 %v411_v22, %v410_v21  ;;  %v3693_v24 = vld [vmem:[%s6516_s5 + $0x38] sm:$0xff]  ;;  %v452_v25 = vld [vmem:[%s6513_s2] sm:$0x3] }
  0x31   : > { %1081 = vmatpush.bf16.msrb.mxu2 %v3677_v29  ;;  %3478 = vmatmul.msk.bf16.vlgmr.msra.gmra.mxu1 %vm498_vm0, %v428_v30  ;;  %v4507_v27 = vperm.slane %v452_v25, 0  ;;  %v4509_v29 = vperm.slane %v452_v25, 1  ;;  %v3692_v30 = vld [vmem:[%s6516_s5 + $0x30] sm:$0xff] }
  0x32   : > { %1170 = vmatpush.bf16.msrb.mxu3 %v3685_v28  ;;  %1439 = vmatpush.bf16.msrb.mxu0 %v3693_v24 }
  0x33   : > { %3486 = vmatmul.msk.bf16.vlgmr.msra.gmra.mxu3 %vm498_vm0, %v4399_v33 }
  0x35   : > { %1082 = vmatpush.bf16.msrb.mxu2 %v3676_v36 }
  0x36   : > { %1171 = vmatpush.bf16.msrb.mxu3 %v3684_v35  ;;  %1440 = vmatpush.bf16.msrb.mxu0 %v3692_v30 }
  0x39   : > { %1083 = vmatpush.bf16.msrb.mxu2 %v3675_v44 }
  0x3a   : > { %1172 = vmatpush.bf16.msrb.mxu3 %v3683_v37  ;;  %1441 = vmatpush.bf16.msrb.mxu0 %v3691_v0 }
  0x3d   : > { %1084 = vmatpush.bf16.msrb.mxu2 %v3674_v52 }
  0x3e   : > { %1173 = vmatpush.bf16.msrb.mxu3 %v3682_v45 }
  0x40   : > { %3463 = vmatmul.msk.bf16.gmra.mxu0 %vm498_vm0, %v429_v42  ;;  %3472 = vmatmul.msk.bf16.gmra.mxu2 %vm498_vm0, %v438_v43 }
  0x41   : > { %3479 = vmatmul.msk.bf16.gmra.mxu1 %vm498_vm0, %v429_v42  ;;  %1085 = vmatpush.bf16.msrb.mxu2 %v3673_v60 }
  0x42   : > { %1174 = vmatpush.bf16.msrb.mxu3 %v3681_v53 }
  0x43   : > { %3487 = vmatmul.msk.bf16.gmra.mxu3 %vm498_vm0, %v437_v34 }
  0x45   : > { %1086 = vmatpush.bf16.msrb.mxu2 %v3672_v4 }
  0x46   : > { %1175 = vmatpush.bf16.msrb.mxu3 %v3680_v61 }
  0x49   : > { %1087 = vmatpush.bf16.msrb.mxu2 %v3671_v12 }
  0x4a   : > { %1176 = vmatpush.bf16.msrb.mxu3 %v3679_v5 }
  0x4d   : > { %1088 = vmatpush.bf16.msrb.mxu2 %v3670_v19 }
  0x4e   : > { %1177 = vmatpush.bf16.msrb.mxu3 %v3678_v20 }
  0x50   : > { %3464 = vmatmul.msk.bf16.gmra.mxu0 %vm498_vm0, %v430_v50  ;;  %3473 = vmatmul.msk.bf16.gmra.mxu2 %vm498_vm0, %v439_v51 }
  0x51   : > { %3480 = vmatmul.msk.bf16.gmra.mxu1 %vm498_vm0, %v430_v50  ;;  %3712 = vmatpush.bf16.msra.mxu2 %v3693_v24 }
  0x53   : > { %3488 = vmatmul.msk.bf16.gmra.mxu3 %vm498_vm0, %v438_v43 }
  0x55   : > { %3713 = vmatpush.bf16.msra.mxu2 %v3692_v30 }
  0x59   : > { %3714 = vmatpush.bf16.msra.mxu2 %v3691_v0 }
  0x60   : > { %3465 = vmatmul.msk.bf16.gmra.mxu0 %vm498_vm0, %v431_v58  ;;  %3474 = vmatmul.msk.bf16.gmra.mxu2 %vm498_vm0, %v440_v59 }
  0x61   : > { %3481 = vmatmul.msk.bf16.gmra.mxu1 %vm498_vm0, %v431_v58 }
  0x63   : > { %3489 = vmatmul.msk.bf16.gmra.mxu3 %vm498_vm0, %v439_v51 }
  0x70   : > { %3466 = vmatmul.msk.bf16.gmra.mxu0 %vm498_vm0, %v432_v2  ;;  %3475 = vmatmul.msk.bf16.gmra.mxu2 %vm498_vm0, %v441_v3 }
  0x71   : > { %3482 = vmatmul.msk.bf16.gmra.mxu1 %vm498_vm0, %v432_v2 }
  0x73   : > { %3490 = vmatmul.msk.bf16.gmra.mxu3 %vm498_vm0, %v440_v59 }
  0x80   : > { %3467 = vmatmul.msk.bf16.gmra.mxu0 %vm498_vm0, %v433_v10  ;;  %3476 = vmatmul.msk.bf16.gmra.mxu2 %vm498_vm0, %v442_v11 }
  0x81   : > { %3483 = vmatmul.msk.bf16.gmra.mxu1 %vm498_vm0, %v433_v10 }
  0x83   : > { %3491 = vmatmul.msk.bf16.gmra.mxu3 %vm498_vm0, %v441_v3 }
  0x90   : > { %3468 = vmatmul.msk.bf16.gmra.mxu0 %vm498_vm0, %v434_v17  ;;  %3477 = vmatmul.msk.bf16.gmra.mxu2 %vm498_vm0, %v443_v18 }
  0x91   : > { %3484 = vmatmul.msk.bf16.gmra.mxu1 %vm498_vm0, %v434_v17 }
  0x93   : > { %3492 = vmatmul.msk.bf16.gmra.mxu3 %vm498_vm0, %v442_v11 }
  0xa0   : > { %3469 = vmatmul.msk.bf16.gmra.mxu0 %vm498_vm0, %v435_v23 }
  0xa1   : > { %3485 = vmatmul.msk.bf16.gmra.mxu1 %vm498_vm0, %v435_v23  ;;  %v3690_v23 = vld [vmem:[%s6516_s5 + $0x20] sm:$0xff] }
  0xa2   : > { %1442 = vmatpush.bf16.msrb.mxu0 %v3690_v23  ;;  %3715 = vmatpush.bf16.msra.mxu2 %v3690_v23 }
  0xa3   : > { %3493 = vmatmul.msk.bf16.gmra.mxu3 %vm498_vm0, %v443_v18 }
  0xad   : > { %v556_v26 = vpop.f32.mrf.mxu0 }
  0xae   : > { %v645_v28 = vpop.f32.mrf.mxu1  ;;  %v557_v31 = vadd.f32 %v556_v26, %v4507_v27 }
  0xaf   : > { %v646_v32 = vadd.f32 %v645_v28, %v4509_v29 }
  0xb0   : > { %3470 = vmatmul.msk.bf16.gmra.mxu0 %vm498_vm0, %v4399_v33  ;;  %v789_v36 = vmul.f32 0.01, %v557_v31  ;;  %vm725_vm1 = vcmp.gt.f32.partialorder %v557_v31, 0.0 }
  0xb1   : > { %v790_v33 = vmul.f32 0.01, %v646_v32  ;;  %vm726_vm2 = vcmp.gt.f32.partialorder %v646_v32, 0.0 }
  0xb2   : > { %v853_v43 = vsel %vm725_vm1, %v557_v31, %v789_v36 }
  0xb3   : > { %v4521_v39 = vpop.f32.mrf.mxu2  ;;  %v854_v46 = vsel %vm726_vm2, %v646_v32, %v790_v33 }
  0xb5   : > { %v558_v35 = vpop.f32.mrf.mxu0 }
  0xb6   : > { %v4518_v34 = vpop.f32.mrf.mxu3  ;;  %v559_v37 = vadd.f32 %v558_v35, %v4507_v27  ;;  %v647_v38 = vpop.f32.mrf.mxu1 }
  0xb7   : > { %v648_v40 = vadd.f32 %v647_v38, %v4509_v29 }
  0xb8   : > { %vm727_vm3 = vcmp.gt.f32.partialorder %v559_v37, 0.0  ;;  %v791_v41 = vmul.f32 0.01, %v559_v37 }
  0xb9   : > { %vm728_vm4 = vcmp.gt.f32.partialorder %v648_v40, 0.0  ;;  %v792_v42 = vmul.f32 0.01, %v648_v40 }
  0xba   : > { %v855_v44 = vsel %vm727_vm3, %v559_v37, %v791_v41 }
  0xbb   : > { %v917_v45 = vpack.c.bf16 %v855_v44, %v853_v43  ;;  %v856_v47 = vsel %vm728_vm4, %v648_v40, %v792_v42  ;;  %v4526_v52 = vpop.f32.mrf.mxu2 }
  0xbc   : > { %v918_v48 = vpack.c.bf16 %v856_v47, %v854_v46 }
  0xbd   : > { %v561_v50 = vpop.f32.mrf.mxu0  ;;  %1089 = vmatmul.bf16.vlgmr.msrb.gmra.mxu2 %v917_v45 }
  0xbe   : > { %v4524_v49 = vpop.f32.mrf.mxu3  ;;  %v650_v51 = vpop.f32.mrf.mxu1  ;;  %1178 = vmatmul.bf16.vlgmr.msrb.gmra.mxu3 %v918_v48  ;;  %v562_v53 = vadd.f32 %v561_v50, %v4507_v27 }
  0xbf   : > { %v651_v54 = vadd.f32 %v650_v51, %v4509_v29  ;;  %v3689_v51 = vld [vmem:[%s6516_s5 + $0x18] sm:$0xff] }
  0xc0   : > { %v793_v57 = vmul.f32 0.01, %v562_v53  ;;  %vm729_vm5 = vcmp.gt.f32.partialorder %v562_v53, 0.0  ;;  %1443 = vmatpush.bf16.msrb.mxu0 %v3689_v51  ;;  %3716 = vmatpush.bf16.msra.mxu2 %v3689_v51 }
  0xc1   : > { %v794_v60 = vmul.f32 0.01, %v651_v54  ;;  %vm730_vm7 = vcmp.gt.f32.partialorder %v651_v54, 0.0 }
  0xc2   : > { %v857_v1 = vsel %vm729_vm5, %v562_v53, %v793_v57 }
  0xc3   : > { %v4537_v3 = vpop.f32.mrf.mxu2  ;;  %v858_v5 = vsel %vm730_vm7, %v651_v54, %v794_v60 }
  0xc5   : > { %v563_v56 = vpop.f32.mrf.mxu0 }
  0xc6   : > { %v4530_v55 = vpop.f32.mrf.mxu3  ;;  %v564_v58 = vadd.f32 %v563_v56, %v4507_v27  ;;  %v652_v59 = vpop.f32.mrf.mxu1 }
  0xc7   : > { %v653_v61 = vadd.f32 %v652_v59, %v4509_v29 }
  0xc8   : > { %v795_v62 = vmul.f32 0.01, %v564_v58  ;;  %vm731_vm6 = vcmp.gt.f32.partialorder %v564_v58, 0.0 }
  0xc9   : > { %v796_v63 = vmul.f32 0.01, %v653_v61  ;;  %vm732_vm8 = vcmp.gt.f32.partialorder %v653_v61, 0.0 }
  0xca   : > { %v859_v2 = vsel %vm731_vm6, %v564_v58, %v795_v62 }
  0xcb   : > { %v919_v4 = vpack.c.bf16 %v859_v2, %v857_v1  ;;  %v860_v6 = vsel %vm732_vm8, %v653_v61, %v796_v63  ;;  %v4545_v14 = vpop.f32.mrf.mxu2 }
  0xcc   : > { %v920_v7 = vpack.c.bf16 %v860_v6, %v858_v5 }
  0xcd   : > { %v566_v9 = vpop.f32.mrf.mxu0  ;;  %1094 = vmatmul.bf16.gmra.mxu2 %v919_v4 }
  0xce   : > { %v4539_v8 = vpop.f32.mrf.mxu3  ;;  %v655_v10 = vpop.f32.mrf.mxu1  ;;  %1183 = vmatmul.bf16.gmra.mxu3 %v920_v7  ;;  %v567_v11 = vadd.f32 %v566_v9, %v4507_v27 }
  0xcf   : > { %v656_v12 = vadd.f32 %v655_v10, %v4509_v29 }
  0xd0   : > { %v797_v16 = vmul.f32 0.01, %v567_v11  ;;  %vm733_vm9 = vcmp.gt.f32.partialorder %v567_v11, 0.0 }
  0xd1   : > { %v798_v19 = vmul.f32 0.01, %v656_v12  ;;  %vm734_vm11 = vcmp.gt.f32.partialorder %v656_v12, 0.0 }
  0xd2   : > { %v861_v24 = vsel %vm733_vm9, %v567_v11, %v797_v16 }
  0xd3   : > { %v862_v28 = vsel %vm734_vm11, %v656_v12, %v798_v19  ;;  %v4554_v37 = vpop.f32.mrf.mxu2 }
  0xd5   : > { %v568_v15 = vpop.f32.mrf.mxu0 }
  0xd6   : > { %v4543_v13 = vpop.f32.mrf.mxu3  ;;  %v569_v17 = vadd.f32 %v568_v15, %v4507_v27  ;;  %v657_v18 = vpop.f32.mrf.mxu1  ;;  %v3688_v15 = vld [vmem:[%s6516_s5 + $0x10] sm:$0xff] }
  0xd7   : > { %v658_v20 = vadd.f32 %v657_v18, %v4509_v29  ;;  %1444 = vmatpush.bf16.msrb.mxu0 %v3688_v15  ;;  %3717 = vmatpush.bf16.msra.mxu2 %v3688_v15 }
  0xd8   : > { %v799_v21 = vmul.f32 0.01, %v569_v17  ;;  %vm735_vm10 = vcmp.gt.f32.partialorder %v569_v17, 0.0 }
  0xd9   : > { %v800_v22 = vmul.f32 0.01, %v658_v20  ;;  %vm736_vm12 = vcmp.gt.f32.partialorder %v658_v20, 0.0 }
  0xda   : > { %v863_v25 = vsel %vm735_vm10, %v569_v17, %v799_v21 }
  0xdb   : > { %v921_v26 = vpack.c.bf16 %v863_v25, %v861_v24  ;;  %v864_v30 = vsel %vm736_vm12, %v658_v20, %v800_v22  ;;  %v4562_v48 = vpop.f32.mrf.mxu2 }
  0xdc   : > { %v922_v31 = vpack.c.bf16 %v864_v30, %v862_v28 }
  0xdd   : > { %v571_v35 = vpop.f32.mrf.mxu0  ;;  %1099 = vmatmul.bf16.gmra.mxu2 %v921_v26 }
  0xde   : > { %v4552_v32 = vpop.f32.mrf.mxu3  ;;  %v660_v36 = vpop.f32.mrf.mxu1  ;;  %1188 = vmatmul.bf16.gmra.mxu3 %v922_v31  ;;  %v572_v38 = vadd.f32 %v571_v35, %v4507_v27 }
  0xdf   : > { %v661_v33 = vadd.f32 %v660_v36, %v4509_v29 }
  0xe0   : > { %v801_v42 = vmul.f32 0.01, %v572_v38  ;;  %vm737_vm13 = vcmp.gt.f32.partialorder %v572_v38, 0.0 }
  0xe1   : > { %v802_v45 = vmul.f32 0.01, %v661_v33  ;;  %vm738_vm15 = vcmp.gt.f32.partialorder %v661_v33, 0.0 }
  0xe2   : > { %v865_v53 = vsel %vm737_vm13, %v572_v38, %v801_v42 }
  0xe3   : > { %v866_v57 = vsel %vm738_vm15, %v661_v33, %v802_v45  ;;  %v4570_v0 = vpop.f32.mrf.mxu2 }
  0xe5   : > { %v573_v41 = vpop.f32.mrf.mxu0 }
  0xe6   : > { %v4558_v40 = vpop.f32.mrf.mxu3  ;;  %v574_v43 = vadd.f32 %v573_v41, %v4507_v27  ;;  %v662_v44 = vpop.f32.mrf.mxu1 }
  0xe7   : > { %v663_v46 = vadd.f32 %v662_v44, %v4509_v29 }
  0xe8   : > { %v803_v47 = vmul.f32 0.01, %v574_v43  ;;  %vm739_vm14 = vcmp.gt.f32.partialorder %v574_v43, 0.0 }
  0xe9   : > { %v804_v50 = vmul.f32 0.01, %v663_v46  ;;  %vm740_vm0 = vcmp.gt.f32.partialorder %v663_v46, 0.0 }
  0xea   : > { %v867_v54 = vsel %vm739_vm14, %v574_v43, %v803_v47 }
  0xeb   : > { %v923_v56 = vpack.c.bf16 %v867_v54, %v865_v53  ;;  %v868_v58 = vsel %vm740_vm0, %v663_v46, %v804_v50  ;;  %v4580_v22 = vpop.f32.mrf.mxu2 }
  0xec   : > { %v924_v59 = vpack.c.bf16 %v868_v58, %v866_v57  ;;  %v3687_v58 = vld [vmem:[%s6516_s5 + $0x8] sm:$0xff] }
  0xed   : > { %v576_v61 = vpop.f32.mrf.mxu0  ;;  %1104 = vmatmul.bf16.gmra.mxu2 %v923_v56  ;;  %1445 = vmatpush.bf16.msrb.mxu0 %v3687_v58 }
  0xee   : > { %v4567_v60 = vpop.f32.mrf.mxu3  ;;  %v665_v62 = vpop.f32.mrf.mxu1  ;;  %1193 = vmatmul.bf16.gmra.mxu3 %v924_v59  ;;  %v577_v63 = vadd.f32 %v576_v61, %v4507_v27  ;;  %3718 = vmatpush.bf16.msra.mxu2 %v3687_v58 }
  0xef   : > { %v666_v1 = vadd.f32 %v665_v62, %v4509_v29 }
  0xf0   : > { %v805_v5 = vmul.f32 0.01, %v577_v63  ;;  %vm741_vm1 = vcmp.gt.f32.partialorder %v577_v63, 0.0 }
  0xf1   : > { %v806_v9 = vmul.f32 0.01, %v666_v1  ;;  %vm742_vm2 = vcmp.gt.f32.partialorder %v666_v1, 0.0 }
  0xf2   : > { %v869_v16 = vsel %vm741_vm1, %v577_v63, %v805_v5 }
  0xf3   : > { %v870_v19 = vsel %vm742_vm2, %v666_v1, %v806_v9  ;;  %v4587_v38 = vpop.f32.mrf.mxu2 }
  0xf5   : > { %v578_v4 = vpop.f32.mrf.mxu0 }
  0xf6   : > { %v4573_v2 = vpop.f32.mrf.mxu3  ;;  %v579_v6 = vadd.f32 %v578_v4, %v4507_v27  ;;  %v667_v7 = vpop.f32.mrf.mxu1 }
  0xf7   : > { %v668_v10 = vadd.f32 %v667_v7, %v4509_v29 }
  0xf8   : > { %v807_v11 = vmul.f32 0.01, %v579_v6  ;;  %vm743_vm3 = vcmp.gt.f32.partialorder %v579_v6, 0.0 }
  0xf9   : > { %vm744_vm4 = vcmp.gt.f32.partialorder %v668_v10, 0.0  ;;  %v808_v12 = vmul.f32 0.01, %v668_v10 }
  0xfa   : > { %v871_v17 = vsel %vm743_vm3, %v579_v6, %v807_v11 }
  0xfb   : > { %v925_v18 = vpack.c.bf16 %v871_v17, %v869_v16  ;;  %v872_v20 = vsel %vm744_vm4, %v668_v10, %v808_v12  ;;  %v4592_v57 = vpop.f32.mrf.mxu2 }
  0xfc   : > { %v926_v21 = vpack.c.bf16 %v872_v20, %v870_v19 }
  0xfd   : > { %v581_v23 = vpop.f32.mrf.mxu0  ;;  %1109 = vmatmul.bf16.gmra.mxu2 %v925_v18 }
  0xfe   : > { %v4582_v24 = vpop.f32.mrf.mxu3  ;;  %v670_v25 = vpop.f32.mrf.mxu1  ;;  %1198 = vmatmul.bf16.gmra.mxu3 %v926_v21  ;;  %v582_v26 = vadd.f32 %v581_v23, %v4507_v27 }
  0xff   : > { %v671_v28 = vadd.f32 %v670_v25, %v4509_v29 }
 0x100   : > { %v809_v31 = vmul.f32 0.01, %v582_v26  ;;  %vm745_vm5 = vcmp.gt.f32.partialorder %v582_v26, 0.0 }
 0x101   : > { %v810_v33 = vmul.f32 0.01, %v671_v28  ;;  %vm746_vm6 = vcmp.gt.f32.partialorder %v671_v28, 0.0 }
 0x102   : > { %v873_v45 = vsel %vm745_vm5, %v582_v26, %v809_v31 }
 0x103   : > { %v874_v50 = vsel %vm746_vm6, %v671_v28, %v810_v33  ;;  %v4603_v12 = vpop.f32.mrf.mxu2 }
 0x105   : > { %v583_v30 = vpop.f32.mrf.mxu0 }
 0x106   : > { %v584_v35 = vadd.f32 %v583_v30, %v4507_v27  ;;  %v672_v36 = vpop.f32.mrf.mxu1  ;;  %v4590_v42 = vpop.f32.mrf.mxu3 }
 0x107   : > { %v673_v41 = vadd.f32 %v672_v36, %v4509_v29  ;;  %v3686_v36 = vld [vmem:[%s6516_s5] sm:$0xff] }
 0x108   : > { %vm747_vm7 = vcmp.gt.f32.partialorder %v584_v35, 0.0  ;;  %v811_v43 = vmul.f32 0.01, %v584_v35  ;;  %1446 = vmatpush.bf16.msrb.mxu0 %v3686_v36  ;;  %3719 = vmatpush.bf16.msra.mxu2 %v3686_v36  ;;  %v693_v36 = vadd.f32 %v4539_v8, %v4509_v29 }
 0x109   : > { %vm748_vm8 = vcmp.gt.f32.partialorder %v673_v41, 0.0  ;;  %v812_v44 = vmul.f32 0.01, %v673_v41 }
 0x10a   : > { %v875_v46 = vsel %vm747_vm7, %v584_v35, %v811_v43 }
 0x10b   : > { %v927_v47 = vpack.c.bf16 %v875_v46, %v873_v45  ;;  %v876_v51 = vsel %vm748_vm8, %v673_v41, %v812_v44  ;;  %v4609_v28 = vpop.f32.mrf.mxu2  ;;  %vm764_vm8 = vcmp.gt.f32.partialorder %v693_v36, 0.0 }
 0x10c   : > { %v928_v53 = vpack.c.bf16 %v876_v51, %v874_v50 }
 0x10d   : > { %v586_v54 = vpop.f32.mrf.mxu0  ;;  %1114 = vmatmul.bf16.gmra.mxu2 %v927_v47 }
 0x10e   : > { %v675_v56 = vpop.f32.mrf.mxu1  ;;  %1203 = vmatmul.bf16.gmra.mxu3 %v928_v53  ;;  %v4598_v61 = vpop.f32.mrf.mxu3  ;;  %v587_v62 = vadd.f32 %v586_v54, %v4507_v27 }
 0x10f   : > { %v676_v59 = vadd.f32 %v675_v56, %v4509_v29 }
 0x110   : > { %v813_v4 = vmul.f32 0.01, %v587_v62  ;;  %vm749_vm10 = vcmp.gt.f32.partialorder %v587_v62, 0.0 }
 0x111   : > { %v814_v63 = vmul.f32 0.01, %v676_v59  ;;  %vm750_vm9 = vcmp.gt.f32.partialorder %v676_v59, 0.0 }
 0x112   : > { %v877_v15 = vsel %vm749_vm10, %v587_v62, %v813_v4 }
 0x113   : > { %v878_v11 = vsel %vm750_vm9, %v676_v59, %v814_v63  ;;  %v4618_v59 = vpop.f32.mrf.mxu2  ;;  %v686_v63 = vadd.f32 %v4518_v34, %v4509_v29 }
 0x115   : > { %v588_v1 = vpop.f32.mrf.mxu0  ;;  %vm758_vm1 = vcmp.gt.f32.partialorder %v686_v63, 0.0 }
 0x116   : > { %v589_v5 = vadd.f32 %v588_v1, %v4507_v27  ;;  %v677_v6 = vpop.f32.mrf.mxu1  ;;  %v4605_v17 = vpop.f32.mrf.mxu3  ;;  %v688_v1 = vadd.f32 %v4524_v49, %v4509_v29 }
 0x117   : > { %v678_v7 = vadd.f32 %v677_v6, %v4509_v29 }
 0x118   : > { %vm751_vm11 = vcmp.gt.f32.partialorder %v589_v5, 0.0  ;;  %v815_v9 = vmul.f32 0.01, %v589_v5  ;;  %v824_v6 = vmul.f32 0.01, %v688_v1  ;;  %vm760_vm2 = vcmp.gt.f32.partialorder %v688_v1, 0.0 }
 0x119   : > { %vm752_vm12 = vcmp.gt.f32.partialorder %v678_v7, 0.0  ;;  %v816_v10 = vmul.f32 0.01, %v678_v7 }
 0x11a   : > { %v879_v16 = vsel %vm751_vm11, %v589_v5, %v815_v9  ;;  %v822_v5 = vmul.f32 0.01, %v686_v63 }
 0x11b   : > { %v929_v18 = vpack.c.bf16 %v879_v16, %v877_v15  ;;  %v880_v19 = vsel %vm752_vm12, %v678_v7, %v816_v10 }
 0x11c   : > { %v930_v20 = vpack.c.bf16 %v880_v19, %v878_v11  ;;  %v4628_v11 = vpop.f32.mrf.mxu2  ;;  %v886_v34 = vsel %vm758_vm1, %v686_v63, %v822_v5 }
 0x11d   : > { %v591_v21 = vpop.f32.mrf.mxu0  ;;  %1119 = vmatmul.bf16.gmra.mxu2 %v929_v18  ;;  %v888_v18 = vsel %vm760_vm2, %v688_v1, %v824_v6  ;;  %v607_v6 = vadd.f32 %v4537_v3, %v4507_v27 }
 0x11e   : > { %v680_v23 = vpop.f32.mrf.mxu1  ;;  %1208 = vmatmul.bf16.gmra.mxu3 %v930_v20  ;;  %v592_v26 = vadd.f32 %v591_v21, %v4507_v27  ;;  %v4611_v31 = vpop.f32.mrf.mxu3  ;;  %v934_v21 = vpack.c.bf16 %v888_v18, %v886_v34  ;;  %v698_v34 = vadd.f32 %v4552_v32, %v4509_v29 }
 0x11f   : > { %v681_v25 = vadd.f32 %v680_v23, %v4509_v29  ;;  %v4635_v23 = vld [vmem:[%s6515_s4] ss:$0 sm:$0xff]  ;;  %vm765_vm11 = vcmp.gt.f32.partialorder %v607_v6, 0.0 }
 0x120   : > { %v817_v33 = vmul.f32 0.01, %v592_v26  ;;  %vm753_vm14 = vcmp.gt.f32.partialorder %v592_v26, 0.0  ;;  %v832_v3 = vmul.f32 0.01, %v698_v34 }
 0x121   : > { %v818_v30 = vmul.f32 0.01, %v681_v25  ;;  %vm754_vm13 = vcmp.gt.f32.partialorder %v681_v25, 0.0 }
 0x122   : > { %v881_v50 = vsel %vm753_vm14, %v592_v26, %v817_v33  ;;  %v604_v26 = vadd.f32 %v4526_v52, %v4507_v27  ;;  %vm768_vm14 = vcmp.gt.f32.partialorder %v698_v34, 0.0 }
 0x123   : > { %v882_v47 = vsel %vm754_vm13, %v681_v25, %v818_v30  ;;  %v602_v25 = vadd.f32 %v4521_v39, %v4507_v27 }
 0x124   : > { %vm763_vm6 = vcmp.gt.f32.partialorder %v604_v26, 0.0 }
 0x125   : > { %v593_v35 = vpop.f32.mrf.mxu0  ;;  %vm761_vm5 = vcmp.gt.f32.partialorder %v602_v25, 0.0 }
 0x126   : > { %v594_v41 = vadd.f32 %v593_v35, %v4507_v27  ;;  %v682_v43 = vpop.f32.mrf.mxu1  ;;  %v4620_v62 = vpop.f32.mrf.mxu3  ;;  %v691_v35 = vadd.f32 %v4530_v55, %v4509_v29 }
 0x127   : > { %v683_v44 = vadd.f32 %v682_v43, %v4509_v29  ;;  %v825_v43 = vmul.f32 0.01, %v602_v25 }
 0x128   : > { %vm755_vm15 = vcmp.gt.f32.partialorder %v594_v41, 0.0  ;;  %v819_v45 = vmul.f32 0.01, %v594_v41  ;;  %vm762_vm7 = vcmp.gt.f32.partialorder %v691_v35, 0.0 }
 0x129   : > { %vm756_vm0 = vcmp.gt.f32.partialorder %v683_v44, 0.0  ;;  %v820_v46 = vmul.f32 0.01, %v683_v44 }
 0x12a   : > { %v883_v51 = vsel %vm755_vm15, %v594_v41, %v819_v45  ;;  %v826_v45 = vmul.f32 0.01, %v691_v35 }
 0x12b   : > { %v931_v53 = vpack.c.bf16 %v883_v51, %v881_v50  ;;  %v884_v54 = vsel %vm756_vm0, %v683_v44, %v820_v46  ;;  %v827_v44 = vmul.f32 0.01, %v604_v26  ;;  %v828_v46 = vmul.f32 0.01, %v693_v36 }
 0x12c   : > { %v932_v56 = vpack.c.bf16 %v884_v54, %v882_v47  ;;  %v889_v47 = vsel %vm761_vm5, %v602_v25, %v825_v43 }
 0x12d   : > { %v596_v58 = vpop.f32.mrf.mxu0  ;;  %1124 = vmatmul.bf16.gmra.mxu2 %v931_v53  ;;  %v891_v50 = vsel %vm763_vm6, %v604_v26, %v827_v44  ;;  %v890_v53 = vsel %vm762_vm7, %v691_v35, %v826_v45  ;;  %v892_v8 = vsel %vm764_vm8, %v693_v36, %v828_v46  ;;  %v896_v36 = vsel %vm768_vm14, %v698_v34, %v832_v3 }
 0x12e   : > { %1213 = vmatmul.bf16.gmra.mxu3 %v932_v56  ;;  %v597_v4 = vadd.f32 %v596_v58, %v4507_v27  ;;  %v4630_v16 = vpop.f32.mrf.mxu3  ;;  %v935_v58 = vpack.c.bf16 %v891_v50, %v889_v47  ;;  %v936_v63 = vpack.c.bf16 %v892_v8, %v890_v53  ;;  %v614_v47 = vadd.f32 %v4562_v48, %v4507_v27 }
 0x12f   : > { %v703_v53 = vadd.f32 %v4567_v60, %v4509_v29 }
 0x130   : > { %v821_v9 = vmul.f32 0.01, %v597_v4  ;;  %vm757_vm3 = vcmp.gt.f32.partialorder %v597_v4, 0.0  ;;  %vm771_vm2 = vcmp.gt.f32.partialorder %v614_v47, 0.0 }
 0x132   : > { %v885_v49 = vsel %vm757_vm3, %v597_v4, %v821_v9 }
 0x135   : > { %v598_v7 = vpop.f32.mrf.mxu0 }
 0x136   : > { %v599_v10 = vadd.f32 %v598_v7, %v4507_v27  ;;  %v609_v7 = vadd.f32 %v4545_v14, %v4507_v27 }
 0x138   : > { %vm759_vm4 = vcmp.gt.f32.partialorder %v599_v10, 0.0  ;;  %v823_v15 = vmul.f32 0.01, %v599_v10  ;;  %vm767_vm12 = vcmp.gt.f32.partialorder %v609_v7, 0.0 }
 0x13a   : > { %v887_v19 = vsel %vm759_vm4, %v599_v10, %v823_v15  ;;  %v696_v15 = vadd.f32 %v4543_v13, %v4509_v29  ;;  %vm772_vm4 = vcmp.gt.f32.partialorder %v703_v53, 0.0 }
 0x13b   : > { %v933_v20 = vpack.c.bf16 %v887_v19, %v885_v49  ;;  %v829_v19 = vmul.f32 0.01, %v607_v6 }
 0x13c   : > { %vm766_vm13 = vcmp.gt.f32.partialorder %v696_v15, 0.0 }
 0x13d   : > { %1129 = vmatmul.bf16.gmra.mxu2 %v933_v20  ;;  %v831_v20 = vmul.f32 0.01, %v609_v7  ;;  %v893_v26 = vsel %vm765_vm11, %v607_v6, %v829_v19 }
 0x13e   : > { %1218 = vmatmul.bf16.gmra.mxu3 %v934_v21  ;;  %v830_v21 = vmul.f32 0.01, %v696_v15 }
 0x140   : > { %v1090_v30 = vpop.f32.mrf.mxu2  ;;  %v894_v32 = vsel %vm766_vm13, %v696_v15, %v830_v21  ;;  %v619_v21 = vadd.f32 %v4580_v22, %v4507_v27  ;;  %v4221_v22 = vmov 0  }
 0x141   : > { %v1179_v33 = vpop.f32.mrf.mxu3  ;;  %v1091_v41 = vadd.f32 %v4635_v23, %v1090_v30  ;;  %v895_v30 = vsel %vm767_vm12, %v609_v7, %v831_v20  ;;  %v938_v44 = vpack.c.bf16 %v896_v36, %v894_v32  ;;  %v617_v20 = vadd.f32 %v4570_v0, %v4507_v27  ;;  %3929 = vset.pattern.permute.xlu2 %v4221_v22 }
 0x142   : > { %v937_v43 = vpack.c.bf16 %v895_v30, %v893_v26  ;;  %v708_v26 = vadd.f32 %v4582_v24, %v4509_v29  ;;  %v839_v32 = vmul.f32 0.01, %v619_v21  ;;  %vm775_vm8 = vcmp.gt.f32.partialorder %v619_v21, 0.0  ;;  %3930 = vset.pattern.permute.xlu0 %v4221_v22  ;;  %3928 = vset.pattern.permute.xlu1 %v4221_v22 }
 0x143   : > { %v1180_v39 = vadd.f32 %v1179_v33, %v1091_v41  ;;  %vm773_vm7 = vcmp.gt.f32.partialorder %v617_v20, 0.0 }
 0x144   : > { %v840_v36 = vmul.f32 0.01, %v708_v26 }
 0x145   : > { %v1291_v54 = vmul.f32 0.01, %v1180_v39  ;;  %vm1259_vm9 = vcmp.gt.f32.partialorder %v1180_v39, 0.0 }
 0x147   : > { %v1323_v4 = vsel %vm1259_vm9, %v1180_v39, %v1291_v54 }
 0x148   : > { %v1092_v52 = vpop.f32.mrf.mxu2 }
 0x149   : > { %v1093_v55 = vadd.f32 %v4635_v23, %v1092_v52  ;;  %v1181_v51 = vpop.f32.mrf.mxu3  ;;  %v612_v52 = vadd.f32 %v4554_v37, %v4507_v27  ;;  %v836_v37 = vmul.f32 0.01, %v703_v53 }
 0x14b   : > { %v1182_v56 = vadd.f32 %v1181_v51, %v1093_v55  ;;  %v701_v51 = vadd.f32 %v4558_v40, %v4509_v29  ;;  %vm769_vm1 = vcmp.gt.f32.partialorder %v612_v52, 0.0  ;;  %v900_v7 = vsel %vm772_vm4, %v703_v53, %v836_v37  ;;  %v2438_v53 = vld [vmem:[%s4681_s29 + $0x10] sm:$0xff] }
 0x14c   : > { %2480 = vperm.xlu0 %3930, %v2438_v53  }
 0x14d   : > { %vm1260_vm10 = vcmp.gt.f32.partialorder %v1182_v56, 0.0  ;;  %v1292_v1 = vmul.f32 0.01, %v1182_v56  ;;  %1134 = vmatmul.bf16.gmra.mxu2 %v935_v58  ;;  %v835_v58 = vmul.f32 0.01, %v614_v47  ;;  %vm770_vm3 = vcmp.gt.f32.partialorder %v701_v51, 0.0 }
 0x14e   : > { %1223 = vmatmul.bf16.gmra.mxu3 %v936_v63  ;;  %v834_v63 = vmul.f32 0.01, %v701_v51 }
 0x14f   : > { %v1324_v5 = vsel %vm1260_vm10, %v1182_v56, %v1292_v1  ;;  %v833_v56 = vmul.f32 0.01, %v612_v52  ;;  %vm776_vm10 = vcmp.gt.f32.partialorder %v708_v26, 0.0 }
 0x150   : > { %v1095_v9 = vpop.f32.mrf.mxu2  ;;  %v1355_v10 = vpack.c.bf16 %v1324_v5, %v1323_v4  ;;  %v899_v5 = vsel %vm771_vm2, %v614_v47, %v835_v58  ;;  %v898_v60 = vsel %vm770_vm3, %v701_v51, %v834_v63  ;;  %v622_v58 = vadd.f32 %v4587_v38, %v4507_v27 }
 0x151   : > { %v1184_v18 = vpop.f32.mrf.mxu3  ;;  %v1096_v49 = vadd.f32 %v4635_v23, %v1095_v9  ;;  %v897_v4 = vsel %vm769_vm1, %v612_v52, %v833_v56  ;;  %v940_v34 = vpack.c.bf16 %v900_v7, %v898_v60  ;;  %v624_v63 = vadd.f32 %v4592_v57, %v4507_v27 }
 0x152   : > { %1447 = vmatmul.bf16.vlgmr.msrb.gmra.mxu0 %v1355_v10  ;;  %v939_v15 = vpack.c.bf16 %v899_v5, %v897_v4  ;;  %v713_v4 = vadd.f32 %v4598_v61, %v4509_v29  ;;  %vm777_vm13 = vcmp.gt.f32.partialorder %v622_v58, 0.0  ;;  %v841_v38 = vmul.f32 0.01, %v622_v58 }
 0x153   : > { %v1185_v14 = vadd.f32 %v1184_v18, %v1096_v49  ;;  %vm779_vm14 = vcmp.gt.f32.partialorder %v624_v63, 0.0  ;;  %v843_v57 = vmul.f32 0.01, %v624_v63 }
 0x154   : > { %v844_v7 = vmul.f32 0.01, %v713_v4 }
 0x155   : > { %v1293_v33 = vmul.f32 0.01, %v1185_v14  ;;  %vm1261_vm15 = vcmp.gt.f32.partialorder %v1185_v14, 0.0 }
 0x157   : > { %v1325_v46 = vsel %vm1261_vm15, %v1185_v14, %v1293_v33 }
 0x158   : > { %v1097_v25 = vpop.f32.mrf.mxu2 }
 0x159   : > { %v1098_v13 = vadd.f32 %v4635_v23, %v1097_v25  ;;  %v1186_v35 = vpop.f32.mrf.mxu3  ;;  %v706_v25 = vadd.f32 %v4573_v2, %v4509_v29 }
 0x15b   : > { %v1187_v41 = vadd.f32 %v1186_v35, %v1098_v13  ;;  %v837_v35 = vmul.f32 0.01, %v617_v20  ;;  %v838_v0 = vmul.f32 0.01, %v706_v25  ;;  %vm774_vm9 = vcmp.gt.f32.partialorder %v706_v25, 0.0 }
 0x15d   : > { %v1294_v45 = vmul.f32 0.01, %v1187_v41  ;;  %1139 = vmatmul.bf16.gmra.mxu2 %v937_v43  ;;  %vm1262_vm0 = vcmp.gt.f32.partialorder %v1187_v41, 0.0  ;;  %v901_v33 = vsel %vm773_vm7, %v617_v20, %v837_v35 }
 0x15e   : > { %1228 = vmatmul.bf16.gmra.mxu3 %v938_v44 }
 0x15f   : > { %v1326_v39 = vsel %vm1262_vm0, %v1187_v41, %v1294_v45  ;;  %v903_v41 = vsel %vm775_vm8, %v619_v21, %v839_v32  ;;  %v902_v45 = vsel %vm774_vm9, %v706_v25, %v838_v0  ;;  %vm780_vm0 = vcmp.gt.f32.partialorder %v713_v4, 0.0  ;;  %v2441_v21 = vld [vmem:[%s4681_s29 + $0x28] sm:$0xff] }
 0x160   : > { %v1100_v50 = vpop.f32.mrf.mxu2  ;;  %v1356_v55 = vpack.c.bf16 %v1326_v39, %v1325_v46  ;;  %v904_v46 = vsel %vm776_vm10, %v708_v26, %v840_v36  ;;  %v2437_v39 = vld [vmem:[%s4681_s29 + $0x8] sm:$0xff]  ;;  %v908_v20 = vsel %vm780_vm0, %v713_v4, %v844_v7  ;;  %v627_v0 = vadd.f32 %v4603_v12, %v4507_v27 }
 0x161   : > { %v1189_v8 = vpop.f32.mrf.mxu3  ;;  %v1101_v54 = vadd.f32 %v4635_v23, %v1100_v50  ;;  %2475 = vperm.xlu2 %3929, %v2437_v39   ;;  %v941_v50 = vpack.c.bf16 %v903_v41, %v901_v33  ;;  %v629_v36 = vadd.f32 %v4609_v28, %v4507_v27  ;;  %v718_v33 = vadd.f32 %v4611_v31, %v4509_v29  ;;  %v2444_v39 = vld [vmem:[%s4681_s29 + $0x40] sm:$0xff] }
 0x162   : > { %1452 = vmatmul.bf16.gmra.mxu0 %v1356_v55  ;;  %v942_v55 = vpack.c.bf16 %v904_v46, %v902_v45  ;;  %vm781_vm3 = vcmp.gt.f32.partialorder %v627_v0, 0.0  ;;  %v845_v12 = vmul.f32 0.01, %v627_v0  ;;  %v632_v4 = vadd.f32 %v4618_v59, %v4507_v27 }
 0x163   : > { %v1190_v48 = vadd.f32 %v1189_v8, %v1101_v54  ;;  %v2436_v8 = vld [vmem:[%s4681_s29] sm:$0xff]  ;;  %v847_v45 = vmul.f32 0.01, %v629_v36  ;;  %vm783_vm4 = vcmp.gt.f32.partialorder %v629_v36, 0.0  ;;  %v848_v46 = vmul.f32 0.01, %v718_v33 }
 0x164   : > { %2470 = vperm.xlu1 %3928, %v2436_v8   ;;  %v909_v31 = vsel %vm781_vm3, %v627_v0, %v845_v12  ;;  %v2446_v8 = vld [vmem:[%s4681_s29 + $0x50] sm:$0xff]  ;;  %vm785_vm9 = vcmp.gt.f32.partialorder %v632_v4, 0.0 }
 0x165   : > { %v1295_v9 = vmul.f32 0.01, %v1190_v48  ;;  %vm1263_vm5 = vcmp.gt.f32.partialorder %v1190_v48, 0.0 }
 0x167   : > { %v1327_v49 = vsel %vm1263_vm5, %v1190_v48, %v1295_v9  ;;  %v2445_v9 = vld [vmem:[%s4681_s29 + $0x48] sm:$0xff] }
 0x168   : > { %v1102_v1 = vpop.f32.mrf.mxu2  ;;  %2515 = vperm.xlu0 %3930, %v2445_v9   ;;  %v849_v9 = vmul.f32 0.01, %v632_v4 }
 0x169   : > { %v1103_v40 = vadd.f32 %v4635_v23, %v1102_v1  ;;  %v1191_v6 = vpop.f32.mrf.mxu3  ;;  %v711_v1 = vadd.f32 %v4590_v42, %v4509_v29 }
 0x16b   : > { %v1192_v10 = vadd.f32 %v1191_v6, %v1103_v40  ;;  %v2439_v40 = vld [vmem:[%s4681_s29 + $0x18] sm:$0xff]  ;;  %v842_v60 = vmul.f32 0.01, %v711_v1  ;;  %vm778_vm15 = vcmp.gt.f32.partialorder %v711_v1, 0.0 }
 0x16c   : > { %2485 = vperm.xlu2 %3929, %v2439_v40  }
 0x16d   : > { %v1296_v18 = vmul.f32 0.01, %v1192_v10  ;;  %1144 = vmatmul.bf16.gmra.mxu2 %v939_v15  ;;  %vm1264_vm6 = vcmp.gt.f32.partialorder %v1192_v10, 0.0  ;;  %v905_v15 = vsel %vm777_vm13, %v622_v58, %v841_v38  ;;  %v721_v38 = vadd.f32 %v4620_v62, %v4509_v29 }
 0x16e   : > { %1233 = vmatmul.bf16.gmra.mxu3 %v940_v34  ;;  %v907_v34 = vsel %vm779_vm14, %v624_v63, %v843_v57  ;;  %v723_v57 = vadd.f32 %v4630_v16, %v4509_v29 }
 0x16f   : > { %v1328_v19 = vsel %vm1264_vm6, %v1192_v10, %v1296_v18  ;;  %v2440_v10 = vld [vmem:[%s4681_s29 + $0x20] sm:$0xff]  ;;  %v943_v25 = vpack.c.bf16 %v907_v34, %v905_v15  ;;  %vm784_vm6 = vcmp.gt.f32.partialorder %v718_v33, 0.0 }
 0x170   : > { %v1105_v3 = vpop.f32.mrf.mxu2  ;;  %v1357_v14 = vpack.c.bf16 %v1328_v19, %v1327_v49  ;;  %2490 = vperm.xlu1 %3928, %v2440_v10   ;;  %v906_v19 = vsel %vm778_vm15, %v711_v1, %v842_v60  ;;  %v912_v53 = vsel %vm784_vm6, %v718_v33, %v848_v46  ;;  %v852_v59 = vmul.f32 0.01, %v723_v57 }
 0x171   : > { %v1194_v30 = vpop.f32.mrf.mxu3  ;;  %v1106_v13 = vadd.f32 %v4635_v23, %v1105_v3  ;;  %v944_v26 = vpack.c.bf16 %v908_v20, %v906_v19 }
 0x172   : > { %1457 = vmatmul.bf16.gmra.mxu0 %v1357_v14 }
 0x173   : > { %v1195_v2 = vadd.f32 %v1194_v30, %v1106_v13  ;;  %v2442_v13 = vld [vmem:[%s4681_s29 + $0x30] sm:$0xff] }
 0x174   : > { %2495 = vperm.xlu2 %3929, %v2441_v21  }
 0x175   : > { %v1297_v52 = vmul.f32 0.01, %v1195_v2  ;;  %vm1265_vm11 = vcmp.gt.f32.partialorder %v1195_v2, 0.0 }
 0x177   : > { %v1329_v54 = vsel %vm1265_vm11, %v1195_v2, %v1297_v52  ;;  %vm786_vm11 = vcmp.gt.f32.partialorder %v721_v38, 0.0 }
 0x178   : > { %v1107_v24 = vpop.f32.mrf.mxu2  ;;  %2500 = vperm.xlu1 %3928, %v2442_v13  }
 0x179   : > { %v1108_v43 = vadd.f32 %v4635_v23, %v1107_v24  ;;  %v1196_v44 = vpop.f32.mrf.mxu3  ;;  %v716_v24 = vadd.f32 %v4605_v17, %v4509_v29 }
 0x17b   : > { %v1197_v47 = vadd.f32 %v1196_v44, %v1108_v43  ;;  %v2443_v43 = vld [vmem:[%s4681_s29 + $0x38] sm:$0xff]  ;;  %v846_v28 = vmul.f32 0.01, %v716_v24  ;;  %vm782_vm5 = vcmp.gt.f32.partialorder %v716_v24, 0.0 }
 0x17c   : > { %2505 = vperm.xlu2 %3929, %v2443_v43  }
 0x17d   : > { %vm1266_vm12 = vcmp.gt.f32.partialorder %v1197_v47, 0.0  ;;  %v1298_v51 = vmul.f32 0.01, %v1197_v47  ;;  %1149 = vmatmul.bf16.gmra.mxu2 %v941_v50 }
 0x17e   : > { %1238 = vmatmul.bf16.gmra.mxu3 %v942_v55 }
 0x17f   : > { %v1330_v56 = vsel %vm1266_vm12, %v1197_v47, %v1298_v51  ;;  %v911_v47 = vsel %vm783_vm4, %v629_v36, %v847_v45  ;;  %v910_v51 = vsel %vm782_vm5, %v716_v24, %v846_v28  ;;  %vm788_vm12 = vcmp.gt.f32.partialorder %v723_v57, 0.0 }
 0x180   : > { %v1110_v37 = vpop.f32.mrf.mxu2  ;;  %v1358_v48 = vpack.c.bf16 %v1330_v56, %v1329_v54  ;;  %2510 = vperm.xlu1 %3928, %v2444_v39   ;;  %v945_v58 = vpack.c.bf16 %v911_v47, %v909_v31  ;;  %v946_v63 = vpack.c.bf16 %v912_v53, %v910_v51  ;;  %v916_v16 = vsel %vm788_vm12, %v723_v57, %v852_v59  ;;  %v4732_v47 = vld [vmem:[%s6517_s6] ss:$0 sm:$0xff] }
 0x181   : > { %v1199_v5 = vpop.f32.mrf.mxu3  ;;  %v1111_v6 = vadd.f32 %v4635_v23, %v1110_v37 }
 0x182   : > { %1462 = vmatmul.bf16.gmra.mxu0 %v1358_v48 }
 0x183   : > { %v1200_v42 = vadd.f32 %v1199_v5, %v1111_v6  ;;  %v634_v5 = vadd.f32 %v4628_v11, %v4507_v27 }
 0x184   : > { %2520 = vperm.xlu2 %3929, %v2446_v8  }
 0x185   : > { %v1299_v3 = vmul.f32 0.01, %v1200_v42  ;;  %vm1267_vm1 = vcmp.gt.f32.partialorder %v1200_v42, 0.0  ;;  %v851_v10 = vmul.f32 0.01, %v634_v5  ;;  %vm787_vm10 = vcmp.gt.f32.partialorder %v634_v5, 0.0 }
 0x187   : > { %v1331_v35 = vsel %vm1267_vm1, %v1200_v42, %v1299_v3  ;;  %v850_v42 = vmul.f32 0.01, %v721_v38  ;;  %v915_v15 = vsel %vm787_vm10, %v634_v5, %v851_v10 }
 0x188   : > { %v1112_v61 = vpop.f32.mrf.mxu2 }
 0x189   : > { %v1113_v18 = vadd.f32 %v4635_v23, %v1112_v61  ;;  %v1201_v49 = vpop.f32.mrf.mxu3  ;;  %v913_v61 = vsel %vm785_vm9, %v632_v4, %v849_v9  ;;  %v914_v29 = vsel %vm786_vm11, %v721_v38, %v850_v42 }
 0x18a   : > { %v947_v19 = vpack.c.bf16 %v915_v15, %v913_v61  ;;  %v948_v20 = vpack.c.bf16 %v916_v16, %v914_v29 }
 0x18b   : > { %v1202_v14 = vadd.f32 %v1201_v49, %v1113_v18 }
 0x18d   : > { %vm1268_vm2 = vcmp.gt.f32.partialorder %v1202_v14, 0.0  ;;  %v1300_v30 = vmul.f32 0.01, %v1202_v14  ;;  %1154 = vmatmul.bf16.gmra.mxu2 %v943_v25 }
 0x18e   : > { %1243 = vmatmul.bf16.gmra.mxu3 %v944_v26 }
 0x18f   : > { %v1332_v32 = vsel %vm1268_vm2, %v1202_v14, %v1300_v30 }
 0x190   : > { %v1115_v22 = vpop.f32.mrf.mxu2  ;;  %v1359_v2 = vpack.c.bf16 %v1332_v32, %v1331_v35 }
 0x191   : > { %v1204_v41 = vpop.f32.mrf.mxu3  ;;  %v1116_v44 = vadd.f32 %v4635_v23, %v1115_v22 }
 0x192   : > { %1467 = vmatmul.bf16.gmra.mxu0 %v1359_v2 }
 0x193   : > { %v1205_v17 = vadd.f32 %v1204_v41, %v1116_v44 }
 0x195   : > { %v1301_v54 = vmul.f32 0.01, %v1205_v17  ;;  %vm1269_vm7 = vcmp.gt.f32.partialorder %v1205_v17, 0.0 }
 0x197   : > { %v1333_v48 = vsel %vm1269_vm7, %v1205_v17, %v1301_v54 }
 0x198   : > { %v1117_v52 = vpop.f32.mrf.mxu2 }
 0x199   : > { %v1118_v50 = vadd.f32 %v4635_v23, %v1117_v52  ;;  %v1206_v55 = vpop.f32.mrf.mxu3 }
 0x19b   : > { %v1207_v56 = vadd.f32 %v1206_v55, %v1118_v50 }
 0x19d   : > { %vm1270_vm8 = vcmp.gt.f32.partialorder %v1207_v56, 0.0  ;;  %v1302_v37 = vmul.f32 0.01, %v1207_v56  ;;  %1159 = vmatmul.bf16.gmra.mxu2 %v945_v58 }
 0x19e   : > { %1248 = vmatmul.bf16.gmra.mxu3 %v946_v63 }
 0x19f   : > { %v1334_v1 = vsel %vm1270_vm8, %v1207_v56, %v1302_v37 }
 0x1a0   : > { %v1120_v40 = vpop.f32.mrf.mxu2  ;;  %v1360_v6 = vpack.c.bf16 %v1334_v1, %v1333_v48 }
 0x1a1   : > { %v1209_v60 = vpop.f32.mrf.mxu3  ;;  %v1121_v7 = vadd.f32 %v4635_v23, %v1120_v40 }
 0x1a2   : > { %1472 = vmatmul.bf16.gmra.mxu0 %v1360_v6 }
 0x1a3   : > { %v1210_v27 = vadd.f32 %v1209_v60, %v1121_v7 }
 0x1a5   : > { %v1303_v18 = vmul.f32 0.01, %v1210_v27  ;;  %vm1271_vm13 = vcmp.gt.f32.partialorder %v1210_v27, 0.0 }
 0x1a7   : > { %v1335_v3 = vsel %vm1271_vm13, %v1210_v27, %v1303_v18 }
 0x1a8   : > { %v1122_v11 = vpop.f32.mrf.mxu2 }
 0x1a9   : > { %v1123_v62 = vadd.f32 %v4635_v23, %v1122_v11  ;;  %v1211_v34 = vpop.f32.mrf.mxu3 }
 0x1ab   : > { %v1212_v49 = vadd.f32 %v1211_v34, %v1123_v62 }
 0x1ad   : > { %vm1272_vm14 = vcmp.gt.f32.partialorder %v1212_v49, 0.0  ;;  %v1304_v21 = vmul.f32 0.01, %v1212_v49  ;;  %1164 = vmatmul.bf16.gmra.mxu2 %v947_v19 }
 0x1ae   : > { %1253 = vmatmul.bf16.gmra.mxu3 %v948_v20 }
 0x1af   : > { %v1336_v14 = vsel %vm1272_vm14, %v1212_v49, %v1304_v21 }
 0x1b0   : > { %v1125_v25 = vpop.f32.mrf.mxu2  ;;  %v1361_v26 = vpack.c.bf16 %v1336_v14, %v1335_v3 }
 0x1b1   : > { %v1214_v30 = vpop.f32.mrf.mxu3  ;;  %v1126_v13 = vadd.f32 %v4635_v23, %v1125_v25 }
 0x1b2   : > { %1477 = vmatmul.bf16.gmra.mxu0 %v1361_v26 }
 0x1b3   : > { %v1215_v35 = vadd.f32 %v1214_v30, %v1126_v13 }
 0x1b5   : > { %v1305_v22 = vmul.f32 0.01, %v1215_v35  ;;  %vm1273_vm15 = vcmp.gt.f32.partialorder %v1215_v35, 0.0 }
 0x1b7   : > { %v1337_v33 = vsel %vm1273_vm15, %v1215_v35, %v1305_v22 }
 0x1b8   : > { %v1127_v32 = vpop.f32.mrf.mxu2 }
 0x1b9   : > { %v1128_v0 = vadd.f32 %v4635_v23, %v1127_v32  ;;  %v1216_v36 = vpop.f32.mrf.mxu3 }
 0x1bb   : > { %v1217_v2 = vadd.f32 %v1216_v36, %v1128_v0 }
 0x1bd   : > { %vm1274_vm0 = vcmp.gt.f32.partialorder %v1217_v2, 0.0  ;;  %v1306_v24 = vmul.f32 0.01, %v1217_v2 }
 0x1bf   : > { %v1338_v41 = vsel %vm1274_vm0, %v1217_v2, %v1306_v24 }
 0x1c0   : > { %v1130_v43 = vpop.f32.mrf.mxu2  ;;  %v1362_v44 = vpack.c.bf16 %v1338_v41, %v1337_v33 }
 0x1c1   : > { %v1219_v12 = vpop.f32.mrf.mxu3  ;;  %v1131_v45 = vadd.f32 %v4635_v23, %v1130_v43 }
 0x1c2   : > { %1482 = vmatmul.bf16.gmra.mxu0 %v1362_v44 }
 0x1c3   : > { %v1220_v28 = vadd.f32 %v1219_v12, %v1131_v45 }
 0x1c5   : > { %v1307_v52 = vmul.f32 0.01, %v1220_v28  ;;  %vm1275_vm1 = vcmp.gt.f32.partialorder %v1220_v28, 0.0 }
 0x1c7   : > { %v1339_v51 = vsel %vm1275_vm1, %v1220_v28, %v1307_v52 }
 0x1c8   : > { %v1132_v46 = vpop.f32.mrf.mxu2 }
 0x1c9   : > { %v1133_v39 = vadd.f32 %v4635_v23, %v1132_v46  ;;  %v1221_v17 = vpop.f32.mrf.mxu3 }
 0x1cb   : > { %v1222_v31 = vadd.f32 %v1221_v17, %v1133_v39 }
 0x1cd   : > { %vm1276_vm2 = vcmp.gt.f32.partialorder %v1222_v31, 0.0  ;;  %v1308_v50 = vmul.f32 0.01, %v1222_v31 }
 0x1cf   : > { %v1448_v55 = vpop.f32.mrf.mxu0  ;;  %v1340_v53 = vsel %vm1276_vm2, %v1222_v31, %v1308_v50 }
 0x1d0   : > { %v4735_v8 = vadd.f32 %v4732_v47, %v1448_v55  ;;  %v1135_v54 = vpop.f32.mrf.mxu2  ;;  %v1363_v56 = vpack.c.bf16 %v1340_v53, %v1339_v51 }
 0x1d1   : > { %v1224_v58 = vpop.f32.mrf.mxu3  ;;  %v1136_v63 = vadd.f32 %v4635_v23, %v1135_v54 }
 0x1d2   : > { %1487 = vmatmul.bf16.gmra.mxu0 %v1363_v56  ;;  %1531 = vmax.xlane.f32.xlu0 %v4735_v8 }
 0x1d3   : > { %v1225_v37 = vadd.f32 %v1224_v58, %v1136_v63 }
 0x1d5   : > { %v1309_v6 = vmul.f32 0.01, %v1225_v37  ;;  %vm1277_vm3 = vcmp.gt.f32.partialorder %v1225_v37, 0.0 }
 0x1d7   : > { %v1450_v48 = vpop.f32.mrf.mxu0  ;;  %v1341_v7 = vsel %vm1277_vm3, %v1225_v37, %v1309_v6 }
 0x1d8   : > { %v1137_v1 = vpop.f32.mrf.mxu2  ;;  %v4740_v4 = vadd.f32 %v4732_v47, %v1450_v48 }
 0x1d9   : > { %v1138_v5 = vadd.f32 %v4635_v23, %v1137_v1  ;;  %v1226_v40 = vpop.f32.mrf.mxu3 }
 0x1da   : > { %1533 = vmax.xlane.f32.xlu0 %v4740_v4 }
 0x1db   : > { %v1227_v38 = vadd.f32 %v1226_v40, %v1138_v5 }
 0x1dd   : > { %vm1278_vm4 = vcmp.gt.f32.partialorder %v1227_v38, 0.0  ;;  %v1310_v57 = vmul.f32 0.01, %v1227_v38 }
 0x1df   : > { %v1453_v60 = vpop.f32.mrf.mxu0  ;;  %v1342_v9 = vsel %vm1278_vm4, %v1227_v38, %v1310_v57 }
 0x1e0   : > { %v4745_v10 = vadd.f32 %v4732_v47, %v1453_v60  ;;  %v1140_v42 = vpop.f32.mrf.mxu2  ;;  %v1364_v59 = vpack.c.bf16 %v1342_v9, %v1341_v7 }
 0x1e1   : > { %v1229_v27 = vpop.f32.mrf.mxu3  ;;  %v1141_v11 = vadd.f32 %v4635_v23, %v1140_v42 }
 0x1e2   : > { %1492 = vmatmul.bf16.gmra.mxu0 %v1364_v59  ;;  %1535 = vmax.xlane.f32.xlu1 %v4745_v10 }
 0x1e3   : > { %v1230_v61 = vadd.f32 %v1229_v27, %v1141_v11 }
 0x1e5   : > { %v1311_v18 = vmul.f32 0.01, %v1230_v61  ;;  %vm1279_vm5 = vcmp.gt.f32.partialorder %v1230_v61, 0.0 }
 0x1e7   : > { %v1455_v15 = vpop.f32.mrf.mxu0  ;;  %v1343_v21 = vsel %vm1279_vm5, %v1230_v61, %v1311_v18 }
 0x1e8   : > { %v1142_v62 = vpop.f32.mrf.mxu2  ;;  %v4750_v34 = vadd.f32 %v4732_v47, %v1455_v15 }
 0x1e9   : > { %v1143_v29 = vadd.f32 %v4635_v23, %v1142_v62  ;;  %v1231_v16 = vpop.f32.mrf.mxu3 }
 0x1ea   : > { %1537 = vmax.xlane.f32.xlu1 %v4750_v34 }
 0x1eb   : > { %v1232_v49 = vadd.f32 %v1231_v16, %v1143_v29 }
 0x1ed   : > { %vm1280_vm6 = vcmp.gt.f32.partialorder %v1232_v49, 0.0  ;;  %v1312_v19 = vmul.f32 0.01, %v1232_v49 }
 0x1ef   : > { %v1458_v20 = vpop.f32.mrf.mxu0  ;;  %v1344_v3 = vsel %vm1280_vm6, %v1232_v49, %v1312_v19 }
 0x1f0   : > { %v4755_v14 = vadd.f32 %v4732_v47, %v1458_v20  ;;  %v1145_v25 = vpop.f32.mrf.mxu2  ;;  %v1365_v26 = vpack.c.bf16 %v1344_v3, %v1343_v21 }
 0x1f1   : > { %v1234_v30 = vpop.f32.mrf.mxu3  ;;  %v1146_v13 = vadd.f32 %v4635_v23, %v1145_v25 }
 0x1f2   : > { %1497 = vmatmul.bf16.gmra.mxu0 %v1365_v26  ;;  %1539 = vmax.xlane.f32.xlu2 %v4755_v14 }
 0x1f3   : > { %v1235_v35 = vadd.f32 %v1234_v30, %v1146_v13 }
 0x1f5   : > { %v1313_v24 = vmul.f32 0.01, %v1235_v35  ;;  %vm1281_vm7 = vcmp.gt.f32.partialorder %v1235_v35, 0.0 }
 0x1f7   : > { %v1460_v32 = vpop.f32.mrf.mxu0  ;;  %v1345_v44 = vsel %vm1281_vm7, %v1235_v35, %v1313_v24 }
 0x1f8   : > { %v1147_v0 = vpop.f32.mrf.mxu2  ;;  %v4760_v36 = vadd.f32 %v4732_v47, %v1460_v32 }
 0x1f9   : > { %v1148_v22 = vadd.f32 %v4635_v23, %v1147_v0  ;;  %v1236_v2 = vpop.f32.mrf.mxu3 }
 0x1fa   : > { %1541 = vmax.xlane.f32.xlu2 %v4760_v36 }
 0x1fb   : > { %v1237_v33 = vadd.f32 %v1236_v2, %v1148_v22  ;;  %v4794_v22 = vpop.permute.xlu1 %2470 }
 0x1fd   : > { %vm1282_vm8 = vcmp.gt.f32.partialorder %v1237_v33, 0.0  ;;  %v1314_v41 = vmul.f32 0.01, %v1237_v33 }
 0x1ff   : > { %v1463_v43 = vpop.f32.mrf.mxu0  ;;  %v1346_v12 = vsel %vm1282_vm8, %v1237_v33, %v1314_v41 }
 0x200   : > { %v4765_v45 = vadd.f32 %v4732_v47, %v1463_v43  ;;  %v1150_v28 = vpop.f32.mrf.mxu2  ;;  %v1366_v46 = vpack.c.bf16 %v1346_v12, %v1345_v44 }
 0x201   : > { %v1239_v39 = vpop.f32.mrf.mxu3  ;;  %v1151_v17 = vadd.f32 %v4635_v23, %v1150_v28  ;;  %v4800_v28 = vpop.permute.xlu0 %2480 }
 0x202   : > { %1502 = vmatmul.bf16.gmra.mxu0 %v1366_v46  ;;  %1543 = vmax.xlane.f32.xlu0 %v4765_v45 }
 0x203   : > { %v1240_v52 = vadd.f32 %v1239_v39, %v1151_v17  ;;  %v4803_v39 = vpop.permute.xlu2 %2475 }
 0x205   : > { %v1315_v54 = vmul.f32 0.01, %v1240_v52  ;;  %vm1283_vm9 = vcmp.gt.f32.partialorder %v1240_v52, 0.0 }
 0x207   : > { %v1465_v31 = vpop.f32.mrf.mxu0  ;;  %v1347_v37 = vsel %vm1283_vm9, %v1240_v52, %v1315_v54 }
 0x208   : > { %v4770_v50 = vadd.f32 %v4732_v47, %v1465_v31  ;;  %v1152_v55 = vpop.f32.mrf.mxu2 }
 0x209   : > { %v1153_v51 = vadd.f32 %v4635_v23, %v1152_v55  ;;  %v1241_v53 = vpop.f32.mrf.mxu3 }
 0x20a   : > { %1545 = vmax.xlane.f32.xlu1 %v4770_v50 }
 0x20b   : > { %v1242_v56 = vadd.f32 %v1241_v53, %v1153_v51  ;;  %v4808_v51 = vpop.permute.xlu1 %2490 }
 0x20d   : > { %vm1284_vm10 = vcmp.gt.f32.partialorder %v1242_v56, 0.0  ;;  %v1316_v58 = vmul.f32 0.01, %v1242_v56 }
 0x20f   : > { %v1468_v63 = vpop.f32.mrf.mxu0  ;;  %v1348_v48 = vsel %vm1284_vm10, %v1242_v56, %v1316_v58 }
 0x210   : > { %v4775_v1 = vadd.f32 %v4732_v47, %v1468_v63  ;;  %v1155_v5 = vpop.f32.mrf.mxu2  ;;  %v1367_v40 = vpack.c.bf16 %v1348_v48, %v1347_v37  ;;  %v4812_v63 = vpop.permute.xlu0 %2515 }
 0x211   : > { %v1244_v6 = vpop.f32.mrf.mxu3  ;;  %v1156_v38 = vadd.f32 %v4635_v23, %v1155_v5  ;;  %v4814_v48 = vpop.permute.xlu2 %2485 }
 0x212   : > { %1507 = vmatmul.bf16.gmra.mxu0 %v1367_v40  ;;  %1547 = vmax.xlane.f32.xlu2 %v4775_v1 }
 0x213   : > { %v1245_v57 = vadd.f32 %v1244_v6, %v1156_v38 }
 0x215   : > { %v1317_v27 = vmul.f32 0.01, %v1245_v57  ;;  %vm1285_vm11 = vcmp.gt.f32.partialorder %v1245_v57, 0.0 }
 0x217   : > { %v1470_v60 = vpop.f32.mrf.mxu0  ;;  %v1349_v62 = vsel %vm1285_vm11, %v1245_v57, %v1317_v27 }
 0x218   : > { %v4780_v7 = vadd.f32 %v4732_v47, %v1470_v60  ;;  %v1157_v9 = vpop.f32.mrf.mxu2 }
 0x219   : > { %v1158_v42 = vadd.f32 %v4635_v23, %v1157_v9  ;;  %v1246_v59 = vpop.f32.mrf.mxu3 }
 0x21a   : > { %1549 = vmax.xlane.f32.xlu0 %v4780_v7 }
 0x21b   : > { %v1247_v11 = vadd.f32 %v1246_v59, %v1158_v42 }
 0x21d   : > { %vm1286_vm12 = vcmp.gt.f32.partialorder %v1247_v11, 0.0  ;;  %v1318_v61 = vmul.f32 0.01, %v1247_v11 }
 0x21f   : > { %v1473_v15 = vpop.f32.mrf.mxu0  ;;  %v1350_v29 = vsel %vm1286_vm12, %v1247_v11, %v1318_v61  ;;  %v4829_v11 = vpop.permute.xlu2 %2495 }
 0x220   : > { %v4785_v16 = vadd.f32 %v4732_v47, %v1473_v15  ;;  %v1160_v18 = vpop.f32.mrf.mxu2  ;;  %v1368_v49 = vpack.c.bf16 %v1350_v29, %v1349_v62 }
 0x221   : > { %v1249_v19 = vpop.f32.mrf.mxu3  ;;  %v1161_v20 = vadd.f32 %v4635_v23, %v1160_v18 }
 0x222   : > { %1512 = vmatmul.bf16.gmra.mxu0 %v1368_v49  ;;  %1551 = vmax.xlane.f32.xlu1 %v4785_v16 }
 0x223   : > { %v1250_v21 = vadd.f32 %v1249_v19, %v1161_v20 }
 0x225   : > { %v1319_v35 = vmul.f32 0.01, %v1250_v21  ;;  %vm1287_vm13 = vcmp.gt.f32.partialorder %v1250_v21, 0.0 }
 0x227   : > { %v1475_v3 = vpop.f32.mrf.mxu0  ;;  %v1351_v24 = vsel %vm1287_vm13, %v1250_v21, %v1319_v35  ;;  %v4845_v19 = vpop.permute.xlu2 %2505 }
 0x228   : > { %v4790_v25 = vadd.f32 %v4732_v47, %v1475_v3  ;;  %v1162_v26 = vpop.f32.mrf.mxu2 }
 0x229   : > { %v1163_v30 = vadd.f32 %v4635_v23, %v1162_v26  ;;  %v1251_v13 = vpop.f32.mrf.mxu3 }
 0x22a   : > { %1553 = vmax.xlane.f32.xlu2 %v4790_v25 }
 0x22b   : > { %v1252_v32 = vadd.f32 %v1251_v13, %v1163_v30 }
 0x22d   : > { %vm1288_vm14 = vcmp.gt.f32.partialorder %v1252_v32, 0.0  ;;  %v1320_v0 = vmul.f32 0.01, %v1252_v32 }
 0x22f   : > { %v1478_v2 = vpop.f32.mrf.mxu0  ;;  %v1352_v33 = vsel %vm1288_vm14, %v1252_v32, %v1320_v0  ;;  %v4858_v13 = vpop.permute.xlu2 %2520 }
 0x230   : > { %v4797_v41 = vadd.f32 %v4732_v47, %v1478_v2  ;;  %v1165_v43 = vpop.f32.mrf.mxu2  ;;  %v1369_v44 = vpack.c.bf16 %v1352_v33, %v1351_v24 }
 0x231   : > { %v1254_v12 = vpop.f32.mrf.mxu3  ;;  %v1166_v46 = vadd.f32 %v4635_v23, %v1165_v43 }
 0x232   : > { %1517 = vmatmul.bf16.gmra.mxu0 %v1369_v44  ;;  %1555 = vmax.xlane.f32.xlu0 %v4797_v41 }
 0x233   : > { %v1255_v17 = vadd.f32 %v1254_v12, %v1166_v46 }
 0x235   : > { %v1321_v56 = vmul.f32 0.01, %v1255_v17  ;;  %vm1289_vm15 = vcmp.gt.f32.partialorder %v1255_v17, 0.0 }
 0x237   : > { %v1480_v52 = vpop.f32.mrf.mxu0  ;;  %v1353_v5 = vsel %vm1289_vm15, %v1255_v17, %v1321_v56 }
 0x238   : > { %v4806_v31 = vadd.f32 %v4732_v47, %v1480_v52  ;;  %v1167_v55 = vpop.f32.mrf.mxu2 }
 0x239   : > { %v1168_v53 = vadd.f32 %v4635_v23, %v1167_v55  ;;  %v1256_v54 = vpop.f32.mrf.mxu3  ;;  %v4820_v23 = vpop.permute.xlu1 %2500 }
 0x23a   : > { %1557 = vmax.xlane.f32.xlu1 %v4806_v31 }
 0x23b   : > { %v1257_v58 = vadd.f32 %v1256_v54, %v1168_v53 }
 0x23d   : > { %vm1290_vm0 = vcmp.gt.f32.partialorder %v1257_v58, 0.0  ;;  %v1322_v37 = vmul.f32 0.01, %v1257_v58 }
 0x23f   : > { %v1354_v40 = vsel %vm1290_vm0, %v1257_v58, %v1322_v37  ;;  %v1483_v6 = vpop.f32.mrf.mxu0 }
 0x240   : > { %v1370_v38 = vpack.c.bf16 %v1354_v40, %v1353_v5  ;;  %v4817_v57 = vadd.f32 %v4732_v47, %v1483_v6 }
 0x241   : > { %v4832_v61 = vpop.permute.xlu1 %2510 }
 0x242   : > { %1522 = vmatmul.bf16.vlgmr.msra.gmra.mxu2 %v1370_v38  ;;  %1559 = vmax.xlane.f32.xlu2 %v4817_v57 }
 0x245   : > { %v1532_v60 = vpop.xlane.xlu0 %1531 }
 0x246   : > { %v4823_v9 = vsub.f32 %v4735_v8, %v1532_v60 }
 0x247   : > { %v1485_v42 = vpop.f32.mrf.mxu0 }
 0x248   : > { %6603 = vst [vmem:[#allocation8_spill] sm:$0xff] %v4823_v9  ;;  %v1627_v59 = vmul.f32 1.442695, %v4823_v9  ;;  %v4827_v27 = vadd.f32 %v4732_v47, %v1485_v42 }
 0x24a   : > { %3933 = vpow2.f32 %v1627_v59  ;;  %1561 = vmax.xlane.f32.xlu0 %v4827_v27 }
 0x24d   : > { %v1534_v15 = vpop.xlane.xlu0 %1533 }
 0x24e   : > { %v4835_v62 = vsub.f32 %v4740_v4, %v1534_v15 }
 0x24f   : > { %v1488_v29 = vpop.f32.mrf.mxu0 }
 0x250   : > { %6604 = vst [vmem:[#allocation9_spill] sm:$0xff] %v4835_v62  ;;  %v4837_v8 = vpop.eup %3933  ;;  %v1629_v18 = vmul.f32 1.442695, %v4835_v62  ;;  %v4841_v49 = vadd.f32 %v4732_v47, %v1488_v29 }
 0x251   : > { %1691 = vadd.xlane.f32.xlu2 %v4837_v8 }
 0x252   : > { %3935 = vpow2.f32 %v1629_v18  ;;  %1563 = vmax.xlane.f32.xlu1 %v4841_v49 }
 0x255   : > { %v1536_v20 = vpop.xlane.xlu1 %1535 }
 0x256   : > { %v4848_v21 = vsub.f32 %v4745_v10, %v1536_v20 }
 0x257   : > { %v1490_v4 = vpop.f32.mrf.mxu0 }
 0x258   : > { %6605 = vst [vmem:[#allocation10_spill] sm:$0xff] %v4848_v21  ;;  %v4850_v3 = vpop.eup %3935  ;;  %v1631_v26 = vmul.f32 1.442695, %v4848_v21  ;;  %v4854_v30 = vadd.f32 %v4732_v47, %v1490_v4 }
 0x259   : > { %1693 = vadd.xlane.f32.xlu0 %v4850_v3 }
 0x25a   : > { %3937 = vpow2.f32 %v1631_v26  ;;  %1565 = vmax.xlane.f32.xlu2 %v4854_v30 }
 0x25d   : > { %v1538_v35 = vpop.xlane.xlu1 %1537 }
 0x25e   : > { %v4861_v32 = vsub.f32 %v4750_v34, %v1538_v35 }
 0x25f   : > { %v1493_v10 = vpop.f32.mrf.mxu0 }
 0x260   : > { %6606 = vst [vmem:[#allocation11_spill] sm:$0xff] %v4861_v32  ;;  %v4863_v0 = vpop.eup %3937  ;;  %v1633_v2 = vmul.f32 1.442695, %v4861_v32  ;;  %v4867_v24 = vadd.f32 %v4732_v47, %v1493_v10 }
 0x261   : > { %1695 = vadd.xlane.f32.xlu1 %v4863_v0 }
 0x262   : > { %3939 = vpow2.f32 %v1633_v2  ;;  %1567 = vmax.xlane.f32.xlu0 %v4867_v24 }
 0x265   : > { %v1540_v33 = vpop.xlane.xlu2 %1539 }
 0x266   : > { %v4872_v43 = vsub.f32 %v4755_v14, %v1540_v33 }
 0x267   : > { %v1495_v44 = vpop.f32.mrf.mxu0 }
 0x268   : > { %6607 = vst [vmem:[#allocation12_spill] sm:$0xff] %v4872_v43  ;;  %v4874_v34 = vpop.eup %3939  ;;  %v1635_v12 = vmul.f32 1.442695, %v4872_v43  ;;  %v4878_v46 = vadd.f32 %v4732_v47, %v1495_v44 }
 0x269   : > { %1697 = vadd.xlane.f32.xlu2 %v4874_v34 }
 0x26a   : > { %3941 = vpow2.f32 %v1635_v12  ;;  %1569 = vmax.xlane.f32.xlu1 %v4878_v46 }
 0x26d   : > { %v1542_v17 = vpop.xlane.xlu2 %1541 }
 0x26e   : > { %v4883_v52 = vsub.f32 %v4760_v36, %v1542_v17 }
 0x26f   : > { %v1498_v55 = vpop.f32.mrf.mxu0 }
 0x270   : > { %6608 = vst [vmem:[#allocation13_spill] sm:$0xff] %v4883_v52  ;;  %v4885_v14 = vpop.eup %3941  ;;  %v1637_v53 = vmul.f32 1.442695, %v4883_v52  ;;  %v4889_v54 = vadd.f32 %v4732_v47, %v1498_v55 }
 0x271   : > { %1699 = vadd.xlane.f32.xlu0 %v4885_v14 }
 0x272   : > { %3943 = vpow2.f32 %v1637_v53  ;;  %1571 = vmax.xlane.f32.xlu2 %v4889_v54 }
 0x275   : > { %v1544_v56 = vpop.xlane.xlu0 %1543 }
 0x276   : > { %v4894_v58 = vsub.f32 %v4765_v45, %v1544_v56 }
 0x277   : > { %v1500_v37 = vpop.f32.mrf.mxu0 }
 0x278   : > { %6609 = vst [vmem:[#allocation14_spill] sm:$0xff] %v4894_v58  ;;  %v4896_v36 = vpop.eup %3943  ;;  %v1639_v5 = vmul.f32 1.442695, %v4894_v58  ;;  %v4900_v40 = vadd.f32 %v4732_v47, %v1500_v37 }
 0x279   : > { %1701 = vadd.xlane.f32.xlu1 %v4896_v36 }
 0x27a   : > { %3945 = vpow2.f32 %v1639_v5  ;;  %1573 = vmax.xlane.f32.xlu0 %v4900_v40 }
 0x27d   : > { %v1546_v6 = vpop.xlane.xlu1 %1545 }
 0x27e   : > { %v4905_v38 = vsub.f32 %v4770_v50, %v1546_v6 }
 0x27f   : > { %v1503_v60 = vpop.f32.mrf.mxu0 }
 0x280   : > { %6610 = vst [vmem:[#allocation15_spill] sm:$0xff] %v4905_v38  ;;  %v4907_v45 = vpop.eup %3945  ;;  %v1641_v42 = vmul.f32 1.442695, %v4905_v38  ;;  %v4911_v59 = vadd.f32 %v4732_v47, %v1503_v60 }
 0x281   : > { %1703 = vadd.xlane.f32.xlu2 %v4907_v45 }
 0x282   : > { %3947 = vpow2.f32 %v1641_v42  ;;  %1575 = vmax.xlane.f32.xlu1 %v4911_v59  ;;  %v3700_v42 = vld [vmem:[%s6519_s8 + $0x30] sm:$0xff] }
 0x285   : > { %v1548_v15 = vpop.xlane.xlu2 %1547 }
 0x286   : > { %v4916_v29 = vsub.f32 %v4775_v1, %v1548_v15 }
 0x287   : > { %v1505_v18 = vpop.f32.mrf.mxu0 }
 0x288   : > { %6611 = vst [vmem:[#allocation16_spill] sm:$0xff] %v4916_v29  ;;  %v4918_v50 = vpop.eup %3947  ;;  %v1643_v20 = vmul.f32 1.442695, %v4916_v29  ;;  %v4922_v4 = vadd.f32 %v4732_v47, %v1505_v18  ;;  %v3699_v18 = vld [vmem:[%s6519_s8 + $0x28] sm:$0xff] }
 0x289   : > { %1705 = vadd.xlane.f32.xlu0 %v4918_v50 }
 0x28a   : > { %3949 = vpow2.f32 %v1643_v20  ;;  %1577 = vmax.xlane.f32.xlu2 %v4922_v4  ;;  %v3698_v20 = vld [vmem:[%s6519_s8 + $0x20] sm:$0xff] }
 0x28d   : > { %v1550_v26 = vpop.xlane.xlu0 %1549 }
 0x28e   : > { %v4927_v35 = vsub.f32 %v4780_v7, %v1550_v26  ;;  %v2448_v26 = vld [vmem:[%s4681_s29 + $0x60] sm:$0xff] }
 0x28f   : > { %v1508_v10 = vpop.f32.mrf.mxu0 }
 0x290   : > { %6612 = vst [vmem:[#allocation17_spill] sm:$0xff] %v4927_v35  ;;  %v4929_v1 = vpop.eup %3949  ;;  %v1645_v2 = vmul.f32 1.442695, %v4927_v35  ;;  %v4933_v33 = vadd.f32 %v4732_v47, %v1508_v10  ;;  %v3697_v10 = vld [vmem:[%s6519_s8 + $0x18] sm:$0xff] }
 0x291   : > { %1707 = vadd.xlane.f32.xlu1 %v4929_v1 }
 0x292   : > { %3951 = vpow2.f32 %v1645_v2  ;;  %1579 = vmax.xlane.f32.xlu0 %v4933_v33  ;;  %v3696_v2 = vld [vmem:[%s6519_s8 + $0x10] sm:$0xff] }
 0x295   : > { %v1552_v44 = vpop.xlane.xlu1 %1551 }
 0x296   : > { %v4938_v12 = vsub.f32 %v4785_v16, %v1552_v44  ;;  %v2449_v44 = vld [vmem:[%s4681_s29 + $0x68] sm:$0xff] }
 0x297   : > { %v1510_v17 = vpop.f32.mrf.mxu0 }
 0x298   : > { %6613 = vst [vmem:[#allocation18_spill] sm:$0xff] %v4938_v12  ;;  %v4940_v7 = vpop.eup %3951  ;;  %v1647_v55 = vmul.f32 1.442695, %v4938_v12  ;;  %v4944_v53 = vadd.f32 %v4732_v47, %v1510_v17  ;;  %v3695_v17 = vld [vmem:[%s6519_s8 + $0x8] sm:$0xff] }
 0x299   : > { %1709 = vadd.xlane.f32.xlu2 %v4940_v7 }
 0x29a   : > { %3953 = vpow2.f32 %v1647_v55  ;;  %1581 = vmax.xlane.f32.xlu1 %v4944_v53 }
 0x29d   : > { %v1554_v56 = vpop.xlane.xlu2 %1553 }
 0x29e   : > { %v4949_v37 = vsub.f32 %v4790_v25, %v1554_v56  ;;  %v3701_v25 = vld [vmem:[%s6519_s8 + $0x38] sm:$0xff] }
 0x29f   : > { %v1513_v5 = vpop.f32.mrf.mxu0  ;;  %2347 = vmatpush.bf16.msrb.mxu1 %v3701_v25 }
 0x2a0   : > { %6614 = vst [vmem:[#allocation19_spill] sm:$0xff] %v4949_v37  ;;  %v4951_v16 = vpop.eup %3953  ;;  %v1649_v6 = vmul.f32 1.442695, %v4949_v37  ;;  %v4955_v60 = vadd.f32 %v4732_v47, %v1513_v5  ;;  %v3694_v5 = vld [vmem:[%s6519_s8] sm:$0xff] }
 0x2a1   : > { %1711 = vadd.xlane.f32.xlu0 %v4951_v16 }
 0x2a2   : > { %3955 = vpow2.f32 %v1649_v6  ;;  %1583 = vmax.xlane.f32.xlu2 %v4955_v60  ;;  %v2447_v6 = vld [vmem:[%s4681_s29 + $0x58] sm:$0xff] }
 0x2a3   : > { %2348 = vmatpush.bf16.msrb.mxu1 %v3700_v42 }
 0x2a5   : > { %v1556_v55 = vpop.xlane.xlu0 %1555 }
 0x2a6   : > { %v5010_v58 = vsub.f32 %v4797_v41, %v1556_v55 }
 0x2a7   : > { %2349 = vmatpush.bf16.msrb.mxu1 %v3699_v18  ;;  %v1515_v12 = vpop.f32.mrf.mxu0 }
 0x2a8   : > { %v4965_v15 = vpop.eup %3955  ;;  %6617 = vst [vmem:[#allocation22_spill] sm:$0xff] %v5010_v58  ;;  %v1651_v55 = vmul.f32 1.442695, %v5010_v58 }
 0x2a9   : > { %1713 = vadd.xlane.f32.xlu1 %v4965_v15 }
 0x2ab   : > { %2350 = vmatpush.bf16.msrb.mxu1 %v3698_v20 }
 0x2ad   : > { %v1558_v25 = vpop.xlane.xlu1 %1557 }
 0x2ae   : > { %v5020_v52 = vsub.f32 %v4806_v31, %v1558_v25 }
 0x2af   : > { %2351 = vmatpush.bf16.msrb.mxu1 %v3697_v10  ;;  %v1518_v31 = vpop.f32.mrf.mxu0 }
 0x2b0   : > { %6619 = vst [vmem:[#allocation24_spill] sm:$0xff] %v5020_v52 }
 0x2b3   : > { %2352 = vmatpush.bf16.msrb.mxu1 %v3696_v2 }
 0x2b5   : > { %2530 = vperm.xlu0 %3930, %v2448_v26   ;;  %v4985_v56 = vpop.xlane.xlu2 %1559 }
 0x2b7   : > { %2353 = vmatpush.bf16.msrb.mxu1 %v3695_v17 }
 0x2ba   : > { %2535 = vperm.xlu2 %3929, %v2449_v44  }
 0x2bb   : > { %2354 = vmatpush.bf16.msrb.mxu1 %v3694_v5 }
 0x2bd   : > { %v4991_v42 = vpop.xlane.xlu0 %1561 }
 0x2c2   : > { %2525 = vperm.xlu1 %3928, %v2447_v6  }
 0x2c4   : > { %v4993_v18 = vpop.xlane.xlu2 %1691 }
 0x2c5   : > { %6615 = vst [vmem:[#allocation20_spill] sm:$0xff] %v4993_v18  ;;  %3957 = vrcp.f32 %v4993_v18  ;;  %v4997_v10 = vpop.xlane.xlu1 %1563  ;;  %v1766_v17 = vand.u32 2147483648, %v4993_v18  ;;  %v1764_v6 = vand.u32 2147483647, %v4993_v18  ;;  %vm1760_vm2 = vweird.f32 %v4993_v18 }
 0x2c7   : > { %v1767_v38 = vor.u32 1.1754944e-38, %v1766_v17  ;;  %vm1765_vm4 = vcmp.eq.f32.partialorder %v1764_v6, 8.507059e+37 }
 0x2cb   : > { %v3958_v20 = vpop.eup %3957 }
 0x2cc   : > { %v1756_v26 = vmul.f32 %v3958_v20, %v4993_v18  ;;  %v4999_v2 = vpop.xlane.xlu0 %1693  ;;  %vm1761_vm1 = vweird.f32 %v3958_v20 }
 0x2cd   : > { %6616 = vst [vmem:[#allocation21_spill] sm:$0xff] %v4999_v2  ;;  %3959 = vrcp.f32 %v4999_v2  ;;  %vm1762_vm3 = vmor %vm1760_vm2, %vm1761_vm1  ;;  %v5013_v29 = vpop.xlane.xlu2 %1565  ;;  %v1780_v41 = vand.u32 2147483648, %v4999_v2  ;;  %v1778_v62 = vand.u32 2147483647, %v4999_v2  ;;  %vm1774_vm6 = vweird.f32 %v4999_v2 }
 0x2ce   : > { %v1757_v44 = vsub.f32 1.0, %v1756_v26 }
 0x2cf   : > { %vm1779_vm8 = vcmp.eq.f32.partialorder %v1778_v62, 8.507059e+37 }
 0x2d0   : > { %v1758_v5 = vmul.f32 %v3958_v20, %v1757_v44 }
 0x2d2   : > { %v1759_v35 = vadd.f32 %v3958_v20, %v1758_v5 }
 0x2d3   : > { %v3960_v37 = vpop.eup %3959 }
 0x2d4   : > { %v1770_v26 = vmul.f32 %v3960_v37, %v4999_v2  ;;  %v5015_v43 = vpop.xlane.xlu1 %1695  ;;  %v1763_v44 = vsel %vm1762_vm3, %v3958_v20, %v1759_v35  ;;  %vm1775_vm5 = vweird.f32 %v3960_v37 }
 0x2d5   : > { %6618 = vst [vmem:[#allocation23_spill] sm:$0xff] %v5015_v43  ;;  %3961 = vrcp.f32 %v5015_v43  ;;  %v1768_v32 = vsel %vm1765_vm4, %v1767_v38, %v1763_v44  ;;  %vm1776_vm7 = vmor %vm1774_vm6, %vm1775_vm5  ;;  %v1792_v62 = vand.u32 2147483647, %v5015_v43  ;;  %vm1788_vm10 = vweird.f32 %v5015_v43 }
 0x2d6   : > { %v1771_v18 = vsub.f32 1.0, %v1770_v26  ;;  %v2203_v5 = vmul.f32 %v4837_v8, %v1768_v32  ;;  %v1653_v8 = vmul.f32 1.442695, %v5020_v52  ;;  %v1781_v32 = vor.u32 1.1754944e-38, %v1780_v41 }
 0x2d7   : > { %3963 = vpow2.f32 %v1651_v55  ;;  %v5034_v26 = vadd.f32 %v4732_v47, %v1515_v12  ;;  %v1794_v41 = vand.u32 2147483648, %v5015_v43  ;;  %vm1793_vm12 = vcmp.eq.f32.partialorder %v1792_v62, 8.507059e+37 }
 0x2d8   : > { %v1772_v17 = vmul.f32 %v3960_v37, %v1771_v18  ;;  %2235 = vst [vmem:[%s5025_s27] sm:$0xff] %v2203_v5  ;;  %v1568_v18 = vpop.xlane.xlu0 %1567 }
 0x2da   : > { %v1773_v38 = vadd.f32 %v3960_v37, %v1772_v17 }
 0x2db   : > { %v3962_v35 = vpop.eup %3961 }
 0x2dc   : > { %v1784_v25 = vmul.f32 %v3962_v35, %v5015_v43  ;;  %v5031_v20 = vpop.xlane.xlu2 %1697  ;;  %v1777_v6 = vsel %vm1776_vm7, %v3960_v37, %v1773_v38  ;;  %vm1789_vm9 = vweird.f32 %v3962_v35 }
 0x2dd   : > { %6620 = vst [vmem:[#allocation25_spill] sm:$0xff] %v5031_v20  ;;  %3965 = vrcp.f32 %v5031_v20  ;;  %v1782_v44 = vsel %vm1779_vm8, %v1781_v32, %v1777_v6  ;;  %v5042_v37 = vpop.eup %3963  ;;  %vm1790_vm11 = vmor %vm1788_vm10, %vm1789_vm9  ;;  %v1570_v32 = vpop.xlane.xlu1 %1569  ;;  %v1806_v62 = vand.u32 2147483647, %v5031_v20  ;;  %vm1802_vm14 = vweird.f32 %v5031_v20 }
 0x2de   : > { %v1785_v17 = vsub.f32 1.0, %v1784_v25  ;;  %v2204_v52 = vmul.f32 %v4850_v3, %v1782_v44  ;;  %3967 = vpow2.f32 %v1653_v8  ;;  %v5047_v3 = vsub.f32 %v4817_v57, %v4985_v56  ;;  %v1520_v56 = vpop.f32.mrf.mxu0 }
 0x2df   : > { %1585 = vmax.xlane.f32.xlu0 %v5034_v26  ;;  %v1795_v8 = vor.u32 1.1754944e-38, %v1794_v41  ;;  %vm1807_vm0 = vcmp.eq.f32.partialorder %v1806_v62, 8.507059e+37 }
 0x2e0   : > { %2236 = vst [vmem:[%s5025_s27 + $0x8] sm:$0xff] %v2204_v52  ;;  %v2267_v55 = vpack.c.bf16 %v2204_v52, %v2203_v5  ;;  %v1786_v2 = vmul.f32 %v3962_v35, %v1785_v17  ;;  %v5052_v52 = vsub.f32 %v4827_v27, %v4991_v42  ;;  %v1655_v27 = vmul.f32 1.442695, %v5047_v3 }
 0x2e1   : > { %6621 = vst [vmem:[#allocation26_spill] sm:$0xff] %v5047_v3  ;;  %v5064_v42 = vsub.f32 %v4841_v49, %v4997_v10 }
 0x2e2   : > { %2355 = vmatmul.bf16.vlgmr.msrb.gmra.mxu1 %v2267_v55  ;;  %v1787_v12 = vadd.f32 %v3962_v35, %v1786_v2  ;;  %6622 = vst [vmem:[#allocation27_spill] sm:$0xff] %v5052_v52  ;;  %v1657_v41 = vmul.f32 1.442695, %v5052_v52 }
 0x2e3   : > { %v3966_v38 = vpop.eup %3965  ;;  %1715 = vadd.xlane.f32.xlu2 %v5042_v37  ;;  %6624 = vst [vmem:[#allocation29_spill] sm:$0xff] %v5064_v42 }
 0x2e4   : > { %v1798_v5 = vmul.f32 %v3966_v38, %v5031_v20  ;;  %v5055_v25 = vpop.xlane.xlu0 %1699  ;;  %v1791_v2 = vsel %vm1790_vm11, %v3962_v35, %v1787_v12  ;;  %v5057_v6 = vpop.eup %3967  ;;  %v1808_v35 = vand.u32 2147483648, %v5031_v20  ;;  %vm1803_vm13 = vweird.f32 %v3966_v38 }
 0x2e5   : > { %6623 = vst [vmem:[#allocation28_spill] sm:$0xff] %v5055_v25  ;;  %3969 = vrcp.f32 %v5055_v25  ;;  %v1796_v57 = vsel %vm1793_vm12, %v1795_v8, %v1791_v2  ;;  %v5072_v12 = vadd.f32 %v4732_v47, %v1520_v56  ;;  %v1523_v8 = vpop.f32.mrf.mxu2  ;;  %v5080_v2 = vsub.f32 %v4867_v24, %v1568_v18  ;;  %vm1804_vm15 = vmor %vm1802_vm14, %vm1803_vm13 }
 0x2e6   : > { %v1799_v44 = vsub.f32 1.0, %v1798_v5  ;;  %v2205_v17 = vmul.f32 %v4863_v0, %v1796_v57  ;;  %v5075_v0 = vadd.f32 %v4732_v47, %v1518_v31  ;;  %3971 = vpow2.f32 %v1655_v27  ;;  %v1572_v31 = vpop.xlane.xlu2 %1571 }
 0x2e7   : > { %1717 = vadd.xlane.f32.xlu0 %v5057_v6  ;;  %v1659_v5 = vmul.f32 1.442695, %v5064_v42  ;;  %6625 = vst [vmem:[#allocation30_spill] sm:$0xff] %v5080_v2  ;;  %v1809_v57 = vor.u32 1.1754944e-38, %v1808_v35  ;;  %3973 = vpow2.f32 %v1657_v41  ;;  %v5088_v27 = vadd.f32 %v4732_v47, %v1523_v8 }
 0x2e8   : > { %v1800_v55 = vmul.f32 %v3966_v38, %v1799_v44  ;;  %2237 = vst [vmem:[%s5025_s27 + $0x10] sm:$0xff] %v2205_v17  ;;  %v1663_v41 = vmul.f32 1.442695, %v5080_v2  ;;  %v5094_v42 = vsub.f32 %v4878_v46, %v1570_v32  ;;  %vm1816_vm2 = vweird.f32 %v5055_v25 }
 0x2e9   : > { %v5107_v32 = vsub.f32 %v4854_v30, %v5013_v29 }
 0x2ea   : > { %v1801_v49 = vadd.f32 %v3966_v38, %v1800_v55  ;;  %6627 = vst [vmem:[#allocation32_spill] sm:$0xff] %v5094_v42 }
 0x2eb   : > { %v3970_v10 = vpop.eup %3969  ;;  %1589 = vmax.xlane.f32.xlu2 %v5072_v12  ;;  %6628 = vst [vmem:[#allocation33_spill] sm:$0xff] %v5107_v32 }
 0x2ec   : > { %v1812_v56 = vmul.f32 %v3970_v10, %v5055_v25  ;;  %1587 = vmax.xlane.f32.xlu1 %v5075_v0  ;;  %v5085_v44 = vpop.xlane.xlu1 %1701  ;;  %v1805_v55 = vsel %vm1804_vm15, %v3966_v38, %v1801_v49  ;;  %v1822_v38 = vand.u32 2147483648, %v5055_v25  ;;  %vm1817_vm1 = vweird.f32 %v3970_v10 }
 0x2ed   : > { %6626 = vst [vmem:[#allocation31_spill] sm:$0xff] %v5085_v44  ;;  %3975 = vrcp.f32 %v5085_v44  ;;  %v1810_v24 = vsel %vm1807_vm0, %v1809_v57, %v1805_v55  ;;  %v1820_v49 = vand.u32 2147483647, %v5055_v25  ;;  %v5100_v57 = vpop.eup %3971  ;;  %vm1818_vm3 = vmor %vm1816_vm2, %vm1817_vm1  ;;  %vm1830_vm6 = vweird.f32 %v5085_v44 }
 0x2ee   : > { %v1813_v18 = vsub.f32 1.0, %v1812_v56  ;;  %v2206_v35 = vmul.f32 %v4874_v34, %v1810_v24  ;;  %3977 = vpow2.f32 %v1659_v5  ;;  %v1574_v56 = vpop.xlane.xlu0 %1573  ;;  %v5102_v34 = vpop.eup %3973  ;;  %v1823_v55 = vor.u32 1.1754944e-38, %v1822_v38 }
 0x2ef   : > { %1591 = vmax.xlane.f32.xlu0 %v5088_v27  ;;  %3979 = vpow2.f32 %v1663_v41  ;;  %vm1821_vm4 = vcmp.eq.f32.partialorder %v1820_v49, 8.507059e+37 }
 0x2f0   : > { %2238 = vst [vmem:[%s5025_s27 + $0x18] sm:$0xff] %v2206_v35  ;;  %v2268_v62 = vpack.c.bf16 %v2206_v35, %v2205_v17  ;;  %v1814_v8 = vmul.f32 %v3970_v10, %v1813_v18  ;;  %v1665_v17 = vmul.f32 1.442695, %v5094_v42  ;;  %v5113_v18 = vsub.f32 %v4900_v40, %v1574_v56  ;;  %v1525_v42 = vpop.f32.mrf.mxu2 }
 0x2f1   : > { %v1661_v40 = vmul.f32 1.442695, %v5107_v32  ;;  %v1834_v56 = vand.u32 2147483647, %v5085_v44 }
 0x2f2   : > { %2360 = vmatmul.bf16.gmra.mxu1 %v2268_v62  ;;  %v1815_v5 = vadd.f32 %v3970_v10, %v1814_v8  ;;  %6629 = vst [vmem:[#allocation34_spill] sm:$0xff] %v5113_v18  ;;  %v1669_v49 = vmul.f32 1.442695, %v5113_v18 }
 0x2f3   : > { %v3976_v46 = vpop.eup %3975  ;;  %1721 = vadd.xlane.f32.xlu2 %v5102_v34  ;;  %vm1835_vm8 = vcmp.eq.f32.partialorder %v1834_v56, 8.507059e+37 }
 0x2f4   : > { %v1826_v24 = vmul.f32 %v3976_v46, %v5085_v44  ;;  %1719 = vadd.xlane.f32.xlu1 %v5100_v57  ;;  %v5116_v35 = vpop.xlane.xlu2 %1703  ;;  %v1819_v62 = vsel %vm1818_vm3, %v3970_v10, %v1815_v5  ;;  %v5118_v30 = vpop.eup %3977  ;;  %v1836_v10 = vand.u32 2147483648, %v5085_v44  ;;  %vm1831_vm5 = vweird.f32 %v3976_v46 }
 0x2f5   : > { %6630 = vst [vmem:[#allocation35_spill] sm:$0xff] %v5116_v35  ;;  %3981 = vrcp.f32 %v5116_v35  ;;  %v1576_v29 = vpop.xlane.xlu1 %1575  ;;  %v1824_v41 = vsel %vm1821_vm4, %v1823_v55, %v1819_v62  ;;  %v5131_v55 = vpop.eup %3979  ;;  %v5138_v62 = vsub.f32 %v4889_v54, %v1572_v31  ;;  %vm1832_vm7 = vmor %vm1830_vm6, %vm1831_vm5  ;;  %v1848_v56 = vand.u32 2147483647, %v5116_v35 }
 0x2f6   : > { %v1827_v8 = vsub.f32 1.0, %v1826_v24  ;;  %v2207_v38 = vmul.f32 %v4885_v14, %v1824_v41  ;;  %3983 = vpow2.f32 %v1665_v17  ;;  %v5128_v5 = vsub.f32 %v4911_v59, %v1576_v29 }
 0x2f7   : > { %1723 = vadd.xlane.f32.xlu0 %v5118_v30  ;;  %v5134_v14 = vadd.f32 %v4732_v47, %v1525_v42  ;;  %3985 = vpow2.f32 %v1661_v40  ;;  %6632 = vst [vmem:[#allocation37_spill] sm:$0xff] %v5138_v62  ;;  %v1837_v59 = vor.u32 1.1754944e-38, %v1836_v10  ;;  %v1667_v40 = vmul.f32 1.442695, %v5138_v62 }
 0x2f8   : > { %6631 = vst [vmem:[#allocation36_spill] sm:$0xff] %v5128_v5  ;;  %v1828_v2 = vmul.f32 %v3976_v46, %v1827_v8  ;;  %3987 = vpow2.f32 %v1669_v49  ;;  %v1671_v47 = vmul.f32 1.442695, %v5128_v5  ;;  %v1850_v10 = vand.u32 2147483648, %v5116_v35 }
 0x2f9   : > { %2239 = vst [vmem:[%s5025_s27 + $0x20] sm:$0xff] %v2207_v38  ;;  %vm1844_vm10 = vweird.f32 %v5116_v35  ;;  %vm1849_vm12 = vcmp.eq.f32.partialorder %v1848_v56, 8.507059e+37 }
 0x2fa   : > { %v1829_v17 = vadd.f32 %v3976_v46, %v1828_v2 }
 0x2fb   : > { %v3982_v24 = vpop.eup %3981  ;;  %1727 = vadd.xlane.f32.xlu2 %v5131_v55 }
 0x2fc   : > { %v1840_v29 = vmul.f32 %v3982_v24, %v5116_v35  ;;  %1593 = vmax.xlane.f32.xlu1 %v5134_v14  ;;  %v5144_v42 = vpop.xlane.xlu0 %1705  ;;  %v1833_v2 = vsel %vm1832_vm7, %v3976_v46, %v1829_v17  ;;  %v5146_v41 = vpop.eup %3983  ;;  %vm1845_vm9 = vweird.f32 %v3982_v24 }
 0x2fd   : > { %6633 = vst [vmem:[#allocation38_spill] sm:$0xff] %v5144_v42  ;;  %3989 = vrcp.f32 %v5144_v42  ;;  %v1838_v54 = vsel %vm1835_vm8, %v1837_v59, %v1833_v2  ;;  %v5155_v17 = vpop.eup %3985  ;;  %v1578_v5 = vpop.xlane.xlu2 %1577  ;;  %vm1846_vm11 = vmor %vm1844_vm10, %vm1845_vm9  ;;  %v1851_v2 = vor.u32 1.1754944e-38, %v1850_v10  ;;  %vm1858_vm14 = vweird.f32 %v5144_v42 }
 0x2fe   : > { %v1841_v31 = vsub.f32 1.0, %v1840_v29  ;;  %v2208_v8 = vmul.f32 %v4896_v36, %v1838_v54  ;;  %3991 = vpow2.f32 %v1671_v47  ;;  %v5157_v59 = vpop.eup %3987 }
 0x2ff   : > { %1729 = vadd.xlane.f32.xlu0 %v5146_v41  ;;  %3993 = vpow2.f32 %v1667_v40 }
 0x300   : > { %2240 = vst [vmem:[%s5025_s27 + $0x28] sm:$0xff] %v2208_v8  ;;  %v2269_v49 = vpack.c.bf16 %v2208_v8, %v2207_v38  ;;  %v1842_v46 = vmul.f32 %v3982_v24, %v1841_v31  ;;  %v5163_v38 = vsub.f32 %v4922_v4, %v1578_v5  ;;  %v1862_v5 = vand.u32 2147483647, %v5144_v42 }
 0x302   : > { %2365 = vmatmul.bf16.gmra.mxu1 %v2269_v49  ;;  %v1843_v36 = vadd.f32 %v3982_v24, %v1842_v46  ;;  %6634 = vst [vmem:[#allocation39_spill] sm:$0xff] %v5163_v38  ;;  %v1673_v56 = vmul.f32 1.442695, %v5163_v38  ;;  %vm1863_vm0 = vcmp.eq.f32.partialorder %v1862_v5, 8.507059e+37 }
 0x303   : > { %v3990_v29 = vpop.eup %3989  ;;  %1733 = vadd.xlane.f32.xlu2 %v5157_v59 }
 0x304   : > { %v1854_v47 = vmul.f32 %v3990_v29, %v5144_v42  ;;  %v5165_v54 = vpop.xlane.xlu1 %1707  ;;  %1725 = vadd.xlane.f32.xlu1 %v5155_v17  ;;  %v1847_v31 = vsel %vm1846_vm11, %v3982_v24, %v1843_v36  ;;  %v5169_v49 = vpop.eup %3991  ;;  %v1864_v24 = vand.u32 2147483648, %v5144_v42  ;;  %vm1859_vm13 = vweird.f32 %v3990_v29 }
 0x305   : > { %6635 = vst [vmem:[#allocation40_spill] sm:$0xff] %v5165_v54  ;;  %3995 = vrcp.f32 %v5165_v54  ;;  %v1580_v8 = vpop.xlane.xlu0 %1579  ;;  %v1852_v40 = vsel %vm1849_vm12, %v1851_v2, %v1847_v31  ;;  %v5181_v2 = vpop.eup %3993  ;;  %vm1860_vm15 = vmor %vm1858_vm14, %vm1859_vm13  ;;  %v1876_v38 = vand.u32 2147483647, %v5165_v54  ;;  %vm1872_vm2 = vweird.f32 %v5165_v54 }
 0x306   : > { %v1855_v46 = vsub.f32 1.0, %v1854_v47  ;;  %v5172_v10 = vsub.f32 %v4933_v33, %v1580_v8  ;;  %v2209_v4 = vmul.f32 %v4907_v45, %v1852_v40  ;;  %v1865_v47 = vor.u32 1.1754944e-38, %v1864_v24 }
 0x307   : > { %1735 = vadd.xlane.f32.xlu0 %v5169_v49  ;;  %vm1877_vm4 = vcmp.eq.f32.partialorder %v1876_v38, 8.507059e+37 }
 0x308   : > { %6636 = vst [vmem:[#allocation41_spill] sm:$0xff] %v5172_v10  ;;  %v1675_v36 = vmul.f32 1.442695, %v5172_v10  ;;  %v1856_v62 = vmul.f32 %v3990_v29, %v1855_v46 }
 0x309   : > { %2241 = vst [vmem:[%s5025_s27 + $0x30] sm:$0xff] %v2209_v4 }
 0x30a   : > { %3997 = vpow2.f32 %v1675_v36  ;;  %v1857_v33 = vadd.f32 %v3990_v29, %v1856_v62 }
 0x30b   : > { %v3996_v45 = vpop.eup %3995  ;;  %3999 = vpow2.f32 %v1673_v56  ;;  %v1878_v56 = vand.u32 2147483648, %v5165_v54 }
 0x30c   : > { %v1868_v31 = vmul.f32 %v3996_v45, %v5165_v54  ;;  %1731 = vadd.xlane.f32.xlu1 %v5181_v2  ;;  %v5186_v8 = vpop.xlane.xlu2 %1709  ;;  %v1861_v40 = vsel %vm1860_vm15, %v3990_v29, %v1857_v33  ;;  %vm1873_vm1 = vweird.f32 %v3996_v45 }
 0x30d   : > { %6637 = vst [vmem:[#allocation42_spill] sm:$0xff] %v5186_v8  ;;  %4001 = vrcp.f32 %v5186_v8  ;;  %v1582_v46 = vpop.xlane.xlu1 %1581  ;;  %v1866_v36 = vsel %vm1863_vm0, %v1865_v47, %v1861_v40  ;;  %vm1874_vm3 = vmor %vm1872_vm2, %vm1873_vm1  ;;  %v1879_v47 = vor.u32 1.1754944e-38, %v1878_v56  ;;  %v1892_v56 = vand.u32 2147483648, %v5186_v8 }
 0x30e   : > { %v1869_v62 = vsub.f32 1.0, %v1868_v31  ;;  %v5190_v10 = vsub.f32 %v4944_v53, %v1582_v46  ;;  %v2210_v24 = vmul.f32 %v4918_v50, %v1866_v36  ;;  %v1890_v38 = vand.u32 2147483647, %v5186_v8 }
 0x30f   : > { %vm1886_vm6 = vweird.f32 %v5186_v8 }
 0x310   : > { %6638 = vst [vmem:[#allocation43_spill] sm:$0xff] %v5190_v10  ;;  %v5195_v18 = vpop.eup %3997  ;;  %v1870_v32 = vmul.f32 %v3996_v45, %v1869_v62  ;;  %v1677_v29 = vmul.f32 1.442695, %v5190_v10  ;;  %v2270_v5 = vpack.c.bf16 %v2210_v24, %v2209_v4  ;;  %vm1891_vm8 = vcmp.eq.f32.partialorder %v1890_v38, 8.507059e+37 }
 0x311   : > { %2242 = vst [vmem:[%s5025_s27 + $0x38] sm:$0xff] %v2210_v24  ;;  %1739 = vadd.xlane.f32.xlu2 %v5195_v18  ;;  %v5200_v33 = vpop.eup %3999 }
 0x312   : > { %4003 = vpow2.f32 %v1677_v29  ;;  %2370 = vmatmul.bf16.gmra.mxu1 %v2270_v5  ;;  %v1871_v50 = vadd.f32 %v3996_v45, %v1870_v32 }
 0x313   : > { %v4002_v53 = vpop.eup %4001 }
 0x314   : > { %v1882_v31 = vmul.f32 %v4002_v53, %v5186_v8  ;;  %1737 = vadd.xlane.f32.xlu1 %v5200_v33  ;;  %v5205_v40 = vpop.xlane.xlu0 %1711  ;;  %v1875_v4 = vsel %vm1874_vm3, %v3996_v45, %v1871_v50  ;;  %vm1887_vm5 = vweird.f32 %v4002_v53 }
 0x315   : > { %6639 = vst [vmem:[#allocation44_spill] sm:$0xff] %v5205_v40  ;;  %4005 = vrcp.f32 %v5205_v40  ;;  %v1584_v46 = vpop.xlane.xlu2 %1583  ;;  %v1880_v36 = vsel %vm1877_vm4, %v1879_v47, %v1875_v4  ;;  %vm1888_vm7 = vmor %vm1886_vm6, %vm1887_vm5  ;;  %vm1900_vm10 = vweird.f32 %v5205_v40 }
 0x316   : > { %v1883_v62 = vsub.f32 1.0, %v1882_v31  ;;  %v5209_v24 = vsub.f32 %v4955_v60, %v1584_v46  ;;  %v2211_v32 = vmul.f32 %v4929_v1, %v1880_v36  ;;  %v1893_v1 = vor.u32 1.1754944e-38, %v1892_v56 }
 0x318   : > { %6640 = vst [vmem:[#allocation45_spill] sm:$0xff] %v5209_v24  ;;  %v5213_v29 = vpop.eup %4003  ;;  %v1884_v5 = vmul.f32 %v4002_v53, %v1883_v62  ;;  %v1679_v10 = vmul.f32 1.442695, %v5209_v24  ;;  %v1906_v62 = vand.u32 2147483648, %v5205_v40  ;;  %v1904_v24 = vand.u32 2147483647, %v5205_v40 }
 0x319   : > { %2243 = vst [vmem:[%s5025_s27 + $0x40] sm:$0xff] %v2211_v32  ;;  %1741 = vadd.xlane.f32.xlu0 %v5213_v29 }
 0x31a   : > { %4007 = vpow2.f32 %v1679_v10  ;;  %v1885_v60 = vadd.f32 %v4002_v53, %v1884_v5  ;;  %vm1905_vm12 = vcmp.eq.f32.partialorder %v1904_v24, 8.507059e+37 }
 0x31b   : > { %v4006_v45 = vpop.eup %4005 }
 0x31c   : > { %v1896_v50 = vmul.f32 %v4006_v45, %v5205_v40  ;;  %v5221_v47 = vpop.xlane.xlu1 %1713  ;;  %v1889_v31 = vsel %vm1888_vm7, %v4002_v53, %v1885_v60  ;;  %vm1901_vm9 = vweird.f32 %v4006_v45 }
 0x31d   : > { %6641 = vst [vmem:[#allocation46_spill] sm:$0xff] %v5221_v47  ;;  %4009 = vrcp.f32 %v5221_v47  ;;  %v1894_v4 = vsel %vm1891_vm8, %v1893_v1, %v1889_v31  ;;  %vm1902_vm11 = vmor %vm1900_vm10, %vm1901_vm9  ;;  %v2452_v31 = vld [vmem:[%s4681_s29 + $0x80] sm:$0xff]  ;;  %vm1914_vm14 = vweird.f32 %v5221_v47 }
 0x31e   : > { %v1897_v46 = vsub.f32 1.0, %v1896_v50  ;;  %v2212_v36 = vmul.f32 %v4940_v7, %v1894_v4  ;;  %v1907_v7 = vor.u32 1.1754944e-38, %v1906_v62  ;;  %v2451_v62 = vld [vmem:[%s4681_s29 + $0x78] sm:$0xff] }
 0x320   : > { %v5226_v10 = vpop.eup %4007  ;;  %v1898_v5 = vmul.f32 %v4006_v45, %v1897_v46  ;;  %2244 = vst [vmem:[%s5025_s27 + $0x48] sm:$0xff] %v2212_v36  ;;  %v2271_v56 = vpack.c.bf16 %v2212_v36, %v2211_v32  ;;  %v1920_v46 = vand.u32 2147483648, %v5221_v47 }
 0x321   : > { %1743 = vadd.xlane.f32.xlu1 %v5226_v10 }
 0x322   : > { %2375 = vmatmul.bf16.gmra.mxu1 %v2271_v56  ;;  %v1899_v53 = vadd.f32 %v4006_v45, %v1898_v5  ;;  %v1918_v5 = vand.u32 2147483647, %v5221_v47  ;;  %v1921_v24 = vor.u32 1.1754944e-38, %v1920_v46 }
 0x323   : > { %v4010_v38 = vpop.eup %4009 }
 0x324   : > { %v1910_v60 = vmul.f32 %v4010_v38, %v5221_v47  ;;  %v1903_v1 = vsel %vm1902_vm11, %v4006_v45, %v1899_v53  ;;  %vm1915_vm13 = vweird.f32 %v4010_v38  ;;  %vm1919_vm0 = vcmp.eq.f32.partialorder %v1918_v5, 8.507059e+37 }
 0x325   : > { %v1908_v50 = vsel %vm1905_vm12, %v1907_v7, %v1903_v1  ;;  %vm1916_vm15 = vmor %vm1914_vm14, %vm1915_vm13 }
 0x326   : > { %v1911_v32 = vsub.f32 1.0, %v1910_v60  ;;  %v2213_v4 = vmul.f32 %v4951_v16, %v1908_v50  ;;  %v2450_v60 = vld [vmem:[%s4681_s29 + $0x70] sm:$0xff]  ;;  %v5245_v50 = vpop.permute.xlu2 %2535 }
 0x327   : > { %v5243_v1 = vpop.permute.xlu0 %2530 }
 0x328   : > { %v1912_v36 = vmul.f32 %v4010_v38, %v1911_v32  ;;  %2245 = vst [vmem:[%s5025_s27 + $0x50] sm:$0xff] %v2213_v4 }
 0x329   : > { %2550 = vperm.xlu2 %3929, %v2452_v31  }
 0x32a   : > { %v1913_v45 = vadd.f32 %v4010_v38, %v1912_v36 }
 0x32c   : > { %v1917_v56 = vsel %vm1916_vm15, %v4010_v38, %v1913_v45 }
 0x32d   : > { %2545 = vperm.xlu0 %3930, %v2451_v62   ;;  %v1922_v16 = vsel %vm1919_vm0, %v1921_v24, %v1917_v56 }
 0x32e   : > { %v2214_v53 = vmul.f32 %v4965_v15, %v1922_v16 }
 0x330   : > { %2246 = vst [vmem:[%s5025_s27 + $0x58] sm:$0xff] %v2214_v53  ;;  %v2272_v7 = vpack.c.bf16 %v2214_v53, %v2213_v4 }
 0x332   : > { %2380 = vmatmul.bf16.gmra.mxu1 %v2272_v7 }
 0x334   : > { %v5253_v36 = vpop.permute.xlu1 %2525 }
 0x33a   : > { %2540 = vperm.xlu1 %3928, %v2450_v60  }
 0x352   : > { %v1586_v32 = vpop.xlane.xlu0 %1585 }
 0x353   : > { %v5248_v31 = vsub.f32 %v5034_v26, %v1586_v32 }
 0x355   : > { %6642 = vst [vmem:[#allocation47_spill] sm:$0xff] %v5248_v31  ;;  %v1681_v38 = vmul.f32 1.442695, %v5248_v31 }
 0x356   : > { %v5251_v46 = vpop.xlane.xlu2 %1715 }
 0x357   : > { %6643 = vst [vmem:[#allocation48_spill] sm:$0xff] %v5251_v46  ;;  %4011 = vpow2.f32 %v1681_v38  ;;  %v1934_v40 = vand.u32 2147483648, %v5251_v46  ;;  %vm1928_vm2 = vweird.f32 %v5251_v46 }
 0x358   : > { %4013 = vrcp.f32 %v5251_v46 }
 0x359   : > { %v1935_v8 = vor.u32 1.1754944e-38, %v1934_v40 }
 0x35a   : > { %v5256_v15 = vpop.xlane.xlu0 %1717 }
 0x35b   : > { %6644 = vst [vmem:[#allocation49_spill] sm:$0xff] %v5256_v15  ;;  %4015 = vrcp.f32 %v5256_v15  ;;  %vm1942_vm6 = vweird.f32 %v5256_v15 }
 0x35d   : > { %v5259_v4 = vpop.eup %4011 }
 0x35e   : > { %v4014_v5 = vpop.eup %4013  ;;  %v1590_v62 = vpop.xlane.xlu2 %1589  ;;  %1745 = vadd.xlane.f32.xlu2 %v5259_v4 }
 0x35f   : > { %v1924_v26 = vmul.f32 %v4014_v5, %v5251_v46  ;;  %v5264_v45 = vsub.f32 %v5072_v12, %v1590_v62  ;;  %v1588_v24 = vpop.xlane.xlu1 %1587  ;;  %vm1929_vm1 = vweird.f32 %v4014_v5 }
 0x360   : > { %v5267_v56 = vsub.f32 %v5075_v0, %v1588_v24  ;;  %v1932_v0 = vand.u32 2147483647, %v5251_v46  ;;  %v1948_v24 = vand.u32 2147483648, %v5256_v15  ;;  %vm1930_vm3 = vmor %vm1928_vm2, %vm1929_vm1 }
 0x361   : > { %6645 = vst [vmem:[#allocation50_spill] sm:$0xff] %v5264_v45  ;;  %v4016_v16 = vpop.eup %4015  ;;  %v1925_v53 = vsub.f32 1.0, %v1924_v26  ;;  %v1685_v7 = vmul.f32 1.442695, %v5264_v45 }
 0x362   : > { %6646 = vst [vmem:[#allocation51_spill] sm:$0xff] %v5267_v56  ;;  %v1938_v60 = vmul.f32 %v4016_v16, %v5256_v15  ;;  %v1683_v32 = vmul.f32 1.442695, %v5267_v56  ;;  %v5272_v38 = vpop.xlane.xlu0 %1591  ;;  %vm1943_vm4 = vweird.f32 %v4016_v16  ;;  %vm1933_vm5 = vcmp.eq.f32.partialorder %v1932_v0, 8.507059e+37 }
 0x363   : > { %v1926_v31 = vmul.f32 %v4014_v5, %v1925_v53  ;;  %4017 = vpow2.f32 %v1685_v7  ;;  %v1946_v7 = vand.u32 2147483647, %v5256_v15  ;;  %vm1944_vm7 = vmor %vm1942_vm6, %vm1943_vm4 }
 0x364   : > { %v1939_v12 = vsub.f32 1.0, %v1938_v60  ;;  %4019 = vpow2.f32 %v1683_v32 }
 0x365   : > { %v1927_v62 = vadd.f32 %v4014_v5, %v1926_v31  ;;  %vm1947_vm8 = vcmp.eq.f32.partialorder %v1946_v7, 8.507059e+37 }
 0x366   : > { %v1940_v26 = vmul.f32 %v4016_v16, %v1939_v12  ;;  %v5278_v45 = vpop.xlane.xlu2 %1721 }
 0x367   : > { %6647 = vst [vmem:[#allocation52_spill] sm:$0xff] %v5278_v45  ;;  %v5280_v56 = vpop.xlane.xlu1 %1719  ;;  %v1931_v53 = vsel %vm1930_vm3, %v4014_v5, %v1927_v62  ;;  %4021 = vrcp.f32 %v5278_v45  ;;  %v1949_v5 = vor.u32 1.1754944e-38, %v1948_v24  ;;  %vm1970_vm9 = vweird.f32 %v5278_v45 }
 0x368   : > { %6648 = vst [vmem:[#allocation53_spill] sm:$0xff] %v5280_v56  ;;  %4023 = vrcp.f32 %v5280_v56  ;;  %v1936_v31 = vsel %vm1933_vm5, %v1935_v8, %v1931_v53  ;;  %v1941_v32 = vadd.f32 %v4016_v16, %v1940_v26  ;;  %v1962_v53 = vand.u32 2147483648, %v5280_v56 }
 0x369   : > { %v5284_v60 = vpop.eup %4017  ;;  %v2215_v0 = vmul.f32 %v5042_v37, %v1936_v31  ;;  %v5311_v31 = vpop.f32.mrf.mxu1  ;;  %vm1956_vm10 = vweird.f32 %v5280_v56 }
 0x36a   : > { %v5288_v12 = vpop.eup %4019  ;;  %1749 = vadd.xlane.f32.xlu1 %v5284_v60  ;;  %v5291_v40 = vpop.xlane.xlu0 %1723  ;;  %v1945_v62 = vsel %vm1944_vm7, %v4016_v16, %v1941_v32  ;;  %v1976_v16 = vand.u32 2147483648, %v5278_v45 }
 0x36b   : > { %4025 = vrcp.f32 %v5291_v40  ;;  %1747 = vadd.xlane.f32.xlu0 %v5288_v12  ;;  %v1950_v15 = vsel %vm1947_vm8, %v1949_v5, %v1945_v62  ;;  %2247 = vst [vmem:[%s5025_s27 + $0x60] sm:$0xff] %v2215_v0  ;;  %v1960_v5 = vand.u32 2147483647, %v5280_v56  ;;  %v1974_v62 = vand.u32 2147483647, %v5278_v45 }
 0x36c   : > { %v2216_v8 = vmul.f32 %v5057_v6, %v1950_v15  ;;  %v1990_v54 = vand.u32 2147483648, %v5291_v40  ;;  %v1988_v20 = vand.u32 2147483647, %v5291_v40  ;;  %vm1984_vm12 = vweird.f32 %v5291_v40 }
 0x36d   : > { %v4022_v26 = vpop.eup %4021  ;;  %vm5327_vm14 = vcmp.eq.f32.partialorder %v1960_v5, 8.507059e+37  ;;  %vm5331_vm15 = vcmp.eq.f32.partialorder %v1974_v62, 8.507059e+37 }
 0x36e   : > { %v5299_v46 = vpop.xlane.xlu2 %1727  ;;  %v4024_v47 = vpop.eup %4023  ;;  %v1966_v24 = vmul.f32 %v4022_v26, %v5278_v45  ;;  %2248 = vst [vmem:[%s5025_s27 + $0x68] sm:$0xff] %v2216_v8  ;;  %v2273_v6 = vpack.c.bf16 %v2216_v8, %v2215_v0  ;;  %v1963_v0 = vor.u32 1.1754944e-38, %v1962_v53  ;;  %vm1971_vm11 = vweird.f32 %v4022_v26 }
 0x36f   : > { %6649 = vst [vmem:[#allocation54_spill] sm:$0xff] %v5299_v46  ;;  %4027 = vrcp.f32 %v5299_v46  ;;  %v5303_v37 = vpop.xlane.xlu1 %1593  ;;  %v1952_v7 = vmul.f32 %v4024_v47, %v5280_v56  ;;  %vm1957_vm13 = vweird.f32 %v4024_v47  ;;  %vm5343_vm0 = vmor %vm1970_vm9, %vm1971_vm11  ;;  %v1991_v62 = vor.u32 1.1754944e-38, %v1990_v54 }
 0x370   : > { %v1967_v32 = vsub.f32 1.0, %v1966_v24  ;;  %2385 = vmatmul.bf16.gmra.mxu1 %v2273_v6  ;;  %v2455_v24 = vld [vmem:[%s4681_s29 + $0x98] sm:$0xff]  ;;  %vm5353_vm1 = vcmp.eq.f32.partialorder %v1988_v20, 8.507059e+37  ;;  %vm1958_vm2 = vmor %vm1956_vm10, %vm1957_vm13  ;;  %v2016_v54 = vand.u32 2147483647, %v5299_v46  ;;  %vm2012_vm4 = vweird.f32 %v5299_v46 }
 0x371   : > { %v5309_v15 = vpop.eup %4025  ;;  %v1953_v42 = vsub.f32 1.0, %v1952_v7  ;;  %v1977_v7 = vor.u32 1.1754944e-38, %v1976_v16 }
 0x372   : > { %v1980_v35 = vmul.f32 %v5309_v15, %v5291_v40  ;;  %v5319_v25 = vpop.xlane.xlu0 %1729  ;;  %v1968_v8 = vmul.f32 %v4022_v26, %v1967_v32  ;;  %vm1985_vm3 = vweird.f32 %v5309_v15  ;;  %vm5392_vm8 = vcmp.eq.f32.partialorder %v2016_v54, 8.507059e+37 }
 0x373   : > { %6650 = vst [vmem:[#allocation55_spill] sm:$0xff] %v5319_v25  ;;  %4029 = vrcp.f32 %v5319_v25  ;;  %v1954_v44 = vmul.f32 %v4024_v47, %v1953_v42  ;;  %vm1986_vm5 = vmor %vm1984_vm12, %vm1985_vm3  ;;  %vm2026_vm7 = vweird.f32 %v5319_v25 }
 0x374   : > { %v1981_v43 = vsub.f32 1.0, %v1980_v35  ;;  %v1969_v53 = vadd.f32 %v4022_v26, %v1968_v8  ;;  %v2018_v8 = vand.u32 2147483648, %v5299_v46 }
 0x375   : > { %v5325_v52 = vpop.eup %4027  ;;  %v1955_v16 = vadd.f32 %v4024_v47, %v1954_v44 }
 0x376   : > { %v1982_v58 = vmul.f32 %v5309_v15, %v1981_v43  ;;  %v2008_v35 = vmul.f32 %v5325_v52, %v5299_v46  ;;  %v5338_v42 = vpop.xlane.xlu2 %1733  ;;  %2565 = vperm.xlu2 %3929, %v2455_v24   ;;  %v1973_v3 = vsel %vm5343_vm0, %v4022_v26, %v1969_v53  ;;  %v2032_v26 = vand.u32 2147483648, %v5319_v25 }
 0x377   : > { %6655 = vst [vmem:[#allocation56_spill] sm:$0xff] %v5338_v42  ;;  %4031 = vrcp.f32 %v5338_v42  ;;  %v5349_v43 = vpop.xlane.xlu1 %1725  ;;  %v1959_v20 = vsel %vm1958_vm2, %v4024_v47, %v1955_v16  ;;  %v1978_v53 = vsel %vm5331_vm15, %v1977_v7, %v1973_v3  ;;  %v5377_v16 = vpop.f32.mrf.mxu1  ;;  %vm2013_vm6 = vweird.f32 %v5325_v52 }
 0x378   : > { %v2009_v44 = vsub.f32 1.0, %v2008_v35  ;;  %4033 = vrcp.f32 %v5349_v43  ;;  %v1983_v35 = vadd.f32 %v5309_v15, %v1982_v58  ;;  %v1964_v21 = vsel %vm5327_vm14, %v1963_v0, %v1959_v20  ;;  %v2458_v58 = vld [vmem:[%s4681_s29 + $0xb0] sm:$0xff]  ;;  %vm5415_vm9 = vmor %vm2012_vm4, %vm2013_vm6 }
 0x379   : > { %v5363_v45 = vpop.eup %4029  ;;  %v2218_v47 = vmul.f32 %v5102_v34, %v1978_v53  ;;  %v2217_v3 = vmul.f32 %v5100_v57, %v1964_v21  ;;  %v2454_v34 = vld [vmem:[%s4681_s29 + $0x90] sm:$0xff]  ;;  %v2060_v24 = vand.u32 2147483648, %v5338_v42  ;;  %vm1998_vm11 = vweird.f32 %v5349_v43 }
 0x37a   : > { %v2010_v5 = vmul.f32 %v5325_v52, %v2009_v44  ;;  %v2022_v56 = vmul.f32 %v5363_v45, %v5319_v25  ;;  %v5372_v9 = vpop.xlane.xlu0 %1735  ;;  %v1987_v7 = vsel %vm1986_vm5, %v5309_v15, %v1983_v35  ;;  %v2019_v44 = vor.u32 1.1754944e-38, %v2018_v8 }
 0x37b   : > { %6660 = vst [vmem:[#allocation57_spill] sm:$0xff] %v5372_v9  ;;  %4035 = vrcp.f32 %v5372_v9  ;;  %v1992_v21 = vsel %vm5353_vm1, %v1991_v62, %v1987_v7  ;;  %v2033_v8 = vor.u32 1.1754944e-38, %v2032_v26  ;;  %vm2027_vm10 = vweird.f32 %v5363_v45 }
 0x37c   : > { %v2023_v0 = vsub.f32 1.0, %v2022_v56  ;;  %2250 = vst [vmem:[%s5025_s27 + $0x78] sm:$0xff] %v2218_v47  ;;  %v2011_v57 = vadd.f32 %v5325_v52, %v2010_v5  ;;  %v2030_v56 = vand.u32 2147483647, %v5319_v25  ;;  %v5409_v54 = vmul.f32 %v5118_v30, %v1992_v21  ;;  %vm2028_vm13 = vmor %vm2026_vm7, %vm2027_vm10 }
 0x37d   : > { %v5396_v32 = vpop.eup %4031  ;;  %2249 = vst [vmem:[%s5025_s27 + $0x70] sm:$0xff] %v2217_v3  ;;  %v2274_v26 = vpack.c.bf16 %v2218_v47, %v2217_v3  ;;  %vm2054_vm0 = vweird.f32 %v5338_v42  ;;  %vm2068_vm1 = vweird.f32 %v5372_v9 }
 0x37e   : > { %v5403_v20 = vpop.eup %4033  ;;  %v2024_v53 = vmul.f32 %v5363_v45, %v2023_v0  ;;  %v2050_v15 = vmul.f32 %v5396_v32, %v5338_v42  ;;  %2580 = vperm.xlu2 %3929, %v2458_v58   ;;  %v2015_v30 = vsel %vm5415_vm9, %v5325_v52, %v2011_v57  ;;  %v2453_v0 = vld [vmem:[%s4681_s29 + $0x88] sm:$0xff]  ;;  %2251 = vst [vmem:[%s5025_s27 + $0x80] sm:$0xff] %v5409_v54  ;;  %vm2031_vm14 = vcmp.eq.f32.partialorder %v2030_v56, 8.507059e+37 }
 0x37f   : > { %v1994_v35 = vmul.f32 %v5403_v20, %v5349_v43  ;;  %v5422_v5 = vpop.xlane.xlu1 %1731  ;;  %2560 = vperm.xlu0 %3930, %v2454_v34   ;;  %v2004_v34 = vand.u32 2147483648, %v5349_v43  ;;  %v2020_v52 = vsel %vm5392_vm8, %v2019_v44, %v2015_v30  ;;  %vm1999_vm12 = vweird.f32 %v5403_v20  ;;  %v2461_v44 = vld [vmem:[%s4681_s29 + $0xc8] sm:$0xff] }
 0x380   : > { %v2051_v58 = vsub.f32 1.0, %v2050_v15  ;;  %4037 = vrcp.f32 %v5422_v5  ;;  %v2025_v57 = vadd.f32 %v5363_v45, %v2024_v53  ;;  %2390 = vmatmul.bf16.gmra.mxu1 %v2274_v26  ;;  %v5448_v3 = vmul.f32 %v5131_v55, %v2020_v52  ;;  %v2457_v30 = vld [vmem:[%s4681_s29 + $0xa8] sm:$0xff]  ;;  %v5461_v52 = vpop.f32.mrf.mxu1  ;;  %vm5471_vm2 = vmor %vm1998_vm11, %vm1999_vm12 }
 0x381   : > { %v5433_v7 = vpop.eup %4035  ;;  %v1995_v21 = vsub.f32 1.0, %v1994_v35  ;;  %vm2055_vm15 = vweird.f32 %v5396_v32  ;;  %v2044_v56 = vand.u32 2147483647, %v5422_v5  ;;  %vm2040_vm9 = vweird.f32 %v5422_v5 }
 0x382   : > { %v2052_v15 = vmul.f32 %v5396_v32, %v2051_v58  ;;  %v2064_v47 = vmul.f32 %v5433_v7, %v5372_v9  ;;  %v2029_v53 = vsel %vm2028_vm13, %v5363_v45, %v2025_v57  ;;  %v2002_v58 = vand.u32 2147483647, %v5349_v43  ;;  %2253 = vst [vmem:[%s5025_s27 + $0x90] sm:$0xff] %v5448_v3  ;;  %vm5484_vm3 = vmor %vm2054_vm0, %vm2055_vm15 }
 0x383   : > { %v1996_v6 = vmul.f32 %v5403_v20, %v1995_v21  ;;  %2555 = vperm.xlu1 %3928, %v2453_v0   ;;  %v2034_v26 = vsel %vm2031_vm14, %v2033_v8, %v2029_v53  ;;  %v2074_v21 = vand.u32 2147483648, %v5372_v9  ;;  %vm2069_vm6 = vweird.f32 %v5433_v7 }
 0x384   : > { %v2065_v62 = vsub.f32 1.0, %v2064_v47  ;;  %v5454_v35 = vpop.xlane.xlu2 %1739  ;;  %v2053_v55 = vadd.f32 %v5396_v32, %v2052_v15  ;;  %v5480_v57 = vmul.f32 %v5146_v41, %v2034_v26  ;;  %v2058_v47 = vand.u32 2147483647, %v5338_v42  ;;  %v2456_v42 = vld [vmem:[%s4681_s29 + $0xa0] sm:$0xff]  ;;  %vm5518_vm8 = vmor %vm2068_vm1, %vm2069_vm6 }
 0x385   : > { %6665 = vst [vmem:[#allocation58_spill] sm:$0xff] %v5454_v35  ;;  %4039 = vrcp.f32 %v5454_v35  ;;  %v1997_v45 = vadd.f32 %v5403_v20, %v1996_v6  ;;  %v2005_v41 = vor.u32 1.1754944e-38, %v2004_v34  ;;  %v2046_v26 = vand.u32 2147483648, %v5422_v5 }
 0x386   : > { %v5475_v8 = vpop.eup %4037  ;;  %v2066_v0 = vmul.f32 %v5433_v7, %v2065_v62  ;;  %2595 = vperm.xlu2 %3929, %v2461_v44   ;;  %v2057_v62 = vsel %vm5484_vm3, %v5396_v32, %v2053_v55  ;;  %vm2003_vm4 = vcmp.eq.f32.partialorder %v2002_v58, 8.507059e+37  ;;  %2254 = vst [vmem:[%s5025_s27 + $0x98] sm:$0xff] %v5480_v57  ;;  %vm2059_vm5 = vcmp.eq.f32.partialorder %v2058_v47, 8.507059e+37 }
 0x387   : > { %v2036_v6 = vmul.f32 %v5475_v8, %v5422_v5  ;;  %2575 = vperm.xlu0 %3930, %v2457_v30   ;;  %v5491_v53 = vpop.xlane.xlu1 %1737  ;;  %v2001_v44 = vsel %vm5471_vm2, %v5403_v20, %v1997_v45  ;;  %v2061_v30 = vor.u32 1.1754944e-38, %v2060_v24  ;;  %v2464_v24 = vld [vmem:[%s4681_s29 + $0xe0] sm:$0xff]  ;;  %vm2041_vm7 = vweird.f32 %v5475_v8 }
 0x388   : > { %6670 = vst [vmem:[#allocation59_spill] sm:$0xff] %v5491_v53  ;;  %4041 = vrcp.f32 %v5491_v53  ;;  %v2006_v46 = vsel %vm2003_vm4, %v2005_v41, %v2001_v44  ;;  %v2067_v34 = vadd.f32 %v5433_v7, %v2066_v0  ;;  %v2075_v47 = vor.u32 1.1754944e-38, %v2074_v21  ;;  %vm2042_vm10 = vmor %vm2040_vm9, %vm2041_vm7 }
 0x389   : > { %v2037_v25 = vsub.f32 1.0, %v2036_v6  ;;  %v2220_v20 = vmul.f32 %v5155_v17, %v2006_v46  ;;  %v2062_v32 = vsel %vm2059_vm5, %v2061_v30, %v2057_v62  ;;  %v2072_v46 = vand.u32 2147483647, %v5372_v9 }
 0x38a   : > { %v5514_v45 = vmul.f32 %v5157_v59, %v2062_v32  ;;  %v2071_v59 = vsel %vm5518_vm8, %v5433_v7, %v2067_v34  ;;  %vm2045_vm11 = vcmp.eq.f32.partialorder %v2044_v56, 8.507059e+37  ;;  %v2047_v41 = vor.u32 1.1754944e-38, %v2046_v26  ;;  %v5539_v7 = vpop.f32.mrf.mxu1 }
 0x38b   : > { %v5508_v55 = vpop.eup %4039  ;;  %v2038_v58 = vmul.f32 %v5475_v8, %v2037_v25  ;;  %2570 = vperm.xlu1 %3928, %v2456_v42   ;;  %v2460_v25 = vld [vmem:[%s4681_s29 + $0xc0] sm:$0xff]  ;;  %2252 = vst [vmem:[%s5025_s27 + $0x88] sm:$0xff] %v2220_v20  ;;  %vm2073_vm12 = vcmp.eq.f32.partialorder %v2072_v46, 8.507059e+37  ;;  %v2102_v62 = vand.u32 2147483648, %v5454_v35  ;;  %vm2096_vm13 = vweird.f32 %v5454_v35 }
 0x38c   : > { %v2092_v0 = vmul.f32 %v5508_v55, %v5454_v35  ;;  %v5525_v15 = vpop.xlane.xlu0 %1741  ;;  %2256 = vst [vmem:[%s5025_s27 + $0xa8] sm:$0xff] %v5514_v45  ;;  %v2076_v32 = vsel %vm2073_vm12, %v2075_v47, %v2071_v59  ;;  %vm2097_vm14 = vweird.f32 %v5508_v55  ;;  %v2463_v47 = vld [vmem:[%s4681_s29 + $0xd8] sm:$0xff]  ;;  %vm2082_vm1 = vweird.f32 %v5491_v53 }
 0x38d   : > { %6673 = vst [vmem:[#allocation60_spill] sm:$0xff] %v5525_v15  ;;  %4043 = vrcp.f32 %v5525_v15  ;;  %v2039_v42 = vadd.f32 %v5475_v8, %v2038_v58  ;;  %v2275_v58 = vpack.c.bf16 %v2220_v20, %v5409_v54  ;;  %v5548_v56 = vmul.f32 %v5169_v49, %v2076_v32  ;;  %vm2098_vm0 = vmor %vm2096_vm13, %vm2097_vm14 }
 0x38e   : > { %v4042_v6 = vpop.eup %4041  ;;  %v2093_v44 = vsub.f32 1.0, %v2092_v0  ;;  %2610 = vperm.xlu2 %3929, %v2464_v24   ;;  %v2459_v24 = vld [vmem:[%s4681_s29 + $0xb8] sm:$0xff]  ;;  %v2100_v20 = vand.u32 2147483647, %v5454_v35  ;;  %vm2110_vm6 = vweird.f32 %v5525_v15  ;;  %vm2630_vm13 = vcmp.le.f32.partialorder %v5461_v52, %v4800_v28  ;;  %v5634_v28 = vpop.permute.xlu2 %2550 }
 0x38f   : > { %v2078_v30 = vmul.f32 %v4042_v6, %v5491_v53  ;;  %2590 = vperm.xlu0 %3930, %v2460_v25   ;;  %v2043_v21 = vsel %vm2042_vm10, %v5475_v8, %v2039_v42  ;;  %v2088_v8 = vand.u32 2147483648, %v5491_v53  ;;  %2257 = vst [vmem:[%s5025_s27 + $0xb0] sm:$0xff] %v5548_v56  ;;  %v2467_v25 = vld [vmem:[%s4681_s29 + $0xf8] sm:$0xff]  ;;  %vm2083_vm15 = vweird.f32 %v4042_v6 }
 0x390   : > { %v2094_v34 = vmul.f32 %v5508_v55, %v2093_v44  ;;  %v2048_v26 = vsel %vm2045_vm11, %v2047_v41, %v2043_v21  ;;  %2395 = vmatmul.bf16.gmra.mxu1 %v2275_v58  ;;  %v2103_v41 = vor.u32 1.1754944e-38, %v2102_v62  ;;  %vm2101_vm2 = vcmp.eq.f32.partialorder %v2100_v20, 8.507059e+37  ;;  %vm2084_vm3 = vmor %vm2082_vm1, %vm2083_vm15 }
 0x391   : > { %v2079_v17 = vsub.f32 1.0, %v2078_v30  ;;  %v5552_v46 = vmul.f32 %v5181_v2, %v2048_v26  ;;  %v2086_v2 = vand.u32 2147483647, %v5491_v53  ;;  %v2089_v32 = vor.u32 1.1754944e-38, %v2088_v8  ;;  %v2462_v26 = vld [vmem:[%s4681_s29 + $0xd0] sm:$0xff] }
 0x392   : > { %v2095_v54 = vadd.f32 %v5508_v55, %v2094_v34  ;;  %v2116_v58 = vand.u32 2147483648, %v5525_v15  ;;  %v5579_v20 = vpop.f32.mrf.mxu1 }
 0x393   : > { %v4044_v49 = vpop.eup %4043  ;;  %v2080_v0 = vmul.f32 %v4042_v6, %v2079_v17  ;;  %2585 = vperm.xlu1 %3928, %v2459_v24   ;;  %2255 = vst [vmem:[%s5025_s27 + $0xa0] sm:$0xff] %v5552_v46  ;;  %vm2087_vm4 = vcmp.eq.f32.partialorder %v2086_v2, 8.507059e+37  ;;  %v2466_v2 = vld [vmem:[%s4681_s29 + $0xf0] sm:$0xff]  ;;  %vm2632_vm1 = vcmp.le.f32.partialorder %v5579_v20, %v4808_v51 }
 0x394   : > { %v2106_v59 = vmul.f32 %v4044_v49, %v5525_v15  ;;  %v5567_v42 = vpop.xlane.xlu1 %1743  ;;  %v2099_v44 = vsel %vm2098_vm0, %v5508_v55, %v2095_v54  ;;  %vm2111_vm5 = vweird.f32 %v4044_v49  ;;  %v2114_v54 = vand.u32 2147483647, %v5525_v15  ;;  %v6718_v15 = vld [vmem:[#allocation29_spill] sm:$0xff] }
 0x395   : > { %6674 = vst [vmem:[#allocation61_spill] sm:$0xff] %v5567_v42  ;;  %4045 = vrcp.f32 %v5567_v42  ;;  %v2081_v30 = vadd.f32 %v4042_v6, %v2080_v0  ;;  %v2104_v34 = vsel %vm2101_vm2, %v2103_v41, %v2099_v44  ;;  %vm2112_vm7 = vmor %vm2110_vm6, %vm2111_vm5  ;;  %v2130_v41 = vand.u32 2147483648, %v5567_v42 }
 0x396   : > { %v2107_v21 = vsub.f32 1.0, %v2106_v59  ;;  %2625 = vperm.xlu2 %3929, %v2467_v25   ;;  %v5575_v55 = vmul.f32 %v5195_v18, %v2104_v34  ;;  %v2117_v18 = vor.u32 1.1754944e-38, %v2116_v58  ;;  %vm2115_vm8 = vcmp.eq.f32.partialorder %v2114_v54, 8.507059e+37 }
 0x397   : > { %2605 = vperm.xlu0 %3930, %v2463_v47   ;;  %v2085_v24 = vsel %vm2084_vm3, %v4042_v6, %v2081_v30  ;;  %vm2124_vm10 = vweird.f32 %v5567_v42  ;;  %v2131_v58 = vor.u32 1.1754944e-38, %v2130_v41  ;;  %vm2628_vm0 = vcmp.le.f32.partialorder %v5311_v31, %v4794_v22 }
 0x398   : > { %v2108_v62 = vmul.f32 %v4044_v49, %v2107_v21  ;;  %v2090_v17 = vsel %vm2087_vm4, %v2089_v32, %v2085_v24  ;;  %2259 = vst [vmem:[%s5025_s27 + $0xc0] sm:$0xff] %v5575_v55  ;;  %v2276_v21 = vpack.c.bf16 %v5480_v57, %v5448_v3  ;;  %v2465_v32 = vld [vmem:[%s4681_s29 + $0xe8] sm:$0xff]  ;;  %vm2629_vm3 = vcmp.le.f32.partialorder %v5377_v16, %v4803_v39  ;;  %s3703_s29 = sshll.u32 %s4301_s17, 8 }
 0x399   : > { %v2226_v8 = vmul.f32 %v5200_v33, %v2090_v17  ;;  %v2277_v17 = vpack.c.bf16 %v5514_v45, %v5552_v46  ;;  %vm2631_vm6 = vcmp.le.f32.partialorder %v5539_v7, %v4814_v48  ;;  %s3309_s21 = scalar_lea.hbm %s6521_s10, %s3703_s29 }
 0x39a   : > { %v2109_v6 = vadd.f32 %v4044_v49, %v2108_v62  ;;  %s3312_s28 = sshll.u32 %s3309_s21, 4  ;;  %s3313_s28 = int_to_ptr.hbm [resolvable:$true] %s3312_s28 }
 0x39b   : > { %v4046_v0 = vpop.eup %4045  ;;  %2600 = vperm.xlu1 %3928, %v2462_v26   ;;  %2258 = vst [vmem:[%s5025_s27 + $0xb8] sm:$0xff] %v2226_v8  ;;  %v5606_v26 = vsub.f32 %v5088_v27, %v5272_v38  ;;  %v2278_v27 = vpack.c.bf16 %v2226_v8, %v5548_v56  ;;  %s4139_s11 = sshra.s32 %s3313_s28, 4  ;;  %s4140_s11 = int_to_ptr.hbm [resolvable:$true] %s4139_s11 }
 0x39c   : > { %v2120_v25 = vmul.f32 %v4046_v0, %v5567_v42  ;;  %v2113_v59 = vsel %vm2112_vm7, %v4044_v49, %v2109_v6  ;;  %vm2125_vm9 = vweird.f32 %v4046_v0  ;;  %v2128_v49 = vand.u32 2147483647, %v5567_v42  ;;  %s4141_s18 = scalar_lea.hbm %s4140_s11, 256  ;;  %p4146_p0 = scmp.lt.s32.totalorder %s4140_s11, %s6521_s10 }
 0x39d   : > { %v2118_v47 = vsel %vm2115_vm8, %v2117_v18, %v2113_v59  ;;  %vm2126_vm11 = vmor %vm2124_vm10, %vm2125_vm9  ;;  %v1687_v54 = vmul.f32 1.442695, %v5606_v26  ;;  %p4142_p11 = scmp.ne.s32.totalorder %s4140_s11, %s4141_s18  ;;  %p4147_p1 = scmp.lt.s32.totalorder %s4145_s25, %s4141_s18 }
 0x39e   : > { %v2121_v44 = vsub.f32 1.0, %v2120_v25  ;;  %v5589_v33 = vmul.f32 %v5213_v29, %v2118_v47  ;;  %v2368_v29 = vpop.f32.mrf.mxu1  ;;  %vm2129_vm12 = vcmp.eq.f32.partialorder %v2128_v49, 8.507059e+37 }
 0x39f   : > { %2620 = vperm.xlu0 %3930, %v2466_v2   ;;  %4047 = vpow2.f32 %v1687_v54  ;;  %vm2633_vm9 = vcmp.le.f32.partialorder %v2368_v29, %v4829_v11  ;;  %v5667_v56 = vpop.permute.xlu0 %2545  ;;  %p4143_p12 = pnand %p4142_p11, %p4318_p5  ;;  %p4148_p2 = por %p4147_p1, %p4146_p0 }
 0x3a0   : > { %v2122_v30 = vmul.f32 %v4046_v0, %v2121_v44  ;;  %2260 = vst [vmem:[%s5025_s27 + $0xc8] sm:$0xff] %v5589_v33  ;;  %2400 = vmatmul.bf16.gmra.mxu1 %v2276_v21  ;;  %v2279_v39 = vpack.c.bf16 %v5589_v33, %v5575_v55 }
 0x3a1   : > { %p4144_p13 = pneg %p4143_p12 }
 0x3a2   : > { %v2123_v34 = vadd.f32 %v4046_v0, %v2122_v30 }
 0x3a3   : > { %2615 = vperm.xlu1 %3928, %v2465_v32   ;;  %p4149_p3 = pnand %p4148_p2, %p4144_p13 }
 0x3a4   : > { %v2127_v24 = vsel %vm2126_vm11, %v4046_v0, %v2123_v34  ;;  %v5613_v0 = vsub.f32 %v5134_v14, %v5303_v37  ;;  %v6576_v14 = vmov 0.0  }
 0x3a5   : > { %v2132_v62 = vsel %vm2129_vm12, %v2131_v58, %v2127_v24  ;;  %v5615_v18 = vpop.eup %4047 }
 0x3a6   : > { %v5600_v3 = vmul.f32 %v5226_v10, %v2132_v62  ;;  %v2371_v57 = vpop.f32.mrf.mxu1  ;;  %v1528_v10 = vlaneseq  ;;  %v1689_v25 = vmul.f32 1.442695, %v5613_v0 }
 0x3a7   : > { %vm2634_vm12 = vcmp.le.f32.partialorder %v2371_v57, %v4820_v23 }
 0x3a8   : > { %2261 = vst [vmem:[%s5025_s27 + $0xd0] sm:$0xff] %v5600_v3  ;;  %v5618_v2 = vand.u32 127, %v1528_v10  ;;  %4049 = vpow2.f32 %v1689_v25 }
 0x3aa   : > { %vm1530_vm14 = vcmp.lt.s32.totalorder %v5618_v2, 18 }
 0x3ab   : > { %vm2662_vm15 = vmand %vm2630_vm13, %vm1530_vm14 }
 0x3ac   : > { %v2694_v37 = vsel %vm2662_vm15, 1.0, %v6576_v14  ;;  %vm2660_vm2 = vmand %vm2628_vm0, %vm1530_vm14 }
 0x3ad   : > { %vm2664_vm4 = vmand %vm2632_vm1, %vm1530_vm14  ;;  %v2692_v31 = vsel %vm2660_vm2, 1.0, %v6576_v14 }
 0x3ae   : > { %v2373_v6 = vpop.f32.mrf.mxu1  ;;  %v5630_v45 = vpop.eup %4049  ;;  %vm2661_vm5 = vmand %vm2629_vm3, %vm1530_vm14  ;;  %v2696_v51 = vsel %vm2664_vm4, 1.0, %v6576_v14 }
 0x3af   : > { %vm2635_vm7 = vcmp.le.f32.partialorder %v2373_v6, %v4845_v19  ;;  %v2693_v16 = vsel %vm2661_vm5, 1.0, %v6576_v14  ;;  %vm2663_vm8 = vmand %vm2631_vm6, %vm1530_vm14  ;;  %v5662_v19 = vpop.permute.xlu1 %2540 }
 0x3b0   : > { %2405 = vmatmul.bf16.gmra.mxu1 %v2277_v17  ;;  %vm2667_vm10 = vmand %vm2635_vm7, %vm1530_vm14  ;;  %v2695_v48 = vsel %vm2663_vm8, 1.0, %v6576_v14 }
 0x3b1   : > { %vm2665_vm11 = vmand %vm2633_vm9, %vm1530_vm14  ;;  %v2699_v11 = vsel %vm2667_vm10, 1.0, %v6576_v14 }
 0x3b2   : > { %v2697_v55 = vsel %vm2665_vm11, 1.0, %v6576_v14  ;;  %vm2666_vm15 = vmand %vm2634_vm12, %vm1530_vm14 }
 0x3b3   : > { %v2698_v59 = vsel %vm2666_vm15, 1.0, %v6576_v14 }
 0x3b6   : > { %v2376_v38 = vpop.f32.mrf.mxu1 }
 0x3b7   : > { %vm2636_vm0 = vcmp.le.f32.partialorder %v2376_v38, %v4832_v61 }
 0x3b8   : > { %vm2668_vm2 = vmand %vm2636_vm0, %vm1530_vm14 }
 0x3b9   : > { %v2700_v21 = vsel %vm2668_vm2, 1.0, %v6576_v14 }
 0x3be   : > { %v2378_v22 = vpop.f32.mrf.mxu1 }
 0x3bf   : > { %1751 = vadd.xlane.f32.xlu2 %v5615_v18  ;;  %vm2637_vm4 = vcmp.le.f32.partialorder %v2378_v22, %v4812_v63 }
 0x3c0   : > { %2410 = vmatmul.bf16.gmra.mxu1 %v2278_v27  ;;  %vm2669_vm7 = vmand %vm2637_vm4, %vm1530_vm14 }
 0x3c1   : > { %v2701_v58 = vsel %vm2669_vm7, 1.0, %v6576_v14 }
 0x3c6   : > { %v2381_v7 = vpop.f32.mrf.mxu1 }
 0x3c7   : > { %2728 = vadd.xlane.f32.xlu2 %v2694_v37  ;;  %vm2638_vm13 = vcmp.le.f32.partialorder %v2381_v7, %v4858_v13 }
 0x3c8   : > { %vm2670_vm1 = vmand %vm2638_vm13, %vm1530_vm14 }
 0x3c9   : > { %1753 = vadd.xlane.f32.xlu0 %v5630_v45  ;;  %v2702_v33 = vsel %vm2670_vm1, 1.0, %v6576_v14 }
 0x3cd   : > { %2724 = vadd.xlane.f32.xlu1 %v2692_v31 }
 0x3ce   : > { %v2383_v41 = vpop.f32.mrf.mxu1 }
 0x3cf   : > { %2732 = vadd.xlane.f32.xlu2 %v2696_v51  ;;  %vm2639_vm9 = vcmp.le.f32.partialorder %v2383_v41, %v5253_v36 }
 0x3d0   : > { %2415 = vmatmul.bf16.gmra.mxu1 %v2279_v39  ;;  %vm2671_vm10 = vmand %vm2639_vm9, %vm1530_vm14 }
 0x3d1   : > { %2726 = vadd.xlane.f32.xlu0 %v2693_v16  ;;  %v5653_v52 = vpop.xlane.xlu2 %1745  ;;  %v2703_v6 = vsel %vm2671_vm10, 1.0, %v6576_v14 }
 0x3d2   : > { %6675 = vst [vmem:[#allocation62_spill] sm:$0xff] %v5653_v52  ;;  %4051 = vrcp.f32 %v5653_v52  ;;  %v2144_v23 = vand.u32 2147483648, %v5653_v52  ;;  %v2142_v44 = vand.u32 2147483647, %v5653_v52  ;;  %vm2138_vm5 = vweird.f32 %v5653_v52 }
 0x3d4   : > { %v2145_v32 = vor.u32 1.1754944e-38, %v2144_v23  ;;  %vm2143_vm8 = vcmp.eq.f32.partialorder %v2142_v44, 8.507059e+37 }
 0x3d5   : > { %2730 = vadd.xlane.f32.xlu1 %v2695_v48 }
 0x3d7   : > { %2738 = vadd.xlane.f32.xlu2 %v2699_v11 }
 0x3d8   : > { %v4052_v46 = vpop.eup %4051 }
 0x3d9   : > { %v2134_v20 = vmul.f32 %v4052_v46, %v5653_v52  ;;  %2734 = vadd.xlane.f32.xlu0 %v2697_v55  ;;  %vm2139_vm3 = vweird.f32 %v4052_v46 }
 0x3da   : > { %vm2140_vm6 = vmor %vm2138_vm5, %vm2139_vm3 }
 0x3db   : > { %v2135_v8 = vsub.f32 1.0, %v2134_v20 }
 0x3dd   : > { %v2136_v47 = vmul.f32 %v4052_v46, %v2135_v8  ;;  %v5680_v13 = vpop.xlane.xlu1 %1749  ;;  %2736 = vadd.xlane.f32.xlu1 %v2698_v59 }
 0x3de   : > { %6676 = vst [vmem:[#allocation63_spill] sm:$0xff] %v5680_v13  ;;  %4053 = vrcp.f32 %v5680_v13  ;;  %v5687_v61 = vpop.xlane.xlu0 %1747  ;;  %v2172_v36 = vand.u32 2147483648, %v5680_v13  ;;  %v2170_v27 = vand.u32 2147483647, %v5680_v13  ;;  %vm2166_vm13 = vweird.f32 %v5680_v13 }
 0x3df   : > { %6677 = vst [vmem:[#allocation64_spill] sm:$0xff] %v5687_v61  ;;  %4055 = vrcp.f32 %v5687_v61  ;;  %2744 = vadd.xlane.f32.xlu2 %v2702_v33  ;;  %v2137_v30 = vadd.f32 %v4052_v46, %v2136_v47  ;;  %v2158_v25 = vand.u32 2147483648, %v5687_v61  ;;  %v2156_v38 = vand.u32 2147483647, %v5687_v61 }
 0x3e0   : > { %vm2152_vm15 = vweird.f32 %v5687_v61  ;;  %v2173_v31 = vor.u32 1.1754944e-38, %v2172_v36  ;;  %vm2171_vm2 = vcmp.eq.f32.partialorder %v2170_v27, 8.507059e+37 }
 0x3e1   : > { %2740 = vadd.xlane.f32.xlu0 %v2700_v21  ;;  %v2141_v63 = vsel %vm2140_vm6, %v4052_v46, %v2137_v30  ;;  %v2159_v51 = vor.u32 1.1754944e-38, %v2158_v25  ;;  %vm2157_vm3 = vcmp.eq.f32.partialorder %v2156_v38, 8.507059e+37 }
 0x3e2   : > { %v2146_v49 = vsel %vm2143_vm8, %v2145_v32, %v2141_v63 }
 0x3e3   : > { %v2230_v34 = vmul.f32 %v5259_v4, %v2146_v49 }
 0x3e4   : > { %v4054_v29 = vpop.eup %4053 }
 0x3e5   : > { %v4056_v24 = vpop.eup %4055  ;;  %v2162_v62 = vmul.f32 %v4054_v29, %v5680_v13  ;;  %2742 = vadd.xlane.f32.xlu1 %v2701_v58  ;;  %2262 = vst [vmem:[%s5025_s27 + $0xd8] sm:$0xff] %v2230_v34  ;;  %v2280_v57 = vpack.c.bf16 %v2230_v34, %v5600_v3  ;;  %vm2167_vm11 = vweird.f32 %v4054_v29 }
 0x3e6   : > { %v2148_v17 = vmul.f32 %v4056_v24, %v5687_v61  ;;  %vm2153_vm12 = vweird.f32 %v4056_v24  ;;  %vm2168_vm0 = vmor %vm2166_vm13, %vm2167_vm11 }
 0x3e7   : > { %v2163_v54 = vsub.f32 1.0, %v2162_v62  ;;  %2420 = vmatmul.bf16.gmra.mxu1 %v2280_v57  ;;  %vm2154_vm1 = vmor %vm2152_vm15, %vm2153_vm12 }
 0x3e8   : > { %v2149_v4 = vsub.f32 1.0, %v2148_v17 }
 0x3e9   : > { %v2164_v10 = vmul.f32 %v4054_v29, %v2163_v54  ;;  %2746 = vadd.xlane.f32.xlu0 %v2703_v6 }
 0x3ea   : > { %v2150_v3 = vmul.f32 %v4056_v24, %v2149_v4 }
 0x3eb   : > { %v2165_v37 = vadd.f32 %v4054_v29, %v2164_v10 }
 0x3ec   : > { %v2151_v22 = vadd.f32 %v4056_v24, %v2150_v3 }
 0x3ed   : > { %v2169_v39 = vsel %vm2168_vm0, %v4054_v29, %v2165_v37  ;;  %v2386_v7 = vpop.f32.mrf.mxu1 }
 0x3ee   : > { %v2155_v16 = vsel %vm2154_vm1, %v4056_v24, %v2151_v22  ;;  %v2174_v48 = vsel %vm2171_vm2, %v2173_v31, %v2169_v39  ;;  %vm2640_vm4 = vcmp.le.f32.partialorder %v2386_v7, %v5243_v1 }
 0x3ef   : > { %v2160_v11 = vsel %vm2157_vm3, %v2159_v51, %v2155_v16  ;;  %v2232_v46 = vmul.f32 %v5284_v60, %v2174_v48  ;;  %vm2672_vm5 = vmand %vm2640_vm4, %vm1530_vm14 }
 0x3f0   : > { %v2231_v55 = vmul.f32 %v5288_v12, %v2160_v11  ;;  %v2704_v20 = vsel %vm2672_vm5, 1.0, %v6576_v14  ;;  %v5726_v12 = vpop.permute.xlu2 %2565 }
 0x3f1   : > { %2264 = vst [vmem:[%s5025_s27 + $0xe8] sm:$0xff] %v2232_v46  ;;  %2748 = vadd.xlane.f32.xlu1 %v2704_v20 }
 0x3f2   : > { %2263 = vst [vmem:[%s5025_s27 + $0xe0] sm:$0xff] %v2231_v55  ;;  %v2281_v8 = vpack.c.bf16 %v2232_v46, %v2231_v55 }
 0x3f5   : > { %v2388_v23 = vpop.f32.mrf.mxu1  ;;  %v5737_v41 = vpop.permute.xlu1 %2555 }
 0x3f6   : > { %vm2641_vm6 = vcmp.le.f32.partialorder %v2388_v23, %v5245_v50 }
 0x3f7   : > { %2425 = vmatmul.bf16.gmra.mxu1 %v2281_v8  ;;  %vm2673_vm7 = vmand %vm2641_vm6, %vm1530_vm14 }
 0x3f8   : > { %v2705_v1 = vsel %vm2673_vm7, 1.0, %v6576_v14  ;;  %v5733_v44 = vpop.permute.xlu2 %2580 }
 0x3f9   : > { %2750 = vadd.xlane.f32.xlu2 %v2705_v1 }
 0x3fd   : > { %v2391_v60 = vpop.f32.mrf.mxu1  ;;  %v5749_v63 = vpop.permute.xlu1 %2570 }
 0x3fe   : > { %vm2642_vm8 = vcmp.le.f32.partialorder %v2391_v60, %v5662_v19  ;;  %v5735_v19 = vpop.permute.xlu0 %2560 }
 0x3ff   : > { %vm2674_vm9 = vmand %vm2642_vm8, %vm1530_vm14 }
 0x400   : > { %v2706_v59 = vsel %vm2674_vm9, 1.0, %v6576_v14  ;;  %v5743_v30 = vpop.permute.xlu2 %2595 }
 0x401   : > { %2752 = vadd.xlane.f32.xlu0 %v2706_v59 }
 0x405   : > { %v2393_v47 = vpop.f32.mrf.mxu1 }
 0x406   : > { %vm2643_vm10 = vcmp.le.f32.partialorder %v2393_v47, %v5667_v56  ;;  %v5745_v21 = vpop.permute.xlu0 %2575 }
 0x407   : > { %vm2675_vm11 = vmand %vm2643_vm10, %vm1530_vm14 }
 0x408   : > { %v2707_v50 = vsel %vm2675_vm11, 1.0, %v6576_v14  ;;  %v5753_v34 = vpop.permute.xlu2 %2610 }
 0x409   : > { %2754 = vadd.xlane.f32.xlu1 %v2707_v50 }
 0x40d   : > { %v2396_v33 = vpop.f32.mrf.mxu1 }
 0x40e   : > { %vm2644_vm12 = vcmp.le.f32.partialorder %v2396_v33, %v5634_v28  ;;  %v5755_v29 = vpop.permute.xlu0 %2590  ;;  %v5757_v28 = vpop.permute.xlu1 %2585 }
 0x40f   : > { %vm2676_vm13 = vmand %vm2644_vm12, %vm1530_vm14 }
 0x410   : > { %v2708_v56 = vsel %vm2676_vm13, 1.0, %v6576_v14  ;;  %v5759_v24 = vpop.permute.xlu2 %2625 }
 0x411   : > { %2756 = vadd.xlane.f32.xlu2 %v2708_v56  ;;  %v6680_v56 = vld [vmem:[#allocation10_spill] sm:$0xff] }
 0x415   : > { %v5747_v32 = vpop.f32.mrf.mxu1 }
 0x416   : > { %v5761_v62 = vpop.permute.xlu0 %2605  ;;  %v5763_v57 = vpop.permute.xlu1 %2600  ;;  %vm2645_vm7 = vcmp.le.f32.partialorder %v5747_v32, %v5737_v41 }
 0x41d   : > { %v5751_v49 = vpop.f32.mrf.mxu1 }
 0x41e   : > { %v5770_v36 = vpop.permute.xlu0 %2620  ;;  %v5774_v6 = vpop.permute.xlu1 %2615 }
 0x425   : > { %v2403_v58 = vpop.f32.mrf.mxu1 }
 0x426   : > { %vm2647_vm6 = vcmp.le.f32.partialorder %v2403_v58, %v5726_v12 }
 0x427   : > { %vm2679_vm10 = vmand %vm2647_vm6, %vm1530_vm14 }
 0x42d   : > { %v5765_v17 = vpop.f32.mrf.mxu1 }
 0x432   : > { %v5767_v54 = vpop.xlane.xlu2 %1751 }
 0x433   : > { %6678 = vst [vmem:[#allocation65_spill] sm:$0xff] %v5767_v54  ;;  %4057 = vrcp.f32 %v5767_v54  ;;  %v2186_v39 = vand.u32 2147483648, %v5767_v54  ;;  %v2184_v7 = vand.u32 2147483647, %v5767_v54  ;;  %vm2180_vm1 = vweird.f32 %v5767_v54 }
 0x435   : > { %v5772_v4 = vpop.f32.mrf.mxu1  ;;  %v2187_v23 = vor.u32 1.1754944e-38, %v2186_v39  ;;  %vm2185_vm4 = vcmp.eq.f32.partialorder %v2184_v7, 8.507059e+37 }
 0x439   : > { %v4058_v10 = vpop.eup %4057 }
 0x43a   : > { %v2176_v25 = vmul.f32 %v4058_v10, %v5767_v54  ;;  %v2729_v27 = vpop.xlane.xlu2 %2728  ;;  %vm2181_vm0 = vweird.f32 %v4058_v10 }
 0x43b   : > { %v5777_v3 = vmin.f32 %v2729_v27, 17.0  ;;  %vm2182_vm2 = vmor %vm2180_vm1, %vm2181_vm0 }
 0x43c   : > { %v2177_v38 = vsub.f32 1.0, %v2176_v25  ;;  %v5779_v37 = vpop.xlane.xlu0 %1753 }
 0x43d   : > { %6679 = vst [vmem:[#allocation66_spill] sm:$0xff] %v5779_v37  ;;  %v3731_v22 = vceil.f32 %v5777_v3  ;;  %v3732_v31 = vfloor.f32 %v5777_v3  ;;  %4059 = vrcp.f32 %v5779_v37  ;;  %vm3730_vm15 = vcmp.lt.s32.totalorder %v5777_v3, 0  ;;  %v5786_v16 = vpop.f32.mrf.mxu1 }
 0x43e   : > { %v2178_v51 = vmul.f32 %v4058_v10, %v2177_v38  ;;  %vm2194_vm12 = vweird.f32 %v5779_v37 }
 0x43f   : > { %v3733_v48 = vsel %vm3730_vm15, %v3731_v22, %v3732_v31 }
 0x440   : > { %v2725_v11 = vpop.xlane.xlu1 %2724  ;;  %v3734_v46 = vcvt.f32.s32 %v3733_v48  ;;  %v2179_v55 = vadd.f32 %v4058_v10, %v2178_v51  ;;  %v2200_v48 = vand.u32 2147483648, %v5779_v37 }
 0x441   : > { %v5790_v20 = vmin.f32 %v2725_v11, 17.0 }
 0x442   : > { %vm2854_vm3 = vcmp.eq.s32.totalorder %v5618_v2, %v3734_v46  ;;  %v2183_v8 = vsel %vm2182_vm2, %v4058_v10, %v2179_v55  ;;  %v2733_v31 = vpop.xlane.xlu2 %2732 }
 0x443   : > { %v4060_v1 = vpop.eup %4059  ;;  %v3721_v60 = vceil.f32 %v5790_v20  ;;  %v3722_v59 = vfloor.f32 %v5790_v20  ;;  %v3624_v47 = vsel %vm2854_vm3, 1.0, %v6576_v14  ;;  %vm3720_vm5 = vcmp.lt.s32.totalorder %v5790_v20, 0 }
 0x444   : > { %v2190_v50 = vmul.f32 %v4060_v1, %v5779_v37  ;;  %v2727_v33 = vpop.xlane.xlu0 %2726  ;;  %v2950_v25 = vmul.f32 %v3624_v47, %v6680_v56  ;;  %v2188_v27 = vsel %vm2185_vm4, %v2187_v23, %v2183_v8  ;;  %vm2195_vm11 = vweird.f32 %v4060_v1 }
 0x445   : > { %v5800_v10 = vmin.f32 %v2727_v33, 17.0  ;;  %v3723_v38 = vsel %vm3720_vm5, %v3721_v60, %v3722_v59  ;;  %v2233_v39 = vmul.f32 %v5615_v18, %v2188_v27  ;;  %v5809_v55 = vpop.f32.mrf.mxu1  ;;  %v2198_v18 = vand.u32 2147483647, %v5779_v37  ;;  %vm2196_vm13 = vmor %vm2194_vm12, %vm2195_vm11 }
 0x446   : > { %v2191_v22 = vsub.f32 1.0, %v2190_v50  ;;  %2984 = vadd.xlane.f32.xlu2 %v2950_v25  ;;  %v3724_v51 = vcvt.f32.s32 %v3723_v38  ;;  %v5818_v23 = vmin.f32 %v2733_v31, 17.0  ;;  %v6681_v50 = vld [vmem:[#allocation8_spill] sm:$0xff]  ;;  %v2711_v27 = vsel %vm2679_vm10, 1.0, %v6576_v14  ;;  %vm2677_vm5 = vmand %vm2645_vm7, %vm1530_vm14 }
 0x447   : > { %v3726_v7 = vceil.f32 %v5800_v10  ;;  %v3727_v11 = vfloor.f32 %v5800_v10  ;;  %vm3725_vm8 = vcmp.lt.s32.totalorder %v5800_v10, 0  ;;  %2265 = vst [vmem:[%s5025_s27 + $0xf0] sm:$0xff] %v2233_v39  ;;  %vm2199_vm1 = vcmp.eq.f32.partialorder %v2198_v18, 8.507059e+37 }
 0x448   : > { %v2192_v46 = vmul.f32 %v4060_v1, %v2191_v22  ;;  %v2731_v8 = vpop.xlane.xlu1 %2730  ;;  %vm2852_vm9 = vcmp.eq.s32.totalorder %v5618_v2, %v3724_v51  ;;  %v2201_v31 = vor.u32 1.1754944e-38, %v2200_v48  ;;  %v3741_v51 = vceil.f32 %v5818_v23 }
 0x449   : > { %v5820_v60 = vmin.f32 %v2731_v8, 17.0  ;;  %v3622_v59 = vsel %vm2852_vm9, 1.0, %v6576_v14  ;;  %v3728_v47 = vsel %vm3725_vm8, %v3726_v7, %v3727_v11  ;;  %v3742_v7 = vfloor.f32 %v5818_v23  ;;  %v6682_v8 = vld [vmem:[#allocation9_spill] sm:$0xff] }
 0x44a   : > { %v2948_v33 = vmul.f32 %v3622_v59, %v6681_v50  ;;  %v3729_v56 = vcvt.f32.s32 %v3728_v47  ;;  %v2193_v25 = vadd.f32 %v4060_v1, %v2192_v46  ;;  %vm3740_vm2 = vcmp.lt.s32.totalorder %v5818_v23, 0 }
 0x44b   : > { %v3736_v12 = vceil.f32 %v5820_v60  ;;  %v3737_v58 = vfloor.f32 %v5820_v60  ;;  %vm3735_vm15 = vcmp.lt.s32.totalorder %v5820_v60, 0  ;;  %vm2646_vm4 = vcmp.le.f32.partialorder %v5751_v49, %v5735_v19 }
 0x44c   : > { %2980 = vadd.xlane.f32.xlu0 %v2948_v33  ;;  %v2735_v38 = vpop.xlane.xlu0 %2734  ;;  %vm2853_vm0 = vcmp.eq.s32.totalorder %v5618_v2, %v3729_v56  ;;  %v2197_v22 = vsel %vm2196_vm13, %v4060_v1, %v2193_v25  ;;  %vm2678_vm6 = vmand %vm2646_vm4, %vm1530_vm14  ;;  %vm2650_vm10 = vcmp.le.f32.partialorder %v5786_v16, %v5733_v44 }
 0x44d   : > { %v5832_v11 = vmin.f32 %v2735_v38, 17.0  ;;  %v3623_v46 = vsel %vm2853_vm0, 1.0, %v6576_v14  ;;  %v2202_v47 = vsel %vm2199_vm1, %v2201_v31, %v2197_v22  ;;  %v3738_v50 = vsel %vm3735_vm15, %v3736_v12, %v3737_v58  ;;  %v5849_v58 = vpop.f32.mrf.mxu1  ;;  %v2739_v22 = vpop.xlane.xlu2 %2738  ;;  %vm2682_vm13 = vmand %vm2650_vm10, %vm1530_vm14 }
 0x44e   : > { %2762 = vadd.xlane.f32.xlu2 %v2711_v27  ;;  %v2949_v59 = vmul.f32 %v3623_v46, %v6682_v8  ;;  %v2234_v18 = vmul.f32 %v5630_v45, %v2202_v47  ;;  %v3739_v33 = vcvt.f32.s32 %v3738_v50  ;;  %v3743_v12 = vsel %vm3740_vm2, %v3741_v51, %v3742_v7  ;;  %v6683_v51 = vld [vmem:[#allocation13_spill] sm:$0xff] }
 0x44f   : > { %v3746_v1 = vceil.f32 %v5832_v11  ;;  %v3747_v48 = vfloor.f32 %v5832_v11  ;;  %vm3745_vm3 = vcmp.lt.s32.totalorder %v5832_v11, 0  ;;  %v2709_v38 = vsel %vm2677_vm5, 1.0, %v6576_v14 }
 0x450   : > { %2982 = vadd.xlane.f32.xlu1 %v2949_v59  ;;  %2266 = vst [vmem:[%s5025_s27 + $0xf8] sm:$0xff] %v2234_v18  ;;  %v2282_v56 = vpack.c.bf16 %v2234_v18, %v2233_v39  ;;  %v2737_v45 = vpop.xlane.xlu1 %2736  ;;  %vm2855_vm7 = vcmp.eq.s32.totalorder %v5618_v2, %v3739_v33  ;;  %v3744_v41 = vcvt.f32.s32 %v3743_v12  ;;  %v2710_v31 = vsel %vm2678_vm6, 1.0, %v6576_v14  ;;  %v6684_v18 = vld [vmem:[#allocation11_spill] sm:$0xff] }
 0x451   : > { %v3748_v25 = vsel %vm3745_vm3, %v3746_v1, %v3747_v48  ;;  %v5856_v32 = vmin.f32 %v2737_v45, 17.0  ;;  %v3625_v59 = vsel %vm2855_vm7, 1.0, %v6576_v14  ;;  %v5870_v47 = vmin.f32 %v2739_v22, 17.0 }
 0x452   : > { %v3749_v27 = vcvt.f32.s32 %v3748_v25  ;;  %2430 = vmatmul.bf16.gmra.mxu1 %v2282_v56  ;;  %vm2856_vm11 = vcmp.eq.s32.totalorder %v5618_v2, %v3744_v41  ;;  %v2951_v33 = vmul.f32 %v3625_v59, %v6684_v18  ;;  %vm2648_vm15 = vcmp.le.f32.partialorder %v5765_v17, %v5749_v63 }
 0x453   : > { %v3751_v50 = vceil.f32 %v5856_v32  ;;  %v3752_v1 = vfloor.f32 %v5856_v32  ;;  %vm3750_vm12 = vcmp.lt.s32.totalorder %v5856_v32, 0  ;;  %v3626_v56 = vsel %vm2856_vm11, 1.0, %v6576_v14  ;;  %vm2680_vm1 = vmand %vm2648_vm15, %vm1530_vm14 }
 0x454   : > { %2758 = vadd.xlane.f32.xlu0 %v2709_v38  ;;  %v2741_v19 = vpop.xlane.xlu0 %2740  ;;  %vm2857_vm8 = vcmp.eq.s32.totalorder %v5618_v2, %v3749_v27  ;;  %v3756_v16 = vceil.f32 %v5870_v47  ;;  %v3757_v12 = vfloor.f32 %v5870_v47  ;;  %v6685_v38 = vld [vmem:[#allocation12_spill] sm:$0xff]  ;;  %vm3755_vm0 = vcmp.lt.s32.totalorder %v5870_v47, 0 }
 0x455   : > { %v5858_v49 = vmin.f32 %v2741_v19, 17.0  ;;  %v3627_v39 = vsel %vm2857_vm8, 1.0, %v6576_v14  ;;  %v2418_v25 = vpop.f32.mrf.mxu1  ;;  %v3753_v45 = vsel %vm3750_vm12, %v3751_v50, %v3752_v1  ;;  %v2952_v19 = vmul.f32 %v3626_v56, %v6685_v38  ;;  %v6687_v50 = vld [vmem:[#allocation16_spill] sm:$0xff] }
 0x456   : > { %v2953_v7 = vmul.f32 %v3627_v39, %v6683_v51  ;;  %v2714_v41 = vsel %vm2682_vm13, 1.0, %v6576_v14  ;;  %v3754_v63 = vcvt.f32.s32 %v3753_v45  ;;  %vm2649_vm3 = vcmp.le.f32.partialorder %v5772_v4, %v5745_v21 }
 0x457   : > { %v3761_v46 = vceil.f32 %v5858_v49  ;;  %v3762_v8 = vfloor.f32 %v5858_v49  ;;  %vm3760_vm9 = vcmp.lt.s32.totalorder %v5858_v49, 0  ;;  %v3758_v39 = vsel %vm3755_vm0, %v3756_v16, %v3757_v12  ;;  %vm2681_vm4 = vmand %vm2649_vm3, %vm1530_vm14  ;;  %v6688_v12 = vld [vmem:[#allocation14_spill] sm:$0xff] }
 0x458   : > { %2760 = vadd.xlane.f32.xlu1 %v2710_v31  ;;  %2990 = vadd.xlane.f32.xlu2 %v2953_v7  ;;  %v2743_v22 = vpop.xlane.xlu1 %2742  ;;  %v2712_v31 = vsel %vm2680_vm1, 1.0, %v6576_v14  ;;  %vm2858_vm5 = vcmp.eq.s32.totalorder %v5618_v2, %v3754_v63  ;;  %vm2653_vm7 = vcmp.le.f32.partialorder %v2418_v25, %v5743_v30  ;;  %vm2651_vm11 = vcmp.le.f32.partialorder %v5809_v55, %v5757_v28  ;;  %v6689_v63 = vld [vmem:[#allocation15_spill] sm:$0xff] }
 0x459   : > { %v3763_v48 = vsel %vm3760_vm9, %v3761_v46, %v3762_v8  ;;  %v3759_v46 = vcvt.f32.s32 %v3758_v39  ;;  %v2745_v8 = vpop.xlane.xlu2 %2744  ;;  %v5900_v59 = vmin.f32 %v2743_v22, 17.0  ;;  %v3628_v18 = vsel %vm2858_vm5, 1.0, %v6576_v14  ;;  %vm2685_vm10 = vmand %vm2653_vm7, %vm1530_vm14 }
 0x45a   : > { %v3764_v44 = vcvt.f32.s32 %v3763_v48  ;;  %v2713_v48 = vsel %vm2681_vm4, 1.0, %v6576_v14  ;;  %v2954_v45 = vmul.f32 %v3628_v18, %v6688_v12  ;;  %v2717_v22 = vsel %vm2685_vm10, 1.0, %v6576_v14  ;;  %vm2683_vm13 = vmand %vm2651_vm11, %vm1530_vm14 }
 0x45b   : > { %vm2859_vm8 = vcmp.eq.s32.totalorder %v5618_v2, %v3759_v46  ;;  %v3766_v56 = vceil.f32 %v5900_v59  ;;  %vm3765_vm9 = vcmp.lt.s32.totalorder %v5900_v59, 0  ;;  %vm2652_vm0 = vcmp.le.f32.partialorder %v5849_v58, %v5755_v29 }
 0x45c   : > { %2986 = vadd.xlane.f32.xlu0 %v2951_v33  ;;  %v2747_v27 = vpop.xlane.xlu0 %2746  ;;  %vm2860_vm2 = vcmp.eq.s32.totalorder %v5618_v2, %v3764_v44  ;;  %v5908_v33 = vmin.f32 %v2745_v8, 17.0  ;;  %v3767_v44 = vfloor.f32 %v5900_v59  ;;  %vm2684_vm1 = vmand %vm2652_vm0, %vm1530_vm14 }
 0x45d   : > { %v5891_v17 = vmin.f32 %v2747_v27, 17.0  ;;  %v3630_v51 = vsel %vm2860_vm2, 1.0, %v6576_v14  ;;  %v3629_v27 = vsel %vm2859_vm8, 1.0, %v6576_v14  ;;  %v2716_v58 = vsel %vm2684_vm1, 1.0, %v6576_v14 }
 0x45e   : > { %v2956_v1 = vmul.f32 %v3630_v51, %v6687_v50  ;;  %v3771_v30 = vceil.f32 %v5908_v33  ;;  %v3772_v25 = vfloor.f32 %v5908_v33  ;;  %v2955_v39 = vmul.f32 %v3629_v27, %v6689_v63 }
 0x45f   : > { %6686 = vst [vmem:[#allocation10_spill] sm:$0xff] %v5891_v17  ;;  %v3776_v21 = vceil.f32 %v5891_v17  ;;  %v3777_v4 = vfloor.f32 %v5891_v17  ;;  %vm3775_vm6 = vcmp.lt.s32.totalorder %v5891_v17, 0  ;;  %vm3770_vm12 = vcmp.lt.s32.totalorder %v5908_v33, 0 }
 0x460   : > { %2988 = vadd.xlane.f32.xlu1 %v2952_v19  ;;  %2768 = vadd.xlane.f32.xlu2 %v2714_v41  ;;  %v3768_v41 = vsel %vm3765_vm9, %v3766_v56, %v3767_v44  ;;  %v3773_v55 = vsel %vm3770_vm12, %v3771_v30, %v3772_v25  ;;  %v2715_v51 = vsel %vm2683_vm13, 1.0, %v6576_v14 }
 0x461   : > { %v3778_v16 = vsel %vm3775_vm6, %v3776_v21, %v3777_v4  ;;  %v3774_v21 = vcvt.f32.s32 %v3773_v55  ;;  %v6696_v55 = vld [vmem:[#allocation26_spill] sm:$0xff] }
 0x462   : > { %v3779_v19 = vcvt.f32.s32 %v3778_v16 }
 0x463   : > { %vm2862_vm3 = vcmp.eq.s32.totalorder %v5618_v2, %v3774_v21 }
 0x464   : > { %2764 = vadd.xlane.f32.xlu0 %v2712_v31  ;;  %v5895_v7 = vpop.f32.mrf.mxu1  ;;  %vm2863_vm15 = vcmp.eq.s32.totalorder %v5618_v2, %v3779_v19  ;;  %v3769_v31 = vcvt.f32.s32 %v3768_v41  ;;  %v2749_v28 = vpop.xlane.xlu1 %2748  ;;  %v3632_v19 = vsel %vm2862_vm3, 1.0, %v6576_v14  ;;  %v6694_v41 = vld [vmem:[#allocation18_spill] sm:$0xff] }
 0x465   : > { %v3633_v46 = vsel %vm2863_vm15, 1.0, %v6576_v14  ;;  %v5933_v8 = vmin.f32 %v2749_v28, 17.0  ;;  %vm2654_vm7 = vcmp.le.f32.partialorder %v5895_v7, %v5763_v57  ;;  %v2958_v63 = vmul.f32 %v3632_v19, %v6694_v41  ;;  %v6700_v19 = vld [vmem:[#allocation20_spill] sm:$0xff] }
 0x466   : > { %vm2861_vm2 = vcmp.eq.s32.totalorder %v5618_v2, %v3769_v31  ;;  %vm2686_vm9 = vmand %vm2654_vm7, %vm1530_vm14 }
 0x467   : > { %6690 = vst [vmem:[#allocation8_spill] sm:$0xff] %v5933_v8  ;;  %v3631_v18 = vsel %vm2861_vm2, 1.0, %v6576_v14  ;;  %v3781_v56 = vceil.f32 %v5933_v8  ;;  %v3782_v44 = vfloor.f32 %v5933_v8  ;;  %vm3780_vm6 = vcmp.lt.s32.totalorder %v5933_v8, 0 }
 0x468   : > { %2766 = vadd.xlane.f32.xlu1 %v2713_v48  ;;  %2996 = vadd.xlane.f32.xlu2 %v2956_v1  ;;  %v6691_v1 = vld [vmem:[#allocation19_spill] sm:$0xff]  ;;  %v2718_v28 = vsel %vm2686_vm9, 1.0, %v6576_v14 }
 0x469   : > { %v2959_v48 = vmul.f32 %v3633_v46, %v6691_v1 }
 0x46c   : > { %2992 = vadd.xlane.f32.xlu0 %v2954_v45  ;;  %v2423_v38 = vpop.f32.mrf.mxu1  ;;  %v6693_v45 = vld [vmem:[#allocation17_spill] sm:$0xff] }
 0x46d   : > { %v2957_v27 = vmul.f32 %v3631_v18, %v6693_v45  ;;  %vm2655_vm11 = vcmp.le.f32.partialorder %v2423_v38, %v5761_v62  ;;  %v6699_v45 = vld [vmem:[#allocation23_spill] sm:$0xff] }
 0x46e   : > { %vm2687_vm12 = vmand %vm2655_vm11, %vm1530_vm14  ;;  %4061 = vlog2.f32 %v6699_v45 }
 0x46f   : > { %v2719_v46 = vsel %vm2687_vm12, 1.0, %v6576_v14  ;;  %4063 = vlog2.f32 %v6700_v19 }
 0x470   : > { %2994 = vadd.xlane.f32.xlu1 %v2955_v39  ;;  %2774 = vadd.xlane.f32.xlu2 %v2717_v22 }
 0x474   : > { %2770 = vadd.xlane.f32.xlu0 %v2715_v51  ;;  %v2426_v4 = vpop.f32.mrf.mxu1  ;;  %v2753_v50 = vpop.xlane.xlu0 %2752 }
 0x475   : > { %v5939_v29 = vmin.f32 %v2753_v50, 17.0  ;;  %vm2656_vm4 = vcmp.le.f32.partialorder %v2426_v4, %v5753_v34  ;;  %v3783_v34 = vsel %vm3780_vm6, %v3781_v56, %v3782_v44  ;;  %v6697_v50 = vld [vmem:[#allocation22_spill] sm:$0xff]  ;;  %v6698_v44 = vld [vmem:[#allocation27_spill] sm:$0xff] }
 0x476   : > { %vm2688_vm8 = vmand %vm2656_vm4, %vm1530_vm14  ;;  %v3784_v22 = vcvt.f32.s32 %v3783_v34  ;;  %v6701_v34 = vld [vmem:[#allocation21_spill] sm:$0xff] }
 0x477   : > { %6692 = vst [vmem:[#allocation9_spill] sm:$0xff] %v5939_v29  ;;  %v3791_v16 = vceil.f32 %v5939_v29  ;;  %v3792_v12 = vfloor.f32 %v5939_v29  ;;  %vm3790_vm5 = vcmp.lt.s32.totalorder %v5939_v29, 0  ;;  %v2720_v39 = vsel %vm2688_vm8, 1.0, %v6576_v14 }
 0x478   : > { %2772 = vadd.xlane.f32.xlu1 %v2716_v58  ;;  %3002 = vadd.xlane.f32.xlu2 %v2959_v48  ;;  %vm2864_vm13 = vcmp.eq.s32.totalorder %v5618_v2, %v3784_v22  ;;  %4065 = vlog2.f32 %v6701_v34 }
 0x479   : > { %v3793_v30 = vsel %vm3790_vm5, %v3791_v16, %v3792_v12  ;;  %v3634_v21 = vsel %vm2864_vm13, 1.0, %v6576_v14  ;;  %v2751_v12 = vpop.xlane.xlu2 %2750 }
 0x47a   : > { %v3794_v25 = vcvt.f32.s32 %v3793_v30  ;;  %v2960_v1 = vmul.f32 %v3634_v21, %v6697_v50  ;;  %v6004_v21 = vmin.f32 %v2751_v12, 17.0 }
 0x47c   : > { %2998 = vadd.xlane.f32.xlu0 %v2957_v27  ;;  %vm2866_vm10 = vcmp.eq.s32.totalorder %v5618_v2, %v3794_v25  ;;  %v2755_v31 = vpop.xlane.xlu1 %2754  ;;  %v2428_v4 = vpop.f32.mrf.mxu1  ;;  %6703 = vst [vmem:[#allocation11_spill] sm:$0xff] %v6004_v21  ;;  %vm3785_vm3 = vcmp.lt.s32.totalorder %v6004_v21, 0 }
 0x47d   : > { %v3636_v57 = vsel %vm2866_vm10, 1.0, %v6576_v14  ;;  %v5968_v7 = vmin.f32 %v2755_v31, 17.0  ;;  %vm2657_vm0 = vcmp.le.f32.partialorder %v2428_v4, %v5774_v6  ;;  %v4062_v6 = vpop.eup %4061 }
 0x47e   : > { %v2962_v51 = vmul.f32 %v3636_v57, %v6696_v55  ;;  %vm2689_vm1 = vmand %vm2657_vm0, %vm1530_vm14  ;;  %v5986_v30 = vmul.f32 0.6931472, %v4062_v6  ;;  %v6702_v57 = vld [vmem:[#allocation31_spill] sm:$0xff] }
 0x47f   : > { %6695 = vst [vmem:[#allocation13_spill] sm:$0xff] %v5968_v7  ;;  %v3796_v62 = vceil.f32 %v5968_v7  ;;  %v3797_v38 = vfloor.f32 %v5968_v7  ;;  %vm3795_vm15 = vcmp.lt.s32.totalorder %v5968_v7, 0  ;;  %v2721_v18 = vsel %vm2689_vm1, 1.0, %v6576_v14 }
 0x480   : > { %3000 = vadd.xlane.f32.xlu1 %v2958_v63  ;;  %2780 = vadd.xlane.f32.xlu2 %v2720_v39  ;;  %v4064_v63 = vpop.eup %4063  ;;  %4067 = vlog2.f32 %v6702_v57 }
 0x481   : > { %v3798_v48 = vsel %vm3795_vm15, %v3796_v62, %v3797_v38  ;;  %v5993_v39 = vmul.f32 0.6931472, %v4064_v63  ;;  %v4066_v22 = vpop.eup %4065  ;;  %v6704_v38 = vld [vmem:[#allocation25_spill] sm:$0xff] }
 0x482   : > { %v3799_v58 = vcvt.f32.s32 %v3798_v48  ;;  %v6000_v55 = vmul.f32 0.6931472, %v4066_v22  ;;  %4069 = vlog2.f32 %v6704_v38  ;;  %v3787_v48 = vfloor.f32 %v6004_v21 }
 0x484   : > { %2776 = vadd.xlane.f32.xlu0 %v2718_v28  ;;  %vm2867_vm2 = vcmp.eq.s32.totalorder %v5618_v2, %v3799_v58  ;;  %v2757_v27 = vpop.xlane.xlu2 %2756  ;;  %v6705_v58 = vld [vmem:[#allocation28_spill] sm:$0xff]  ;;  %v6707_v28 = vld [vmem:[#allocation35_spill] sm:$0xff] }
 0x485   : > { %v3637_v56 = vsel %vm2867_vm2, 1.0, %v6576_v14  ;;  %4071 = vlog2.f32 %v6705_v58 }
 0x486   : > { %v2963_v16 = vmul.f32 %v3637_v56, %v6698_v44  ;;  %v4068_v4 = vpop.eup %4067  ;;  %v6015_v44 = vmin.f32 %v2757_v27, 17.0 }
 0x488   : > { %2778 = vadd.xlane.f32.xlu1 %v2719_v46  ;;  %3008 = vadd.xlane.f32.xlu2 %v2962_v51  ;;  %v4070_v56 = vpop.eup %4069  ;;  %v3801_v38 = vceil.f32 %v6015_v44  ;;  %vm3800_vm5 = vcmp.lt.s32.totalorder %v6015_v44, 0 }
 0x489   : > { %v6027_v57 = vmul.f32 0.6931472, %v4070_v56 }
 0x48b   : > { %v4072_v27 = vpop.eup %4071 }
 0x48c   : > { %3004 = vadd.xlane.f32.xlu0 %v2960_v1  ;;  %v3786_v1 = vceil.f32 %v6004_v21 }
 0x48e   : > { %v3788_v19 = vsel %vm3785_vm3, %v3786_v1, %v3787_v48  ;;  %v3802_v1 = vfloor.f32 %v6015_v44 }
 0x48f   : > { %v3789_v58 = vcvt.f32.s32 %v3788_v19  ;;  %v6044_v19 = vmul.f32 0.6931472, %v4072_v27 }
 0x491   : > { %vm2865_vm10 = vcmp.eq.s32.totalorder %v5618_v2, %v3789_v58 }
 0x494   : > { %2782 = vadd.xlane.f32.xlu0 %v2721_v18  ;;  %v6013_v18 = vmul.f32 0.6931472, %v4068_v4 }
 0x49c   : > { %3010 = vadd.xlane.f32.xlu0 %v2963_v16 }
 0x4b9   : > { %v5988_v25 = vpop.xlane.xlu2 %2984 }
 0x4bf   : > { %v5995_v31 = vpop.xlane.xlu0 %2980 }
 0x4c1   : > { %v2763_v51 = vpop.xlane.xlu2 %2762 }
 0x4c3   : > { %v6002_v46 = vpop.xlane.xlu1 %2982 }
 0x4c7   : > { %v2759_v50 = vpop.xlane.xlu0 %2758 }
 0x4c8   : > { %v6023_v34 = vmin.f32 %v2759_v50, 17.0 }
 0x4ca   : > { %v3806_v56 = vceil.f32 %v6023_v34  ;;  %v3807_v41 = vfloor.f32 %v6023_v34  ;;  %vm3805_vm8 = vcmp.lt.s32.totalorder %v6023_v34, 0 }
 0x4cb   : > { %v2761_v16 = vpop.xlane.xlu1 %2760  ;;  %v6017_v12 = vpop.xlane.xlu2 %2990 }
 0x4cc   : > { %v6019_v45 = vmin.f32 %v2761_v16, 17.0  ;;  %v6706_v16 = vld [vmem:[#allocation40_spill] sm:$0xff]  ;;  %v3808_v54 = vsel %vm3805_vm8, %v3806_v56, %v3807_v41  ;;  %v6710_v41 = vld [vmem:[#allocation38_spill] sm:$0xff] }
 0x4cd   : > { %4073 = vlog2.f32 %v6706_v16  ;;  %v6046_v16 = vmin.f32 %v2763_v51, 17.0  ;;  %v3803_v51 = vsel %vm3800_vm5, %v3801_v38, %v3802_v1  ;;  %v3809_v38 = vcvt.f32.s32 %v3808_v54 }
 0x4ce   : > { %v3811_v63 = vceil.f32 %v6019_v45  ;;  %v3812_v22 = vfloor.f32 %v6019_v45  ;;  %vm3810_vm4 = vcmp.lt.s32.totalorder %v6019_v45, 0  ;;  %4075 = vlog2.f32 %v6707_v28 }
 0x4cf   : > { %v6031_v4 = vpop.xlane.xlu0 %2986  ;;  %v2431_v50 = vpop.f32.mrf.mxu1  ;;  %v3817_v28 = vfloor.f32 %v6046_v16  ;;  %v3804_v13 = vcvt.f32.s32 %v3803_v51  ;;  %vm3815_vm11 = vcmp.lt.s32.totalorder %v6046_v16, 0  ;;  %4077 = vlog2.f32 %v6710_v41  ;;  %v6711_v51 = vld [vmem:[#allocation24_spill] sm:$0xff] }
 0x4d0   : > { %v3813_v6 = vsel %vm3810_vm4, %v3811_v63, %v3812_v22  ;;  %vm2658_vm6 = vcmp.le.f32.partialorder %v2431_v50, %v5770_v36  ;;  %v6708_v50 = vld [vmem:[#allocation30_spill] sm:$0xff]  ;;  %v3635_v36 = vsel %vm2865_vm10, 1.0, %v6576_v14 }
 0x4d1   : > { %v3814_v62 = vcvt.f32.s32 %v3813_v6  ;;  %vm2690_vm7 = vmand %vm2658_vm6, %vm1530_vm14  ;;  %vm6082_vm0 = vcmp.eq.s32.totalorder %v5618_v2, %v3804_v13 }
 0x4d2   : > { %v2722_v63 = vsel %vm2690_vm7, 1.0, %v6576_v14 }
 0x4d3   : > { %v6049_v22 = vpop.xlane.xlu1 %2988  ;;  %v2769_v48 = vpop.xlane.xlu2 %2768  ;;  %vm2870_vm9 = vcmp.eq.s32.totalorder %v5618_v2, %v3814_v62  ;;  %2784 = vadd.xlane.f32.xlu1 %v2722_v63  ;;  %v3816_v62 = vceil.f32 %v6046_v16 }
 0x4d4   : > { %v3640_v6 = vsel %vm2870_vm9, 1.0, %v6576_v14  ;;  %v4074_v27 = vpop.eup %4073  ;;  %v6093_v52 = vmin.f32 %v2769_v48, 17.0 }
 0x4d5   : > { %v2966_v37 = vmul.f32 %v3640_v6, %v6708_v50  ;;  %v4076_v1 = vpop.eup %4075  ;;  %v6069_v6 = vmul.f32 0.6931472, %v4074_v27  ;;  %v2961_v50 = vmul.f32 %v3635_v36, %v6711_v51  ;;  %v6719_v27 = vld [vmem:[#allocation33_spill] sm:$0xff] }
 0x4d6   : > { %6715 = vst [vmem:[#allocation14_spill] sm:$0xff] %v6093_v52  ;;  %v3831_v36 = vceil.f32 %v6093_v52  ;;  %v3832_v7 = vfloor.f32 %v6093_v52  ;;  %vm3830_vm2 = vcmp.lt.s32.totalorder %v6093_v52, 0 }
 0x4d7   : > { %3016 = vadd.xlane.f32.xlu0 %v2966_v37  ;;  %v2765_v63 = vpop.xlane.xlu0 %2764  ;;  %v2433_v58 = vpop.f32.mrf.mxu1 }
 0x4d8   : > { %v6066_v61 = vmin.f32 %v2765_v63, 17.0  ;;  %vm2659_vm12 = vcmp.le.f32.partialorder %v2433_v58, %v5759_v24  ;;  %v3818_v58 = vsel %vm3815_vm11, %v3816_v62, %v3817_v28  ;;  %v6716_v62 = vld [vmem:[#allocation46_spill] sm:$0xff]  ;;  %v4078_v28 = vpop.eup %4077 }
 0x4d9   : > { %vm2691_vm15 = vmand %vm2659_vm12, %vm1530_vm14  ;;  %vm2869_vm14 = vcmp.eq.s32.totalorder %v5618_v2, %v3809_v38  ;;  %4079 = vlog2.f32 %v6716_v62  ;;  %v6113_v35 = vmul.f32 0.6931472, %v4078_v28  ;;  %v6721_v28 = vld [vmem:[#allocation34_spill] sm:$0xff] }
 0x4da   : > { %6709 = vst [vmem:[#allocation12_spill] sm:$0xff] %v6066_v61  ;;  %vm3820_vm13 = vcmp.lt.s32.totalorder %v6066_v61, 0  ;;  %v3821_v37 = vceil.f32 %v6066_v61  ;;  %v3822_v56 = vfloor.f32 %v6066_v61  ;;  %v2723_v24 = vsel %vm2691_vm15, 1.0, %v6576_v14 }
 0x4db   : > { %v2767_v63 = vpop.xlane.xlu1 %2766  ;;  %v6078_v54 = vpop.xlane.xlu2 %2996  ;;  %3006 = vadd.xlane.f32.xlu1 %v2961_v50  ;;  %2786 = vadd.xlane.f32.xlu2 %v2723_v24  ;;  %v6095_v14 = vmul.f32 0.6931472, %v4076_v1 }
 0x4dc   : > { %v6088_v41 = vmin.f32 %v2767_v63, 17.0  ;;  %v3823_v51 = vsel %vm3820_vm13, %v3821_v37, %v3822_v56  ;;  %v6717_v63 = vmov 0.0   ;;  %v3819_v37 = vcvt.f32.s32 %v3818_v58 }
 0x4dd   : > { %v3638_v38 = vsel %vm6082_vm0, 1.0, %v6717_v63  ;;  %v3639_v48 = vsel %vm2869_vm14, 1.0, %v6717_v63  ;;  %v3824_v1 = vcvt.f32.s32 %v3823_v51 }
 0x4de   : > { %6714 = vst [vmem:[#allocation16_spill] sm:$0xff] %v6088_v41  ;;  %v3826_v13 = vceil.f32 %v6088_v41  ;;  %v3827_v42 = vfloor.f32 %v6088_v41  ;;  %vm3825_vm1 = vcmp.lt.s32.totalorder %v6088_v41, 0  ;;  %v2964_v29 = vmul.f32 %v3638_v38, %v6718_v15 }
 0x4df   : > { %v6101_v50 = vpop.xlane.xlu0 %2992  ;;  %v2965_v21 = vmul.f32 %v3639_v48, %v6719_v27  ;;  %vm2871_vm4 = vcmp.eq.s32.totalorder %v5618_v2, %v3819_v37  ;;  %vm2872_vm5 = vcmp.eq.s32.totalorder %v5618_v2, %v3824_v1  ;;  %v6722_v48 = vld [vmem:[#allocation42_spill] sm:$0xff]  ;;  %v6724_v27 = vld [vmem:[#allocation44_spill] sm:$0xff] }
 0x4e0   : > { %v3828_v24 = vsel %vm3825_vm1, %v3826_v13, %v3827_v42  ;;  %v4080_v42 = vpop.eup %4079  ;;  %4081 = vlog2.f32 %v6722_v48  ;;  %v3641_v37 = vsel %vm2871_vm4, 1.0, %v6717_v63  ;;  %v3642_v1 = vsel %vm2872_vm5, 1.0, %v6717_v63  ;;  %v6725_v48 = vld [vmem:[#allocation32_spill] sm:$0xff] }
 0x4e1   : > { %v3829_v62 = vcvt.f32.s32 %v3828_v24  ;;  %v3833_v24 = vsel %vm3830_vm2, %v3831_v36, %v3832_v7  ;;  %4083 = vlog2.f32 %v6724_v27  ;;  %v2967_v51 = vmul.f32 %v3641_v37, %v6725_v48  ;;  %v6726_v7 = vld [vmem:[#allocation37_spill] sm:$0xff] }
 0x4e2   : > { %v2968_v36 = vmul.f32 %v3642_v1, %v6726_v7  ;;  %vm3141_vm5 = vcmp.eq.s32.totalorder %v5618_v2, 1 }
 0x4e3   : > { %v6116_v41 = vpop.xlane.xlu1 %2994  ;;  %v2775_v58 = vpop.xlane.xlu2 %2774  ;;  %vm2873_vm3 = vcmp.eq.s32.totalorder %v5618_v2, %v3829_v62  ;;  %3012 = vadd.xlane.f32.xlu1 %v2964_v29  ;;  %3014 = vadd.xlane.f32.xlu2 %v2965_v21  ;;  %v6134_v21 = vmul.f32 0.6931472, %v4080_v42 }
 0x4e4   : > { %v3643_v15 = vsel %vm2873_vm3, 1.0, %v6717_v63  ;;  %v6124_v13 = vmin.f32 %v2775_v58, 17.0  ;;  %v3834_v58 = vcvt.f32.s32 %v3833_v24 }
 0x4e5   : > { %v2969_v38 = vmul.f32 %v3643_v15, %v6721_v28 }
 0x4e6   : > { %6720 = vst [vmem:[#allocation15_spill] sm:$0xff] %v6124_v13  ;;  %v3846_v15 = vceil.f32 %v6124_v13  ;;  %v3847_v28 = vfloor.f32 %v6124_v13  ;;  %vm3845_vm6 = vcmp.lt.s32.totalorder %v6124_v13, 0  ;;  %vm2874_vm7 = vcmp.eq.s32.totalorder %v5618_v2, %v3834_v58 }
 0x4e7   : > { %3022 = vadd.xlane.f32.xlu0 %v2969_v38  ;;  %v2771_v29 = vpop.xlane.xlu0 %2770 }
 0x4e8   : > { %v6132_v62 = vmin.f32 %v2771_v29, 17.0  ;;  %v4082_v29 = vpop.eup %4081  ;;  %v3848_v7 = vsel %vm3845_vm6, %v3846_v15, %v3847_v28  ;;  %vm3140_vm6 = vcmp.eq.s32.totalorder %v5618_v2, 0 }
 0x4e9   : > { %v4084_v13 = vpop.eup %4083  ;;  %v6155_v53 = vmul.f32 0.6931472, %v4082_v29  ;;  %v6729_v29 = vld [vmem:[#allocation36_spill] sm:$0xff] }
 0x4ea   : > { %6723 = vst [vmem:[#allocation19_spill] sm:$0xff] %v6132_v62  ;;  %vm3835_vm8 = vcmp.lt.s32.totalorder %v6132_v62, 0  ;;  %v3836_v38 = vceil.f32 %v6132_v62  ;;  %v3837_v42 = vfloor.f32 %v6132_v62  ;;  %v6165_v37 = vmul.f32 0.6931472, %v4084_v13  ;;  %v6731_v13 = vld [vmem:[#allocation41_spill] sm:$0xff] }
 0x4eb   : > { %v2773_v56 = vpop.xlane.xlu1 %2772  ;;  %v6145_v27 = vpop.xlane.xlu2 %3002  ;;  %3018 = vadd.xlane.f32.xlu1 %v2967_v51  ;;  %3020 = vadd.xlane.f32.xlu2 %v2968_v36  ;;  %v3644_v51 = vsel %vm2874_vm7, 1.0, %v6717_v63  ;;  %v3849_v36 = vcvt.f32.s32 %v3848_v7  ;;  %v6732_v7 = vld [vmem:[#allocation48_spill] sm:$0xff] }
 0x4ec   : > { %v6147_v24 = vmin.f32 %v2773_v56, 17.0  ;;  %v3838_v1 = vsel %vm3835_vm8, %v3836_v38, %v3837_v42  ;;  %v6728_v38 = vld [vmem:[#allocation39_spill] sm:$0xff]  ;;  %4085 = vlog2.f32 %v6732_v7 }
 0x4ed   : > { %v3839_v48 = vcvt.f32.s32 %v3838_v1  ;;  %vm2877_vm12 = vcmp.eq.s32.totalorder %v5618_v2, %v3849_v36  ;;  %4087 = vlog2.f32 %v5291_v40 }
 0x4ee   : > { %6727 = vst [vmem:[#allocation17_spill] sm:$0xff] %v6147_v24  ;;  %vm3840_vm9 = vcmp.lt.s32.totalorder %v6147_v24, 0  ;;  %v3841_v62 = vceil.f32 %v6147_v24  ;;  %v3842_v52 = vfloor.f32 %v6147_v24  ;;  %v2970_v24 = vmul.f32 %v3644_v51, %v6729_v29  ;;  %v6734_v29 = vld [vmem:[#allocation43_spill] sm:$0xff] }
 0x4ef   : > { %v6157_v56 = vpop.xlane.xlu0 %2998  ;;  %vm2875_vm10 = vcmp.eq.s32.totalorder %v5618_v2, %v3839_v48  ;;  %4089 = vlog2.f32 %v5349_v43  ;;  %v6749_v43 = vld [vmem:[#allocation54_spill] sm:$0xff] }
 0x4f0   : > { %v3645_v15 = vsel %vm2875_vm10, 1.0, %v6717_v63  ;;  %v3843_v28 = vsel %vm3840_vm9, %v3841_v62, %v3842_v52  ;;  %4091 = vlog2.f32 %v6749_v43 }
 0x4f1   : > { %v2971_v42 = vmul.f32 %v3645_v15, %v6728_v38  ;;  %v3844_v1 = vcvt.f32.s32 %v3843_v28 }
 0x4f3   : > { %v6168_v8 = vpop.xlane.xlu1 %3000  ;;  %v2781_v61 = vpop.xlane.xlu2 %2780  ;;  %vm2876_vm11 = vcmp.eq.s32.totalorder %v5618_v2, %v3844_v1  ;;  %3024 = vadd.xlane.f32.xlu1 %v2970_v24  ;;  %3026 = vadd.xlane.f32.xlu2 %v2971_v42 }
 0x4f4   : > { %v6173_v58 = vmin.f32 %v2781_v61, 17.0  ;;  %v3646_v52 = vsel %vm2876_vm11, 1.0, %v6717_v63  ;;  %v3647_v61 = vsel %vm2877_vm12, 1.0, %v6717_v63 }
 0x4f5   : > { %v2972_v62 = vmul.f32 %v3646_v52, %v6731_v13  ;;  %v2973_v52 = vmul.f32 %v3647_v61, %v6734_v29  ;;  %v4086_v13 = vpop.eup %4085 }
 0x4f6   : > { %6730 = vst [vmem:[#allocation18_spill] sm:$0xff] %v6173_v58  ;;  %vm3860_vm13 = vcmp.lt.s32.totalorder %v6173_v58, 0  ;;  %v3861_v51 = vceil.f32 %v6173_v58  ;;  %v3862_v15 = vfloor.f32 %v6173_v58 }
 0x4f7   : > { %3028 = vadd.xlane.f32.xlu0 %v2972_v62  ;;  %v2777_v28 = vpop.xlane.xlu0 %2776 }
 0x4f8   : > { %v6183_v24 = vmin.f32 %v2777_v28, 17.0  ;;  %v3863_v38 = vsel %vm3860_vm13, %v3861_v51, %v3862_v15 }
 0x4f9   : > { %v3864_v42 = vcvt.f32.s32 %v3863_v38  ;;  %v6195_v38 = vmul.f32 0.6931472, %v4086_v13 }
 0x4fa   : > { %6733 = vst [vmem:[#allocation26_spill] sm:$0xff] %v6183_v24  ;;  %vm3850_vm15 = vcmp.lt.s32.totalorder %v6183_v24, 0  ;;  %v3851_v36 = vceil.f32 %v6183_v24  ;;  %v3852_v1 = vfloor.f32 %v6183_v24 }
 0x4fb   : > { %v2779_v7 = vpop.xlane.xlu1 %2778  ;;  %3030 = vadd.xlane.f32.xlu1 %v2973_v52  ;;  %vm2880_vm0 = vcmp.eq.s32.totalorder %v5618_v2, %v3864_v42 }
 0x4fc   : > { %v6189_v48 = vmin.f32 %v2779_v7, 17.0  ;;  %v3853_v62 = vsel %vm3850_vm15, %v3851_v36, %v3852_v1  ;;  %v3650_v61 = vsel %vm2880_vm0, 1.0, %v6717_v63  ;;  %v6736_v1 = vld [vmem:[#allocation45_spill] sm:$0xff] }
 0x4fd   : > { %v3854_v28 = vcvt.f32.s32 %v3853_v62  ;;  %v6737_v62 = vld [vmem:[#allocation51_spill] sm:$0xff] }
 0x4fe   : > { %6735 = vst [vmem:[#allocation22_spill] sm:$0xff] %v6189_v48  ;;  %vm3855_vm14 = vcmp.lt.s32.totalorder %v6189_v48, 0  ;;  %v3856_v51 = vceil.f32 %v6189_v48  ;;  %v3857_v15 = vfloor.f32 %v6189_v48  ;;  %v2976_v24 = vmul.f32 %v3650_v61, %v6737_v62  ;;  %v6738_v48 = vld [vmem:[#allocation47_spill] sm:$0xff] }
 0x4ff   : > { %v6197_v58 = vpop.xlane.xlu0 %3004  ;;  %vm2878_vm1 = vcmp.eq.s32.totalorder %v5618_v2, %v3854_v28 }
 0x500   : > { %v3120_v29 = vsub.f32 %v6197_v58, %v6195_v38  ;;  %v3648_v42 = vsel %vm2878_vm1, 1.0, %v6717_v63  ;;  %v3858_v36 = vsel %vm3855_vm14, %v3856_v51, %v3857_v15 }
 0x501   : > { %v2974_v52 = vmul.f32 %v3648_v42, %v6736_v1  ;;  %v3859_v7 = vcvt.f32.s32 %v3858_v36  ;;  %v6739_v36 = vld [vmem:[#allocation50_spill] sm:$0xff] }
 0x503   : > { %3032 = vadd.xlane.f32.xlu2 %v2974_v52  ;;  %vm2879_vm2 = vcmp.eq.s32.totalorder %v5618_v2, %v3859_v7  ;;  %3036 = vadd.xlane.f32.xlu1 %v2976_v24  ;;  %v6741_v7 = vsub.f32 %v6002_v46, %v6000_v55 }
 0x504   : > { %v3649_v13 = vsel %vm2879_vm2, 1.0, %v6717_v63 }
 0x505   : > { %v2975_v9 = vmul.f32 %v3649_v13, %v6738_v48  ;;  %v3143_v62 = vsel %vm3141_vm5, %v6741_v7, 0.0 }
 0x507   : > { %3034 = vadd.xlane.f32.xlu0 %v2975_v9  ;;  %v2783_v28 = vpop.xlane.xlu0 %2782  ;;  %v6740_v9 = vsub.f32 %v5995_v31, %v5993_v39  ;;  %v3175_v39 = vsel %vm3140_vm6, %v5800_v10, %v3143_v62  ;;  %v6235_v31 = vpop.xlane.xlu2 %3008 }
 0x508   : > { %v6209_v17 = vmin.f32 %v2783_v28, 17.0  ;;  %v6742_v28 = vsub.f32 %v5988_v25, %v5986_v30  ;;  %v6743_v30 = vsub.f32 %v6031_v4, %v6027_v57 }
 0x509   : > { %v3142_v48 = vsel %vm3141_vm5, %v6740_v9, 0.0 }
 0x50a   : > { %vm3865_vm3 = vcmp.lt.s32.totalorder %v6209_v17, 0  ;;  %v3866_v51 = vceil.f32 %v6209_v17  ;;  %v3867_v15 = vfloor.f32 %v6209_v17  ;;  %v3174_v52 = vsel %vm3140_vm6, %v5790_v20, %v3142_v48 }
 0x50b   : > { %v3144_v20 = vsel %vm3141_vm5, %v6742_v28, 0.0  ;;  %v3145_v25 = vsel %vm3141_vm5, %v6743_v30, 0.0 }
 0x50c   : > { %v3868_v42 = vsel %vm3865_vm3, %v3866_v51, %v3867_v15  ;;  %v3176_v10 = vsel %vm3140_vm6, %v5777_v3, %v3144_v20  ;;  %v3177_v57 = vsel %vm3140_vm6, %v5820_v60, %v3145_v25 }
 0x50d   : > { %v3869_v61 = vcvt.f32.s32 %v3868_v42 }
 0x50f   : > { %vm2881_vm4 = vcmp.eq.s32.totalorder %v5618_v2, %v3869_v61 }
 0x510   : > { %v3651_v24 = vsel %vm2881_vm4, 1.0, %v6717_v63 }
 0x511   : > { %v2977_v1 = vmul.f32 %v3651_v24, %v6739_v36 }
 0x513   : > { %3038 = vadd.xlane.f32.xlu2 %v2977_v1 }
 0x53c   : > { %3206 = vxpose.xlu2.b32.start [1/16] (narrow) %v3174_v52, 8  ;;  %v6744_v52 = vsub.f32 %v6049_v22, %v6044_v19 }
 0x544   : > { %3207 = vxpose.xlu2.b32.cont [2/16] (narrow) %v3175_v39, 8  ;;  %v6745_v39 = vsub.f32 %v6017_v12, %v6013_v18  ;;  %v4088_v12 = vpop.eup %4087 }
 0x545   : > { %v4090_v20 = vpop.eup %4089 }
 0x546   : > { %v2785_v13 = vpop.xlane.xlu1 %2784 }
 0x547   : > { %v6242_v51 = vmin.f32 %v2785_v13, 17.0  ;;  %v3147_v13 = vsel %vm3141_vm5, %v6745_v39, 0.0  ;;  %v6756_v39 = vld [vmem:[#allocation10_spill] sm:$0xff] }
 0x548   : > { %v3179_v19 = vsel %vm3140_vm6, %v5832_v11, %v3147_v13  ;;  %v6747_v11 = vsub.f32 %v6116_v41, %v6113_v35 }
 0x549   : > { %vm3870_vm8 = vcmp.lt.s32.totalorder %v6242_v51, 0  ;;  %v3871_v55 = vceil.f32 %v6242_v51  ;;  %v3872_v46 = vfloor.f32 %v6242_v51 }
 0x54b   : > { %v3873_v15 = vsel %vm3870_vm8, %v3871_v55, %v3872_v46  ;;  %v6312_v55 = vpop.xlane.xlu0 %3010 }
 0x54c   : > { %3208 = vxpose.xlu2.b32.cont [3/16] (narrow) %v3176_v10, 8  ;;  %v3874_v42 = vcvt.f32.s32 %v3873_v15  ;;  %v3079_v10 = vmul.f32 0.6931472, %v4090_v20  ;;  %v4092_v15 = vpop.eup %4091 }
 0x54e   : > { %v2787_v61 = vpop.xlane.xlu2 %2786  ;;  %vm2882_vm7 = vcmp.eq.s32.totalorder %v5618_v2, %v3874_v42  ;;  %v6285_v22 = vpop.xlane.xlu1 %3006  ;;  %v6750_v42 = vsub.f32 %v6157_v56, %v6155_v53  ;;  %v6752_v56 = vsub.f32 %v6168_v8, %v6165_v37  ;;  %v6753_v37 = vsub.f32 %v6145_v27, %v6134_v21 }
 0x54f   : > { %v6256_v24 = vmin.f32 %v2787_v61, 17.0  ;;  %v3652_v36 = vsel %vm2882_vm7, 1.0, %v6717_v63 }
 0x550   : > { %v2978_v1 = vmul.f32 %v3652_v36, %v5606_v26  ;;  %v3146_v26 = vsel %vm3141_vm5, %v6744_v52, 0.0  ;;  %v3151_v61 = vsel %vm3141_vm5, %v6750_v42, 0.0  ;;  %v6751_v36 = vld [vmem:[#allocation55_spill] sm:$0xff] }
 0x551   : > { %vm3875_vm9 = vcmp.lt.s32.totalorder %v6256_v24, 0  ;;  %v3876_v3 = vceil.f32 %v6256_v24  ;;  %v3877_v9 = vfloor.f32 %v6256_v24  ;;  %v3178_v60 = vsel %vm3140_vm6, %v5818_v23, %v3146_v26 }
 0x552   : > { %3040 = vadd.xlane.f32.xlu0 %v2978_v1  ;;  %4093 = vlog2.f32 %v6751_v36  ;;  %v3183_v1 = vsel %vm3140_vm6, %v5900_v59, %v3151_v61  ;;  %v3153_v26 = vsel %vm3141_vm5, %v6753_v37, 0.0 }
 0x553   : > { %v3878_v4 = vsel %vm3875_vm9, %v3876_v3, %v3877_v9  ;;  %v3017_v25 = vpop.xlane.xlu0 %3016  ;;  %v3152_v9 = vsel %vm3141_vm5, %v6752_v56, 0.0  ;;  %4095 = vlog2.f32 %v5422_v5  ;;  %v6754_v5 = vld [vmem:[#allocation49_spill] sm:$0xff]  ;;  %v3185_v21 = vsel %vm3140_vm6, %v6756_v39, %v3153_v26 }
 0x554   : > { %3209 = vxpose.xlu2.b32.cont [4/16] (narrow) %v3177_v57, 8  ;;  %v3879_v48 = vcvt.f32.s32 %v3878_v4  ;;  %4097 = vlog2.f32 %v6754_v5 }
 0x556   : > { %vm2883_vm10 = vcmp.eq.s32.totalorder %v5618_v2, %v3879_v48  ;;  %v3013_v28 = vpop.xlane.xlu1 %3012  ;;  %v3015_v46 = vpop.xlane.xlu2 %3014  ;;  %v3184_v48 = vsel %vm3140_vm6, %v5908_v33, %v3152_v9  ;;  %v6767_v9 = vld [vmem:[#allocation9_spill] sm:$0xff] }
 0x557   : > { %v3653_v7 = vsel %vm2883_vm10, 1.0, %v6717_v63  ;;  %v3149_v63 = vsel %vm3141_vm5, %v6747_v11, 0.0 }
 0x558   : > { %v2979_v62 = vmul.f32 %v3653_v7, %v5613_v0  ;;  %v6746_v0 = vsub.f32 %v6101_v50, %v6095_v14  ;;  %v3077_v14 = vmul.f32 0.6931472, %v4088_v12  ;;  %v3181_v40 = vsel %vm3140_vm6, %v5870_v47, %v3149_v63  ;;  %v4094_v53 = vpop.eup %4093  ;;  %v6758_v12 = vld [vmem:[#allocation57_spill] sm:$0xff] }
 0x559   : > { %v4096_v8 = vpop.eup %4095 }
 0x55a   : > { %3042 = vadd.xlane.f32.xlu1 %v2979_v62  ;;  %v3148_v23 = vsel %vm3141_vm5, %v6746_v0, 0.0  ;;  %v3124_v50 = vsub.f32 %v3013_v28, %v3077_v14  ;;  %v4098_v13 = vpop.eup %4097  ;;  %v6757_v0 = vld [vmem:[#allocation53_spill] sm:$0xff]  ;;  %v6759_v28 = vld [vmem:[#allocation12_spill] sm:$0xff] }
 0x55b   : > { %v3180_v18 = vsel %vm3140_vm6, %v5856_v32, %v3148_v23  ;;  %v6748_v32 = vsub.f32 %v6078_v54, %v6069_v6  ;;  %v3125_v54 = vsub.f32 %v3015_v46, %v3079_v10  ;;  %v3154_v23 = vsel %vm3141_vm5, %v3120_v29, 0.0  ;;  %v6762_v46 = vld [vmem:[#allocation59_spill] sm:$0xff] }
 0x55c   : > { %3210 = vxpose.xlu2.b32.cont [5/16] (narrow) %v3178_v60, 8  ;;  %v3158_v41 = vsel %vm3141_vm5, %v3124_v50, 0.0  ;;  %v3085_v60 = vmul.f32 0.6931472, %v4096_v8  ;;  %v3071_v11 = vmul.f32 0.6931472, %v4098_v13 }
 0x55d   : > { %v3150_v35 = vsel %vm3141_vm5, %v6748_v32, 0.0  ;;  %v3190_v47 = vsel %vm3140_vm6, %v6015_v44, %v3158_v41  ;;  %v3159_v30 = vsel %vm3141_vm5, %v3125_v54, 0.0  ;;  %v3081_v44 = vmul.f32 0.6931472, %v4092_v15  ;;  %v6761_v32 = vld [vmem:[#allocation52_spill] sm:$0xff]  ;;  %v6764_v54 = vld [vmem:[#allocation11_spill] sm:$0xff] }
 0x55e   : > { %v3182_v6 = vsel %vm3140_vm6, %v5858_v49, %v3150_v35  ;;  %v3191_v49 = vsel %vm3140_vm6, %v6023_v34, %v3159_v30  ;;  %v3019_v4 = vpop.xlane.xlu1 %3018  ;;  %v3083_v34 = vmul.f32 0.6931472, %v4094_v53  ;;  %v3021_v62 = vpop.xlane.xlu2 %3020  ;;  %v3121_v58 = vsub.f32 %v6285_v22, %v3071_v11  ;;  %v6766_v53 = vld [vmem:[#allocation14_spill] sm:$0xff] }
 0x55f   : > { %v3126_v3 = vsub.f32 %v3017_v25, %v3081_v44  ;;  %v3128_v27 = vsub.f32 %v3021_v62, %v3085_v60 }
 0x560   : > { %v3127_v52 = vsub.f32 %v3019_v4, %v3083_v34  ;;  %v3155_v35 = vsel %vm3141_vm5, %v3121_v58, 0.0 }
 0x561   : > { %v3160_v57 = vsel %vm3141_vm5, %v3126_v3, 0.0  ;;  %v3187_v15 = vsel %vm3140_vm6, %v6764_v54, %v3155_v35 }
 0x562   : > { %v3192_v59 = vsel %vm3140_vm6, %v6019_v45, %v3160_v57  ;;  %v3161_v7 = vsel %vm3141_vm5, %v3127_v52, 0.0  ;;  %v6755_v45 = vld [vmem:[#allocation56_spill] sm:$0xff] }
 0x563   : > { %4099 = vlog2.f32 %v6755_v45  ;;  %v3193_v33 = vsel %vm3140_vm6, %v6046_v16, %v3161_v7  ;;  %v3162_v16 = vsel %vm3141_vm5, %v3128_v27, 0.0 }
 0x564   : > { %3211 = vxpose.xlu2.b32.cont [6/16] (narrow) %v3179_v19, 8  ;;  %4101 = vlog2.f32 %v6757_v0  ;;  %v3194_v14 = vsel %vm3140_vm6, %v6759_v28, %v3162_v16 }
 0x565   : > { %4103 = vlog2.f32 %v6758_v12 }
 0x566   : > { %4105 = vlog2.f32 %v6761_v32  ;;  %v3025_v43 = vpop.xlane.xlu1 %3024 }
 0x567   : > { %4107 = vlog2.f32 %v6762_v46 }
 0x569   : > { %v4100_v19 = vpop.eup %4099 }
 0x56a   : > { %v3087_v63 = vmul.f32 0.6931472, %v4100_v19  ;;  %v4102_v29 = vpop.eup %4101 }
 0x56b   : > { %v4104_v20 = vpop.eup %4103  ;;  %v3073_v10 = vmul.f32 0.6931472, %v4102_v29 }
 0x56c   : > { %3212 = vxpose.xlu2.b32.cont [7/16] (narrow) %v3180_v18, 8  ;;  %v3023_v18 = vpop.xlane.xlu0 %3022  ;;  %v3089_v22 = vmul.f32 0.6931472, %v4104_v20  ;;  %v4106_v30 = vpop.eup %4105 }
 0x56d   : > { %v3129_v38 = vsub.f32 %v3023_v18, %v3087_v63  ;;  %v3122_v42 = vsub.f32 %v6235_v31, %v3073_v10  ;;  %v4108_v25 = vpop.eup %4107  ;;  %v3075_v31 = vmul.f32 0.6931472, %v4106_v30 }
 0x56e   : > { %v3130_v61 = vsub.f32 %v3025_v43, %v3089_v22  ;;  %v3091_v3 = vmul.f32 0.6931472, %v4108_v25 }
 0x56f   : > { %v3163_v41 = vsel %vm3141_vm5, %v3129_v38, 0.0  ;;  %v3156_v36 = vsel %vm3141_vm5, %v3122_v42, 0.0  ;;  %v3123_v4 = vsub.f32 %v6312_v55, %v3075_v31 }
 0x570   : > { %v3164_v44 = vsel %vm3141_vm5, %v3130_v61, 0.0  ;;  %v3188_v57 = vsel %vm3140_vm6, %v6767_v9, %v3156_v36 }
 0x571   : > { %v3196_v56 = vsel %vm3140_vm6, %v6766_v53, %v3164_v44 }
 0x574   : > { %3213 = vxpose.xlu2.b32.cont [8/16] (narrow) %v3181_v40, 8  ;;  %v6760_v40 = vld [vmem:[#allocation8_spill] sm:$0xff] }
 0x575   : > { %v3186_v50 = vsel %vm3140_vm6, %v6760_v40, %v3154_v23 }
 0x57b   : > { %3238 = vxpose.xlu0.b32.start [1/16] (narrow) %v3190_v47, 8  ;;  %v6763_v47 = vld [vmem:[#allocation16_spill] sm:$0xff] }
 0x57c   : > { %3214 = vxpose.xlu2.b32.cont [9/16] (narrow) %v3182_v6, 8  ;;  %v3195_v6 = vsel %vm3140_vm6, %v6763_v47, %v3163_v41 }
 0x583   : > { %3239 = vxpose.xlu0.b32.cont [2/16] (narrow) %v3191_v49, 8  ;;  %v3027_v49 = vpop.xlane.xlu2 %3026 }
 0x584   : > { %3215 = vxpose.xlu2.b32.cont [10/16] (narrow) %v3183_v1, 8  ;;  %v6765_v1 = vld [vmem:[#allocation58_spill] sm:$0xff]  ;;  %v3131_v34 = vsub.f32 %v3027_v49, %v3091_v3 }
 0x585   : > { %4109 = vlog2.f32 %v6765_v1 }
 0x58b   : > { %3240 = vxpose.xlu0.b32.cont [3/16] (narrow) %v3192_v59, 8 }
 0x58c   : > { %3216 = vxpose.xlu2.b32.cont [11/16] (narrow) %v3184_v48, 8 }
 0x593   : > { %3241 = vxpose.xlu0.b32.cont [4/16] (narrow) %v3193_v33, 8 }
 0x594   : > { %3217 = vxpose.xlu2.b32.cont [12/16] (narrow) %v3185_v21, 8 }
 0x59b   : > { %3242 = vxpose.xlu0.b32.cont [5/16] (narrow) %v3194_v14, 8 }
 0x59c   : > { %3218 = vxpose.xlu2.b32.cont [13/16] (narrow) %v3186_v50, 8 }
 0x5a3   : > { %3243 = vxpose.xlu0.b32.cont [6/16] (narrow) %v3195_v6, 8 }
 0x5a4   : > { %3219 = vxpose.xlu2.b32.cont [14/16] (narrow) %v3187_v15, 8 }
 0x5ab   : > { %3244 = vxpose.xlu0.b32.cont [7/16] (narrow) %v3196_v56, 8 }
 0x5ac   : > { %3220 = vxpose.xlu2.b32.cont [15/16] (narrow) %v3188_v57, 8 }
 0x5ad   : > { %4152 = shalt.err (!%p4149_p3)
}
 0x5ae   : > { %s4223_s0 = smov 128   ;;  %s4224_s1 = smov 8   ;;  %v4110_v55 = vpop.eup %4109  ;;  %v3157_v59 = vsel %vm3141_vm5, %v3123_v4, 0.0  ;;  %v3165_v48 = vsel %vm3141_vm5, %v3131_v34, 0.0  ;;  %v3029_v52 = vpop.xlane.xlu0 %3028  ;;  %v6768_v8 = vld [vmem:[#allocation60_spill] sm:$0xff]  ;;  %v6769_v26 = vld [vmem:[#allocation19_spill] sm:$0xff] }
 0x5af   : > { %3881 = dma.vmem_to_hbm [thread:$0]  (%p4318_p5), %s3311_s26, 4096, %s3313_s28, %s3283_s30, %s4223_s0, %s4223_s0, %s4224_s1   ;;  %4111 = vlog2.f32 %v6768_v8  ;;  %v3093_v37 = vmul.f32 0.6931472, %v4110_v55  ;;  %v3197_v5 = vsel %vm3140_vm6, %v6769_v26, %v3165_v48  ;;  %v6770_v7 = vld [vmem:[#allocation13_spill] sm:$0xff]  ;;  %v3031_v39 = vpop.xlane.xlu1 %3030  ;;  %v3033_v18 = vpop.xlane.xlu2 %3032  ;;  %v6773_v12 = vld [vmem:[#allocation62_spill] sm:$0xff]  ;;  %v6774_v63 = vld [vmem:[#allocation15_spill] sm:$0xff] }
 0x5b0   : > { %v3189_v45 = vsel %vm3140_vm6, %v6770_v7, %v3157_v59  ;;  %v6771_v21 = vld [vmem:[#allocation61_spill] sm:$0xff]  ;;  %v6775_v58 = vld [vmem:[#allocation64_spill] sm:$0xff]  ;;  %v6776_v20 = vld [vmem:[#allocation26_spill] sm:$0xff]  ;;  %s3424_s0 = sshll.u32 %s5004_s12, 2  ;;  %s3702_s1 = sshll.u32 %s4301_s17, 2  ;;  %vm3273_vm11 = vcmask 1041408  }
 0x5b1   : > { %v3132_v62 = vsub.f32 %v3029_v52, %v3093_v37  ;;  %4113 = vlog2.f32 %v6771_v21  ;;  %v6772_v13 = vld [vmem:[#allocation17_spill] sm:$0xff]  ;;  %v6777_v10 = vld [vmem:[#allocation63_spill] sm:$0xff]  ;;  %v6778_v47 = vld [vmem:[#allocation22_spill] sm:$0xff]  ;;  %s3294_s30 = scalar_lea.hbm %s6520_s9, %s3702_s1  ;;  %s373_s11 = scalar_lea.vmem [#allocation2], %s3424_s0 }
 0x5b2   : > { %4115 = vlog2.f32 %v6773_v12  ;;  %v6779_v30 = vld [vmem:[#allocation65_spill] sm:$0xff]  ;;  %v6780_v36 = vld [vmem:[#allocation18_spill] sm:$0xff]  ;;  %s3296_s18 = sshll.u32 %s373_s11, 4  ;;  %s3298_s27 = sshll.u32 %s3294_s30, 4  ;;  %s3297_s18 = int_to_ptr.vmem [resolvable:$true] %s3296_s18  ;;  %s3299_s27 = int_to_ptr.hbm [resolvable:$true] %s3298_s27 }
 0x5b3   : > { %3245 = vxpose.xlu0.b32.cont [8/16] (narrow) %v3197_v5, 8  ;;  %v3166_v33 = vsel %vm3141_vm5, %v3132_v62, 0.0  ;;  %4117 = vlog2.f32 %v6775_v58  ;;  %v6781_v53 = vld [vmem:[#allocation66_spill] sm:$0xff]  ;;  %s3278_s29 = scalar_lea.sflag [#allocation3], %s5004_s12  ;;  %s4167_s25 = sshra.s32 %s3299_s27, 4  ;;  %s4168_s25 = int_to_ptr.hbm [resolvable:$true] %s4167_s25 }
 0x5b4   : > { %3221 = vxpose.xlu2.b32.end [16/16] (narrow) %v3189_v45, 8  ;;  %v3198_v19 = vsel %vm3140_vm6, %v6772_v13, %v3166_v33  ;;  %4119 = vlog2.f32 %v6777_v10  ;;  %s4169_s17 = scalar_lea.hbm %s4168_s25, 4  ;;  %s4173_s0 = scalar_lea.hbm %s6520_s9, 8 }
 0x5b5   : > { %v4112_v60 = vpop.eup %4111  ;;  %4121 = vlog2.f32 %v6779_v30  ;;  %p4170_p4 = scmp.ne.s32.totalorder %s4168_s25, %s4169_s17  ;;  %p4174_p9 = scmp.lt.s32.totalorder %s4168_s25, %s6520_s9 }
 0x5b6   : > { %v3095_v27 = vmul.f32 0.6931472, %v4112_v60  ;;  %v3035_v38 = vpop.xlane.xlu0 %3034  ;;  %4123 = vlog2.f32 %v6781_v53  ;;  %p4175_p10 = scmp.lt.s32.totalorder %s4173_s0, %s4169_s17 }
 0x5b7   : > { %v4114_v23 = vpop.eup %4113  ;;  %v3037_v46 = vpop.xlane.xlu1 %3036  ;;  %p4171_p7 = pnand %p4170_p4, %p4318_p5 }
 0x5b8   : > { %v3133_v0 = vsub.f32 %v3031_v39, %v3095_v27  ;;  %v3097_v11 = vmul.f32 0.6931472, %v4114_v23  ;;  %v4116_v40 = vpop.eup %4115  ;;  %v3039_v61 = vpop.xlane.xlu2 %3038  ;;  %p4176_p11 = por %p4175_p10, %p4174_p9 }
 0x5b9   : > { %v3099_v29 = vmul.f32 0.6931472, %v4116_v40  ;;  %v4118_v41 = vpop.eup %4117  ;;  %p4172_p8 = pneg %p4171_p7 }
 0x5ba   : > { %v3167_v16 = vsel %vm3141_vm5, %v3133_v0, 0.0  ;;  %v3134_v14 = vsub.f32 %v3033_v18, %v3097_v11  ;;  %v3101_v22 = vmul.f32 0.6931472, %v4118_v41  ;;  %v4120_v15 = vpop.eup %4119 }
 0x5bb   : > { %3246 = vxpose.xlu0.b32.cont [9/16] (narrow) %v3198_v19, 8  ;;  %v3199_v28 = vsel %vm3140_vm6, %v6774_v63, %v3167_v16  ;;  %v3135_v35 = vsub.f32 %v3035_v38, %v3099_v29  ;;  %v3103_v25 = vmul.f32 0.6931472, %v4120_v15  ;;  %v4122_v1 = vpop.eup %4121  ;;  %p4177_p12 = pnand %p4176_p11, %p4172_p8 }
 0x5bc   : > { %v3168_v50 = vsel %vm3141_vm5, %v3134_v14, 0.0  ;;  %v3136_v54 = vsub.f32 %v3037_v46, %v3101_v22  ;;  %v3105_v56 = vmul.f32 0.6931472, %v4122_v1  ;;  %v4124_v4 = vpop.eup %4123 }
 0x5bd   : > { %v3200_v32 = vsel %vm3140_vm6, %v6776_v20, %v3168_v50  ;;  %v3169_v43 = vsel %vm3141_vm5, %v3135_v35, 0.0  ;;  %v3137_v49 = vsub.f32 %v3039_v61, %v3103_v25  ;;  %v3107_v59 = vmul.f32 0.6931472, %v4124_v4 }
 0x5be   : > { %v3201_v6 = vsel %vm3140_vm6, %v6778_v47, %v3169_v43  ;;  %v3170_v42 = vsel %vm3141_vm5, %v3136_v54, 0.0 }
 0x5bf   : > { %v3202_v44 = vsel %vm3140_vm6, %v6780_v36, %v3170_v42  ;;  %v3171_v31 = vsel %vm3141_vm5, %v3137_v49, 0.0 }
 0x5c0   : > { %v3203_v9 = vsel %vm3140_vm6, %v6209_v17, %v3171_v31 }
 0x5c3   : > { %3247 = vxpose.xlu0.b32.cont [10/16] (narrow) %v3199_v28, 8 }
 0x5c5   : > { %v3041_v3 = vpop.xlane.xlu0 %3040 }
 0x5c6   : > { %v3138_v57 = vsub.f32 %v3041_v3, %v3105_v56 }
 0x5c8   : > { %v3172_v34 = vsel %vm3141_vm5, %v3138_v57, 0.0 }
 0x5c9   : > { %v3204_v48 = vsel %vm3140_vm6, %v6242_v51, %v3172_v34 }
 0x5cb   : > { %3248 = vxpose.xlu0.b32.cont [11/16] (narrow) %v3200_v32, 8 }
 0x5cd   : > { %v3043_v55 = vpop.xlane.xlu1 %3042 }
 0x5ce   : > { %v3139_v52 = vsub.f32 %v3043_v55, %v3107_v59 }
 0x5d0   : > { %v3173_v8 = vsel %vm3141_vm5, %v3139_v52, 0.0 }
 0x5d1   : > { %v3205_v17 = vsel %vm3140_vm6, %v6256_v24, %v3173_v8 }
 0x5d3   : > { %3249 = vxpose.xlu0.b32.cont [12/16] (narrow) %v3201_v6, 8 }
 0x5d5   : > { %v3222_v37 = vpop.trf.xlu2 }
 0x5db   : > { %3250 = vxpose.xlu0.b32.cont [13/16] (narrow) %v3202_v44, 8 }
 0x5e3   : > { %3251 = vxpose.xlu0.b32.cont [14/16] (narrow) %v3203_v9, 8 }
 0x5eb   : > { %3252 = vxpose.xlu0.b32.cont [15/16] (narrow) %v3204_v48, 8 }
 0x5f3   : > { %3253 = vxpose.xlu0.b32.end [16/16] (narrow) %v3205_v17, 8 }
 0x61f   : > { %v3254_v51 = vpop.trf.xlu0 }
 0x620   : > { %v3272_v26 = vrot.slane %v3254_v51, 6 }
 0x622   : > { %v3274_v2 = vsel %vm3273_vm11, %v3222_v37, %v3272_v26 }
 0x623   : > { %3276 = vst [vmem:[%s373_s11] sm:$0xf] %v3274_v2 }
 0x624   : > { %4180 = shalt.err (!%p4177_p12)
}
 0x625   : > { %3880 = dma.vmem_to_hbm [thread:$0]  (%p4318_p5), %s3297_s18, 64, %s3299_s27, %s3278_s29  }
 0x626 PF: > { %p3891_p13 = scmp.ge.s32.totalorder %s4219_s16, 2  ;;  %s3327_s12 = sand.u32 1, %s4207_s13  }
 0x627   : > { %s3328_s28 = scalar_lea.sflag [#allocation3], %s3327_s12 }
 0x628   : > { %p3885_p0 = pnand %p3891_p13, %p4322_p6 }
 0x62a   : > { %p3886_p1 = pneg %p3885_p0 }
 0x62c   : > { %4198 = dma.done.wait (%p3886_p1), %s3328_s28, 64  }
 0x62d   : > { %4200 = vsyncadd (%p3886_p1), %s3328_s28, 4294967232  ;;  %s3338_s30 = scalar_lea.sflag [#allocation5], %s3327_s12 }
 0x62e   : > { %4202 = dma.done.wait (%p3886_p1), %s3338_s30, 4096  }
 0x62f   : > { %4204 = vsyncadd (%p3886_p1), %s3338_s30, 4294963200  ;;  %p24_p5 = scmp.ge.s32.totalorder %s4305_s19, 4   ;;  %s6782_s13 = smov %s4211_s14 }
 0x630   : > { %s6783_s14 = smov %s4215_s15  ;;  %s6784_s15 = smov %s4316_s22 }
 0x631   : > { %s6785_s16 = smov %s4305_s19  ;;  %26 = sbr.rel (!%p24_p5) target bundleno = 8 (0x8), region = 111 }
 0x636   :  { %3344 = vsyncpa [#allocation3], 1 }
 0x637   :  { %3346 = vsyncpa [#allocation3 + $0x1], 1 }
 0x638   :  { %3347 = vsyncpa [#allocation5], 1 }
 0x639   :  { %3349 = vsyncpa [#allocation5 + $0x1], 1 }

</bundles_post_ra>
